<compile_context>
chip_gen: v7x
topology: tpu7x:2x2x1
jax: 0.10.0
libtpu: 0.0.40
codegen_flags: <defaults>
</compile_context>

<pallas_src>
import math
import functools
import numpy as np

import jax
import jax.numpy as jnp
from jax.experimental import pallas as pl
from jax.experimental.pallas import tpu as pltpu


STANDARD_NET_SHAPE = (3, 64, 64)   # from RepresentationNetwork.__init__
NET_INPUT_CHANNELS = 7
N_CHANNEL_PER_NET = 7
CLIP_KERNEL_SIZE = 5


def _round_up(x, m):
    return (x + m - 1) // m * m


# --------------------------------------------------------------------------
# Pallas kernel: fused (im2col-matmul conv) + folded-BN affine + residual + ReLU
#   out[Coutp, TM] = relu?( W[Coutp,K] @ P[K,TM] + shift[Coutp,1] (+ R[Coutp,TM]) )
#   (BN scale pre-folded into W rows; shift = bias*scale + bn_shift.)
# --------------------------------------------------------------------------
def _fused_conv_kernel(w_ref, p_ref, sh_ref, *rest, apply_relu, has_residual):
    if has_residual:
        r_ref, o_ref = rest
    else:
        (o_ref,) = rest
    acc = jnp.dot(w_ref[...], p_ref[...], preferred_element_type=jnp.float32)
    out = acc + sh_ref[...]
    if has_residual:
        out = out + r_ref[...]
    if apply_relu:
        out = jnp.maximum(out, 0.0)
    o_ref[...] = out


def _pick_tile(M):
    """Lane tile for the spatial axis M: big tiles (fewer grid steps / less
    per-step overhead) but keep >=2 grid steps when M is large enough so both
    v7x TensorCores get work under dimension_semantics=('parallel',)."""
    Mp128 = _round_up(M, 128)
    if Mp128 >= 4096:
        tm = 2048
    elif Mp128 >= 256:
        tm = _round_up(Mp128 // 2, 128)
    else:
        tm = 128
    return tm, _round_up(M, tm)


def fused_conv_matmul(wmat, shift, patches_t, residual=None, apply_relu=False,
                      cout=None):
    """wmat: [Coutp, K] bf16 (BN scale folded in), shift: [Coutp, 1] f32,
    patches_t: [K, M] bf16, residual: [Cout, M] f32 or None -> out[cout, M] f32."""
    coutp, K = wmat.shape
    M = patches_t.shape[1]
    TM, Mp = _pick_tile(M)
    if Mp != M:
        patches_t = jnp.pad(patches_t, ((0, 0), (0, Mp - M)))

    has_res = residual is not None
    args = [wmat, patches_t, shift]
    in_specs = [
        pl.BlockSpec((coutp, K), lambda i: (0, 0)),   # weight (full, resident)
        pl.BlockSpec((K, TM), lambda i: (0, i)),      # patches tile (lane-dense M)
        pl.BlockSpec((coutp, 1), lambda i: (0, 0)),   # per-channel shift
    ]
    if has_res:
        r = jnp.pad(residual.astype(jnp.float32),
                    ((0, coutp - residual.shape[0]), (0, Mp - M)))
        args.append(r)
        in_specs.append(pl.BlockSpec((coutp, TM), lambda i: (0, i)))

    out = pl.pallas_call(
        functools.partial(_fused_conv_kernel, apply_relu=apply_relu,
                          has_residual=has_res),
        out_shape=jax.ShapeDtypeStruct((coutp, Mp), jnp.float32),
        grid_spec=pltpu.PrefetchScalarGridSpec(
            num_scalar_prefetch=0,
            grid=(Mp // TM,),
            in_specs=in_specs,
            out_specs=pl.BlockSpec((coutp, TM), lambda i: (0, i)),
        ),
        compiler_params=pltpu.CompilerParams(dimension_semantics=("parallel",)),
    )(*args)
    return out[:cout, :M]


# --------------------------------------------------------------------------
# Plain-JAX glue: im2col (channels-first, [K, M] layout), conv wrapper,
# residual block, clip, paths
# --------------------------------------------------------------------------
def _im2col_3d_t(x, ksize, stride, pad):
    """x: [C, D, H, W] -> (patches [C*kd*kh*kw, Do*Ho*Wo], (Do,Ho,Wo)).
    K ordering = (Cin, kd, kh, kw) row-major, matching torch weight.reshape(Cout, -1).
    Channels-first layout: no transposes, spatial axis lands on the lane dim."""
    C, D, H, W = x.shape
    kd, kh, kw = ksize
    sd, sh_, sw = stride
    pd, ph, pw = pad
    xp = jnp.pad(x, ((0, 0), (pd, pd), (ph, ph), (pw, pw)))
    Dp, Hp, Wp = D + 2 * pd, H + 2 * ph, W + 2 * pw
    Do = (Dp - kd) // sd + 1
    Ho = (Hp - kh) // sh_ + 1
    Wo = (Wp - kw) // sw + 1
    slices = []
    for dz in range(kd):
        for dy in range(kh):
            for dx in range(kw):
                slices.append(xp[:, dz:dz + sd * (Do - 1) + 1:sd,
                                    dy:dy + sh_ * (Ho - 1) + 1:sh_,
                                    dx:dx + sw * (Wo - 1) + 1:sw])   # [C,Do,Ho,Wo]
    p = jnp.stack(slices, axis=1)                                    # [C,kvol,Do,Ho,Wo]
    return p.reshape(C * kd * kh * kw, Do * Ho * Wo), (Do, Ho, Wo)


def conv3d_fused(x, w, b, stride=(1, 1, 1), pad=(1, 1, 1),
                 bn_scale=None, bn_shift=None, residual=None, relu=False):
    """x: [Cin, D, H, W]; w: [Cout, Cin, kd, kh, kw]; b: [Cout] -> [Cout, Do, Ho, Wo]."""
    Cout = w.shape[0]
    ksize = tuple(w.shape[2:])
    if bn_scale is None:
        scale = jnp.ones((Cout,), jnp.float32)
        shift = b.astype(jnp.float32)
    else:
        scale = bn_scale
        shift = b * bn_scale + bn_shift
    coutp = _round_up(Cout, 8)
    # Fold BN scale into the weight rows; bf16 for the MXU-native path.
    wmat = (w.reshape(Cout, -1) * scale[:, None]).astype(jnp.bfloat16)
    wmat = jnp.pad(wmat, ((0, coutp - Cout), (0, 0)))
    shift_p = jnp.pad(shift.reshape(Cout, 1).astype(jnp.float32),
                      ((0, coutp - Cout), (0, 0)))

    patches_t, (Do, Ho, Wo) = _im2col_3d_t(x.astype(jnp.bfloat16), ksize, stride, pad)
    res = None
    if residual is not None:
        res = residual.reshape(Cout, Do * Ho * Wo)
    out = fused_conv_matmul(wmat, shift_p, patches_t, res, relu, cout=Cout)
    return out.reshape(Cout, Do, Ho, Wo)


def bn_fold(gamma, beta, mean, var, eps=1e-5):
    scale = gamma / jnp.sqrt(var + eps)
    shift = beta - mean * scale
    return scale, shift


def residual_block(x, p):
    """ResidualBlock: conv3x3x3 -> BN -> relu -> conv3x3x3 -> BN -> +x -> relu."""
    h = conv3d_fused(x, p['w1'], p['b1'],
                     bn_scale=p['bn1_scale'], bn_shift=p['bn1_shift'], relu=True)
    out = conv3d_fused(h, p['w2'], p['b2'],
                       bn_scale=p['bn2_scale'], bn_shift=p['bn2_shift'],
                       residual=x, relu=True)
    return out


def clip_conv(x, w, b, standard=STANDARD_NET_SHAPE, clip_kernel_size=CLIP_KERNEL_SIZE):
    """Reproduces baseline `clip`: stride from exceed-length, k=5/pad=1 conv, then
    zero-pad each spatial dim (at the end) up to `standard`."""
    C, D, H, W = x.shape
    shape = (D, H, W)
    assert min(shape) >= clip_kernel_size
    stride = tuple(math.ceil(max(0, shape[i] - standard[i]) / standard[i]) + 1
                   for i in range(3))
    assert max(stride) <= clip_kernel_size, 'stride:%s' % (stride,)
    out = conv3d_fused(x, w, b, stride=stride, pad=(1, 1, 1))
    _, Do, Ho, Wo = out.shape
    out = jnp.pad(out, ((0, 0),
                        (0, max(0, standard[0] - Do)),
                        (0, max(0, standard[1] - Ho)),
                        (0, max(0, standard[2] - Wo))))
    return out


def ob_path(obstacle_grid, params):
    """obstacle_grid: [D, H, W] -> [hidden_dim=64]."""
    x = obstacle_grid[None]                                    # [1, D, H, W]
    x = residual_block(x, params['ob_conv1'])
    x = clip_conv(x, params['ob_align_conv1_w'], params['ob_align_conv1_b'])
    x = residual_block(x, params['ob_conv2'])
    x = conv3d_fused(x, params['ob_align_conv2_w'], params['ob_align_conv2_b'],
                     stride=(1, 1, 1), pad=(0, 0, 1))          # [1,1,1,64]
    return x.reshape(-1)


def net_path(net_grid, params):
    """net_grid: [7, D, H, W] -> [hidden_dim=64]."""
    x = residual_block(net_grid, params['net_conv1'])
    x = clip_conv(x, params['net_align_conv1_w'], params['net_align_conv1_b'])
    x = residual_block(x, params['net_conv2'])
    x = conv3d_fused(x, params['net_align_conv2_w'], params['net_align_conv2_b'],
                     stride=(1, 1, 1), pad=(0, 0, 1))
    return x.reshape(-1)


def _ob_path_batched(obs_stack, params):      # [B, D, H, W] -> [B, 64]
    return jnp.stack([ob_path(obs_stack[i], params)
                      for i in range(obs_stack.shape[0])])


def _net_path_batched(net_stack, params):     # [N, 7, D, H, W] -> [N, 64]
    return jnp.stack([net_path(net_stack[i], params)
                      for i in range(net_stack.shape[0])])


OB_PATH_BATCH = jax.jit(_ob_path_batched)
NET_PATH_BATCH = jax.jit(_net_path_batched)


def get_net_order(order_grid):
    """Host-side replica of _getNetOrder: flattened values >= 1, in order."""
    o = np.asarray(order_grid, dtype=np.float32).reshape(-1)
    return [int(v) for v in o[o >= 1.0]]


def representation_forward(x_list, params):
    """x_list: list of arrays [2 + 7*nNet, D, H, W] (ch0 obstacles, ch1 netOrder,
    ch2.. netGrids).  Returns (representation_list, action_mapping_list)."""
    # --- obstacle path, batched per spatial shape ---
    obs_groups = {}
    for b, xi in enumerate(x_list):
        obs_groups.setdefault(tuple(np.asarray(xi[0]).shape), []).append(b)
    obs_results = {}
    for _, idxs in obs_groups.items():
        stack = jnp.stack([jnp.asarray(x_list[b][0], jnp.float32) for b in idxs])
        res = OB_PATH_BATCH(stack, params)
        for j, b in enumerate(idxs):
            obs_results[b] = res[j]
    obs_list = [obs_results[b] for b in range(len(x_list))]

    # --- net order (host side) ---
    net_orders = [get_net_order(xi[1]) for xi in x_list]

    # --- net path: gather all nets across samples, batched per shape ---
    net_groups = {}
    for b, xi in enumerate(x_list):
        grids = np.asarray(xi[2:], np.float32)
        n_net = grids.shape[0] // N_CHANNEL_PER_NET
        assert n_net == len(net_orders[b])
        for i in range(n_net):
            net = grids[i * N_CHANNEL_PER_NET:(i + 1) * N_CHANNEL_PER_NET]
            net_groups.setdefault(net.shape, []).append((b, i, net))
    net_results = {}
    for _, items in net_groups.items():
        stack = jnp.stack([jnp.asarray(net, jnp.float32) for (_, _, net) in items])
        res = NET_PATH_BATCH(stack, params)
        for j, (b, i, _) in enumerate(items):
            net_results[(b, i)] = res[j]

    action_mapping_list = []
    for b in range(len(x_list)):
        mapping = {}
        for i in range(len(net_orders[b])):
            mapping[net_orders[b][i]] = net_results[(b, i)]
        action_mapping_list.append(mapping)

    return obs_list, action_mapping_list


# --------------------------------------------------------------------------
# Deterministic parameter init (synthetic; shapes from RepresentationNetwork.__init__)
# --------------------------------------------------------------------------
def _init_resblock(key, c):
    ks = jax.random.split(key, 6)

    def bn(k):
        g = 1.0 + 0.1 * jax.random.normal(jax.random.fold_in(k, 0), (c,), jnp.float32)
        beta = 0.1 * jax.random.normal(jax.random.fold_in(k, 1), (c,), jnp.float32)
        mean = 0.1 * jax.random.normal(jax.random.fold_in(k, 2), (c,), jnp.float32)
        var = jnp.abs(1.0 + 0.1 * jax.random.normal(jax.random.fold_in(k, 3), (c,), jnp.float32))
        return bn_fold(g, beta, mean, var)

    s1, sh1 = bn(ks[2])
    s2, sh2 = bn(ks[5])
    return {
        'w1': 0.05 * jax.random.normal(ks[0], (c, c, 3, 3, 3), jnp.float32),
        'b1': 0.05 * jax.random.normal(ks[1], (c,), jnp.float32),
        'bn1_scale': s1, 'bn1_shift': sh1,
        'w2': 0.05 * jax.random.normal(ks[3], (c, c, 3, 3, 3), jnp.float32),
        'b2': 0.05 * jax.random.normal(ks[4], (c,), jnp.float32),
        'bn2_scale': s2, 'bn2_shift': sh2,
    }


def init_params(key):
    C = NET_INPUT_CHANNELS
    D0, H0, _ = STANDARD_NET_SHAPE
    ks = jax.random.split(key, 12)
    p = {}
    p['net_conv1'] = _init_resblock(ks[0], C)
    p['net_align_conv1_w'] = 0.05 * jax.random.normal(ks[1], (C, C, 5, 5, 5), jnp.float32)
    p['net_align_conv1_b'] = 0.05 * jax.random.normal(ks[2], (C,), jnp.float32)
    p['net_conv2'] = _init_resblock(ks[3], C)
    p['net_align_conv2_w'] = 0.05 * jax.random.normal(ks[4], (1, C, D0, H0, 3), jnp.float32)
    p['net_align_conv2_b'] = 0.05 * jax.random.normal(ks[5], (1,), jnp.float32)
    p['ob_conv1'] = _init_resblock(ks[6], 1)
    p['ob_align_conv1_w'] = 0.05 * jax.random.normal(ks[7], (C, 1, 5, 5, 5), jnp.float32)
    p['ob_align_conv1_b'] = 0.05 * jax.random.normal(ks[8], (C,), jnp.float32)
    p['ob_conv2'] = _init_resblock(ks[9], C)
    p['ob_align_conv2_w'] = 0.05 * jax.random.normal(ks[10], (1, C, D0, H0, 3), jnp.float32)
    p['ob_align_conv2_b'] = 0.05 * jax.random.normal(ks[11], (1,), jnp.float32)
    return p


if __name__ == "__main__":
    key = jax.random.PRNGKey(0)
    pkey, dkey = jax.random.split(key)
    params = init_params(pkey)

    # Small shapes consistent with the module: batch=2, 1 net per sample,
    # spatial grid D,H,W = 5,8,8 (clip requires min spatial >= 5).
    batch, n_net, D, H, W = 2, 1, 5, 8, 8
    dkeys = jax.random.split(dkey, batch)
    x_list = []
    for b in range(batch):
        xi = np.array(jax.random.normal(dkeys[b], (2 + N_CHANNEL_PER_NET * n_net, D, H, W),
                                        jnp.float32))
        # channel 1 encodes the net order: exactly n_net values >= 1.
        order_plane = np.zeros((D, H, W), np.float32)
        order_plane.reshape(-1)[:n_net] = np.arange(1, n_net + 1, dtype=np.float32)
        xi[1] = order_plane
        x_list.append(xi)

    reps, mappings = representation_forward(x_list, params)

    reps = [jax.block_until_ready(r) for r in reps]
    for m in mappings:
        for v in m.values():
            jax.block_until_ready(v)

    assert len(reps) == batch and all(r.shape == (64,) for r in reps)
    assert len(mappings) == batch
    assert all(v.shape == (64,) for m in mappings for v in m.values())
    assert all(np.all(np.isfinite(np.asarray(r))) for r in reps)
    print("KERNEL_OK")
</pallas_src>

<mosaic_0001>
module attributes {stable_mosaic.version = 11 : i64} {
  func.func @_fused_conv_kernel(%arg0: i32, %arg1: memref<8x27xbf16, #tpu.memory_space<vmem>>, %arg2: memref<27x256xbf16, #tpu.memory_space<vmem>>, %arg3: memref<8x1xf32, #tpu.memory_space<vmem>>, %arg4: memref<8x256xf32, #tpu.memory_space<vmem>>) attributes {dimension_semantics = [#tpu.dimension_semantics<parallel>], iteration_bounds = array<i64: 2>, scalar_prefetch = 0 : i64, scratch_operands = 0 : i64, tpu.core_type = #tpu.core_type<tc>, window_params = [{pipeline_mode = #tpu.pipeline_mode<synchronous>, transform_indices = @transform_0, window_bounds = array<i64: 8, 27>}, {transform_indices = @transform_1, window_bounds = array<i64: 27, 256>}, {pipeline_mode = #tpu.pipeline_mode<synchronous>, transform_indices = @transform_2, window_bounds = array<i64: 8, 1>}, {transform_indices = @transform_3, window_bounds = array<i64: 8, 256>}]} {
    %c0 = arith.constant 0 : index
    %c0_0 = arith.constant 0 : index
    %0 = vector.load %arg1[%c0, %c0_0] : memref<8x27xbf16, #tpu.memory_space<vmem>>, vector<8x27xbf16>
    %c0_1 = arith.constant 0 : index
    %c0_2 = arith.constant 0 : index
    %1 = vector.load %arg2[%c0_1, %c0_2] : memref<27x256xbf16, #tpu.memory_space<vmem>>, vector<27x256xbf16>
    %cst = arith.constant dense<0.000000e+00> : vector<8x256xf32>
    %2 = tpu.matmul %0, %1, %cst {dimension_numbers = #tpu.dot_dimension_numbers<[1], [0], [0], [1], [0, 0, 1, 1], [], []>} : vector<8x27xbf16>, vector<27x256xbf16>, vector<8x256xf32> -> vector<8x256xf32>
    %c0_3 = arith.constant 0 : index
    %c0_4 = arith.constant 0 : index
    %3 = vector.load %arg3[%c0_3, %c0_4] : memref<8x1xf32, #tpu.memory_space<vmem>>, vector<8x1xf32>
    %4 = vector.broadcast %3 : vector<8x1xf32> to vector<8x256xf32>
    %5 = arith.addf %2, %4 : vector<8x256xf32>
    %cst_5 = arith.constant 0.000000e+00 : f32
    %6 = vector.broadcast %cst_5 : f32 to vector<8x256xf32>
    %7 = arith.maximumf %5, %6 : vector<8x256xf32>
    %c0_6 = arith.constant 0 : index
    %c0_7 = arith.constant 0 : index
    %8 = vector.load %arg4[%c0_6, %c0_7] : memref<8x256xf32, #tpu.memory_space<vmem>>, vector<8x256xf32>
    tpu.vector_store %arg4[%c0_6, %c0_7], %7 {strides = array<i32>} : memref<8x256xf32, #tpu.memory_space<vmem>>, vector<8x256xf32>,
    return
  }
  func.func @transform_0(%arg0: i32) -> (i32, i32) {
    %c0_i32 = arith.constant 0 : i32
    %c0_i32_0 = arith.constant 0 : i32
    %c0_i32_1 = arith.constant 0 : i32
    return %c0_i32, %c0_i32_0 : i32, i32
  }
  func.func @transform_1(%arg0: i32) -> (i32, i32) {
    %c0_i32 = arith.constant 0 : i32
    %c0_i32_0 = arith.constant 0 : i32
    return %c0_i32, %arg0 : i32, i32
  }
  func.func @transform_2(%arg0: i32) -> (i32, i32) {
    %c0_i32 = arith.constant 0 : i32
    %c0_i32_0 = arith.constant 0 : i32
    %c0_i32_1 = arith.constant 0 : i32
    return %c0_i32, %c0_i32_0 : i32, i32
  }
  func.func @transform_3(%arg0: i32) -> (i32, i32) {
    %c0_i32 = arith.constant 0 : i32
    %c0_i32_0 = arith.constant 0 : i32
    return %c0_i32, %arg0 : i32, i32
  }
}

module attributes {stable_mosaic.version = 11 : i64} {
  func.func @_fused_conv_kernel(%arg0: i32, %arg1: memref<8x27xbf16, #tpu.memory_space<vmem>>, %arg2: memref<27x256xbf16, #tpu.memory_space<vmem>>, %arg3: memref<8x1xf32, #tpu.memory_space<vmem>>, %arg4: memref<8x256xf32, #tpu.memory_space<vmem>>, %arg5: memref<8x256xf32, #tpu.memory_space<vmem>>) attributes {dimension_semantics = [#tpu.dimension_semantics<parallel>], iteration_bounds = array<i64: 2>, scalar_prefetch = 0 : i64, scratch_operands = 0 : i64, tpu.core_type = #tpu.core_type<tc>, window_params = [{pipeline_mode = #tpu.pipeline_mode<synchronous>, transform_indices = @transform_0, window_bounds = array<i64: 8, 27>}, {transform_indices = @transform_1, window_bounds = array<i64: 27, 256>}, {pipeline_mode = #tpu.pipeline_mode<synchronous>, transform_indices = @transform_2, window_bounds = array<i64: 8, 1>}, {transform_indices = @transform_3, window_bounds = array<i64: 8, 256>}, {transform_indices = @transform_4, window_bounds = array<i64: 8, 256>}]} {
    %c0 = arith.constant 0 : index
    %c0_0 = arith.constant 0 : index
    %0 = vector.load %arg1[%c0, %c0_0] : memref<8x27xbf16, #tpu.memory_space<vmem>>, vector<8x27xbf16>
    %c0_1 = arith.constant 0 : index
    %c0_2 = arith.constant 0 : index
    %1 = vector.load %arg2[%c0_1, %c0_2] : memref<27x256xbf16, #tpu.memory_space<vmem>>, vector<27x256xbf16>
    %cst = arith.constant dense<0.000000e+00> : vector<8x256xf32>
    %2 = tpu.matmul %0, %1, %cst {dimension_numbers = #tpu.dot_dimension_numbers<[1], [0], [0], [1], [0, 0, 1, 1], [], []>} : vector<8x27xbf16>, vector<27x256xbf16>, vector<8x256xf32> -> vector<8x256xf32>
    %c0_3 = arith.constant 0 : index
    %c0_4 = arith.constant 0 : index
    %3 = vector.load %arg3[%c0_3, %c0_4] : memref<8x1xf32, #tpu.memory_space<vmem>>, vector<8x1xf32>
    %4 = vector.broadcast %3 : vector<8x1xf32> to vector<8x256xf32>
    %5 = arith.addf %2, %4 : vector<8x256xf32>
    %c0_5 = arith.constant 0 : index
    %c0_6 = arith.constant 0 : index
    %6 = vector.load %arg4[%c0_5, %c0_6] : memref<8x256xf32, #tpu.memory_space<vmem>>, vector<8x256xf32>
    %7 = arith.addf %5, %6 : vector<8x256xf32>
    %cst_7 = arith.constant 0.000000e+00 : f32
    %8 = vector.broadcast %cst_7 : f32 to vector<8x256xf32>
    %9 = arith.maximumf %7, %8 : vector<8x256xf32>
    %c0_8 = arith.constant 0 : index
    %c0_9 = arith.constant 0 : index
    %10 = vector.load %arg5[%c0_8, %c0_9] : memref<8x256xf32, #tpu.memory_space<vmem>>, vector<8x256xf32>
    tpu.vector_store %arg5[%c0_8, %c0_9], %9 {strides = array<i32>} : memref<8x256xf32, #tpu.memory_space<vmem>>, vector<8x256xf32>,
    return
  }
  func.func @transform_0(%arg0: i32) -> (i32, i32) {
    %c0_i32 = arith.constant 0 : i32
    %c0_i32_0 = arith.constant 0 : i32
    %c0_i32_1 = arith.constant 0 : i32
    return %c0_i32, %c0_i32_0 : i32, i32
  }
  func.func @transform_1(%arg0: i32) -> (i32, i32) {
    %c0_i32 = arith.constant 0 : i32
    %c0_i32_0 = arith.constant 0 : i32
    return %c0_i32, %arg0 : i32, i32
  }
  func.func @transform_2(%arg0: i32) -> (i32, i32) {
    %c0_i32 = arith.constant 0 : i32
    %c0_i32_0 = arith.constant 0 : i32
    %c0_i32_1 = arith.constant 0 : i32
    return %c0_i32, %c0_i32_0 : i32, i32
  }
  func.func @transform_3(%arg0: i32) -> (i32, i32) {
    %c0_i32 = arith.constant 0 : i32
    %c0_i32_0 = arith.constant 0 : i32
    return %c0_i32, %arg0 : i32, i32
  }
  func.func @transform_4(%arg0: i32) -> (i32, i32) {
    %c0_i32 = arith.constant 0 : i32
    %c0_i32_0 = arith.constant 0 : i32
    return %c0_i32, %arg0 : i32, i32
  }
}

module attributes {stable_mosaic.version = 11 : i64} {
  func.func @_fused_conv_kernel(%arg0: i32, %arg1: memref<8x125xbf16, #tpu.memory_space<vmem>>, %arg2: memref<125x128xbf16, #tpu.memory_space<vmem>>, %arg3: memref<8x1xf32, #tpu.memory_space<vmem>>, %arg4: memref<8x128xf32, #tpu.memory_space<vmem>>) attributes {dimension_semantics = [#tpu.dimension_semantics<parallel>], iteration_bounds = array<i64: 1>, scalar_prefetch = 0 : i64, scratch_operands = 0 : i64, tpu.core_type = #tpu.core_type<tc>, window_params = [{pipeline_mode = #tpu.pipeline_mode<synchronous>, transform_indices = @transform_0, window_bounds = array<i64: 8, 125>}, {transform_indices = @transform_1, window_bounds = array<i64: 125, 128>}, {pipeline_mode = #tpu.pipeline_mode<synchronous>, transform_indices = @transform_2, window_bounds = array<i64: 8, 1>}, {transform_indices = @transform_3, window_bounds = array<i64: 8, 128>}]} {
    %c0 = arith.constant 0 : index
    %c0_0 = arith.constant 0 : index
    %0 = vector.load %arg1[%c0, %c0_0] : memref<8x125xbf16, #tpu.memory_space<vmem>>, vector<8x125xbf16>
    %c0_1 = arith.constant 0 : index
    %c0_2 = arith.constant 0 : index
    %1 = vector.load %arg2[%c0_1, %c0_2] : memref<125x128xbf16, #tpu.memory_space<vmem>>, vector<125x128xbf16>
    %cst = arith.constant dense<0.000000e+00> : vector<8x128xf32>
    %2 = tpu.matmul %0, %1, %cst {dimension_numbers = #tpu.dot_dimension_numbers<[1], [0], [0], [1], [0, 0, 1, 1], [], []>} : vector<8x125xbf16>, vector<125x128xbf16>, vector<8x128xf32> -> vector<8x128xf32>
    %c0_3 = arith.constant 0 : index
    %c0_4 = arith.constant 0 : index
    %3 = vector.load %arg3[%c0_3, %c0_4] : memref<8x1xf32, #tpu.memory_space<vmem>>, vector<8x1xf32>
    %4 = vector.broadcast %3 : vector<8x1xf32> to vector<8x128xf32>
    %5 = arith.addf %2, %4 : vector<8x128xf32>
    %c0_5 = arith.constant 0 : index
    %c0_6 = arith.constant 0 : index
    %6 = vector.load %arg4[%c0_5, %c0_6] : memref<8x128xf32, #tpu.memory_space<vmem>>, vector<8x128xf32>
    tpu.vector_store %arg4[%c0_5, %c0_6], %5 {strides = array<i32>} : memref<8x128xf32, #tpu.memory_space<vmem>>, vector<8x128xf32>,
    return
  }
  func.func @transform_0(%arg0: i32) -> (i32, i32) {
    %c0_i32 = arith.constant 0 : i32
    %c0_i32_0 = arith.constant 0 : i32
    %c0_i32_1 = arith.constant 0 : i32
    return %c0_i32, %c0_i32_0 : i32, i32
  }
  func.func @transform_1(%arg0: i32) -> (i32, i32) {
    %c0_i32 = arith.constant 0 : i32
    %c0_i32_0 = arith.constant 0 : i32
    return %c0_i32, %arg0 : i32, i32
  }
  func.func @transform_2(%arg0: i32) -> (i32, i32) {
    %c0_i32 = arith.constant 0 : i32
    %c0_i32_0 = arith.constant 0 : i32
    %c0_i32_1 = arith.constant 0 : i32
    return %c0_i32, %c0_i32_0 : i32, i32
  }
  func.func @transform_3(%arg0: i32) -> (i32, i32) {
    %c0_i32 = arith.constant 0 : i32
    %c0_i32_0 = arith.constant 0 : i32
    return %c0_i32, %arg0 : i32, i32
  }
}

module attributes {stable_mosaic.version = 11 : i64} {
  func.func @_fused_conv_kernel(%arg0: i32, %arg1: memref<8x189xbf16, #tpu.memory_space<vmem>>, %arg2: memref<189x2048xbf16, #tpu.memory_space<vmem>>, %arg3: memref<8x1xf32, #tpu.memory_space<vmem>>, %arg4: memref<8x2048xf32, #tpu.memory_space<vmem>>) attributes {dimension_semantics = [#tpu.dimension_semantics<parallel>], iteration_bounds = array<i64: 6>, scalar_prefetch = 0 : i64, scratch_operands = 0 : i64, tpu.core_type = #tpu.core_type<tc>, window_params = [{pipeline_mode = #tpu.pipeline_mode<synchronous>, transform_indices = @transform_0, window_bounds = array<i64: 8, 189>}, {transform_indices = @transform_1, window_bounds = array<i64: 189, 2048>}, {pipeline_mode = #tpu.pipeline_mode<synchronous>, transform_indices = @transform_2, window_bounds = array<i64: 8, 1>}, {transform_indices = @transform_3, window_bounds = array<i64: 8, 2048>}]} {
    %c0 = arith.constant 0 : index
    %c0_0 = arith.constant 0 : index
    %0 = vector.load %arg1[%c0, %c0_0] : memref<8x189xbf16, #tpu.memory_space<vmem>>, vector<8x189xbf16>
    %c0_1 = arith.constant 0 : index
    %c0_2 = arith.constant 0 : index
    %1 = vector.load %arg2[%c0_1, %c0_2] : memref<189x2048xbf16, #tpu.memory_space<vmem>>, vector<189x2048xbf16>
    %cst = arith.constant dense<0.000000e+00> : vector<8x2048xf32>
    %2 = tpu.matmul %0, %1, %cst {dimension_numbers = #tpu.dot_dimension_numbers<[1], [0], [0], [1], [0, 0, 1, 1], [], []>} : vector<8x189xbf16>, vector<189x2048xbf16>, vector<8x2048xf32> -> vector<8x2048xf32>
    %c0_3 = arith.constant 0 : index
    %c0_4 = arith.constant 0 : index
    %3 = vector.load %arg3[%c0_3, %c0_4] : memref<8x1xf32, #tpu.memory_space<vmem>>, vector<8x1xf32>
    %4 = vector.broadcast %3 : vector<8x1xf32> to vector<8x2048xf32>
    %5 = arith.addf %2, %4 : vector<8x2048xf32>
    %cst_5 = arith.constant 0.000000e+00 : f32
    %6 = vector.broadcast %cst_5 : f32 to vector<8x2048xf32>
    %7 = arith.maximumf %5, %6 : vector<8x2048xf32>
    %c0_6 = arith.constant 0 : index
    %c0_7 = arith.constant 0 : index
    %8 = vector.load %arg4[%c0_6, %c0_7] : memref<8x2048xf32, #tpu.memory_space<vmem>>, vector<8x2048xf32>
    tpu.vector_store %arg4[%c0_6, %c0_7], %7 {strides = array<i32>} : memref<8x2048xf32, #tpu.memory_space<vmem>>, vector<8x2048xf32>,
    return
  }
  func.func @transform_0(%arg0: i32) -> (i32, i32) {
    %c0_i32 = arith.constant 0 : i32
    %c0_i32_0 = arith.constant 0 : i32
    %c0_i32_1 = arith.constant 0 : i32
    return %c0_i32, %c0_i32_0 : i32, i32
  }
  func.func @transform_1(%arg0: i32) -> (i32, i32) {
    %c0_i32 = arith.constant 0 : i32
    %c0_i32_0 = arith.constant 0 : i32
    return %c0_i32, %arg0 : i32, i32
  }
  func.func @transform_2(%arg0: i32) -> (i32, i32) {
    %c0_i32 = arith.constant 0 : i32
    %c0_i32_0 = arith.constant 0 : i32
    %c0_i32_1 = arith.constant 0 : i32
    return %c0_i32, %c0_i32_0 : i32, i32
  }
  func.func @transform_3(%arg0: i32) -> (i32, i32) {
    %c0_i32 = arith.constant 0 : i32
    %c0_i32_0 = arith.constant 0 : i32
    return %c0_i32, %arg0 : i32, i32
  }
}

module attributes {stable_mosaic.version = 11 : i64} {
  func.func @_fused_conv_kernel(%arg0: i32, %arg1: memref<8x189xbf16, #tpu.memory_space<vmem>>, %arg2: memref<189x2048xbf16, #tpu.memory_space<vmem>>, %arg3: memref<8x1xf32, #tpu.memory_space<vmem>>, %arg4: memref<8x2048xf32, #tpu.memory_space<vmem>>, %arg5: memref<8x2048xf32, #tpu.memory_space<vmem>>) attributes {dimension_semantics = [#tpu.dimension_semantics<parallel>], iteration_bounds = array<i64: 6>, scalar_prefetch = 0 : i64, scratch_operands = 0 : i64, tpu.core_type = #tpu.core_type<tc>, window_params = [{pipeline_mode = #tpu.pipeline_mode<synchronous>, transform_indices = @transform_0, window_bounds = array<i64: 8, 189>}, {transform_indices = @transform_1, window_bounds = array<i64: 189, 2048>}, {pipeline_mode = #tpu.pipeline_mode<synchronous>, transform_indices = @transform_2, window_bounds = array<i64: 8, 1>}, {transform_indices = @transform_3, window_bounds = array<i64: 8, 2048>}, {transform_indices = @transform_4, window_bounds = array<i64: 8, 2048>}]} {
    %c0 = arith.constant 0 : index
    %c0_0 = arith.constant 0 : index
    %0 = vector.load %arg1[%c0, %c0_0] : memref<8x189xbf16, #tpu.memory_space<vmem>>, vector<8x189xbf16>
    %c0_1 = arith.constant 0 : index
    %c0_2 = arith.constant 0 : index
    %1 = vector.load %arg2[%c0_1, %c0_2] : memref<189x2048xbf16, #tpu.memory_space<vmem>>, vector<189x2048xbf16>
    %cst = arith.constant dense<0.000000e+00> : vector<8x2048xf32>
    %2 = tpu.matmul %0, %1, %cst {dimension_numbers = #tpu.dot_dimension_numbers<[1], [0], [0], [1], [0, 0, 1, 1], [], []>} : vector<8x189xbf16>, vector<189x2048xbf16>, vector<8x2048xf32> -> vector<8x2048xf32>
    %c0_3 = arith.constant 0 : index
    %c0_4 = arith.constant 0 : index
    %3 = vector.load %arg3[%c0_3, %c0_4] : memref<8x1xf32, #tpu.memory_space<vmem>>, vector<8x1xf32>
    %4 = vector.broadcast %3 : vector<8x1xf32> to vector<8x2048xf32>
    %5 = arith.addf %2, %4 : vector<8x2048xf32>
    %c0_5 = arith.constant 0 : index
    %c0_6 = arith.constant 0 : index
    %6 = vector.load %arg4[%c0_5, %c0_6] : memref<8x2048xf32, #tpu.memory_space<vmem>>, vector<8x2048xf32>
    %7 = arith.addf %5, %6 : vector<8x2048xf32>
    %cst_7 = arith.constant 0.000000e+00 : f32
    %8 = vector.broadcast %cst_7 : f32 to vector<8x2048xf32>
    %9 = arith.maximumf %7, %8 : vector<8x2048xf32>
    %c0_8 = arith.constant 0 : index
    %c0_9 = arith.constant 0 : index
    %10 = vector.load %arg5[%c0_8, %c0_9] : memref<8x2048xf32, #tpu.memory_space<vmem>>, vector<8x2048xf32>
    tpu.vector_store %arg5[%c0_8, %c0_9], %9 {strides = array<i32>} : memref<8x2048xf32, #tpu.memory_space<vmem>>, vector<8x2048xf32>,
    return
  }
  func.func @transform_0(%arg0: i32) -> (i32, i32) {
    %c0_i32 = arith.constant 0 : i32
    %c0_i32_0 = arith.constant 0 : i32
    %c0_i32_1 = arith.constant 0 : i32
    return %c0_i32, %c0_i32_0 : i32, i32
  }
  func.func @transform_1(%arg0: i32) -> (i32, i32) {
    %c0_i32 = arith.constant 0 : i32
    %c0_i32_0 = arith.constant 0 : i32
    return %c0_i32, %arg0 : i32, i32
  }
  func.func @transform_2(%arg0: i32) -> (i32, i32) {
    %c0_i32 = arith.constant 0 : i32
    %c0_i32_0 = arith.constant 0 : i32
    %c0_i32_1 = arith.constant 0 : i32
    return %c0_i32, %c0_i32_0 : i32, i32
  }
  func.func @transform_3(%arg0: i32) -> (i32, i32) {
    %c0_i32 = arith.constant 0 : i32
    %c0_i32_0 = arith.constant 0 : i32
    return %c0_i32, %arg0 : i32, i32
  }
  func.func @transform_4(%arg0: i32) -> (i32, i32) {
    %c0_i32 = arith.constant 0 : i32
    %c0_i32_0 = arith.constant 0 : i32
    return %c0_i32, %arg0 : i32, i32
  }
}

module attributes {stable_mosaic.version = 11 : i64} {
  func.func @_fused_conv_kernel(%arg0: i32, %arg1: memref<8x4032xbf16, #tpu.memory_space<vmem>>, %arg2: memref<4032x128xbf16, #tpu.memory_space<vmem>>, %arg3: memref<8x1xf32, #tpu.memory_space<vmem>>, %arg4: memref<8x128xf32, #tpu.memory_space<vmem>>) attributes {dimension_semantics = [#tpu.dimension_semantics<parallel>], iteration_bounds = array<i64: 1>, scalar_prefetch = 0 : i64, scratch_operands = 0 : i64, tpu.core_type = #tpu.core_type<tc>, window_params = [{pipeline_mode = #tpu.pipeline_mode<synchronous>, transform_indices = @transform_0, window_bounds = array<i64: 8, 4032>}, {transform_indices = @transform_1, window_bounds = array<i64: 4032, 128>}, {pipeline_mode = #tpu.pipeline_mode<synchronous>, transform_indices = @transform_2, window_bounds = array<i64: 8, 1>}, {transform_indices = @transform_3, window_bounds = array<i64: 8, 128>}]} {
    %c0 = arith.constant 0 : index
    %c0_0 = arith.constant 0 : index
    %0 = vector.load %arg1[%c0, %c0_0] : memref<8x4032xbf16, #tpu.memory_space<vmem>>, vector<8x4032xbf16>
    %c0_1 = arith.constant 0 : index
    %c0_2 = arith.constant 0 : index
    %1 = vector.load %arg2[%c0_1, %c0_2] : memref<4032x128xbf16, #tpu.memory_space<vmem>>, vector<4032x128xbf16>
    %cst = arith.constant dense<0.000000e+00> : vector<8x128xf32>
    %2 = tpu.matmul %0, %1, %cst {dimension_numbers = #tpu.dot_dimension_numbers<[1], [0], [0], [1], [0, 0, 1, 1], [], []>} : vector<8x4032xbf16>, vector<4032x128xbf16>, vector<8x128xf32> -> vector<8x128xf32>
    %c0_3 = arith.constant 0 : index
    %c0_4 = arith.constant 0 : index
    %3 = vector.load %arg3[%c0_3, %c0_4] : memref<8x1xf32, #tpu.memory_space<vmem>>, vector<8x1xf32>
    %4 = vector.broadcast %3 : vector<8x1xf32> to vector<8x128xf32>
    %5 = arith.addf %2, %4 : vector<8x128xf32>
    %c0_5 = arith.constant 0 : index
    %c0_6 = arith.constant 0 : index
    %6 = vector.load %arg4[%c0_5, %c0_6] : memref<8x128xf32, #tpu.memory_space<vmem>>, vector<8x128xf32>
    tpu.vector_store %arg4[%c0_5, %c0_6], %5 {strides = array<i32>} : memref<8x128xf32, #tpu.memory_space<vmem>>, vector<8x128xf32>,
    return
  }
  func.func @transform_0(%arg0: i32) -> (i32, i32) {
    %c0_i32 = arith.constant 0 : i32
    %c0_i32_0 = arith.constant 0 : i32
    %c0_i32_1 = arith.constant 0 : i32
    return %c0_i32, %c0_i32_0 : i32, i32
  }
  func.func @transform_1(%arg0: i32) -> (i32, i32) {
    %c0_i32 = arith.constant 0 : i32
    %c0_i32_0 = arith.constant 0 : i32
    return %c0_i32, %arg0 : i32, i32
  }
  func.func @transform_2(%arg0: i32) -> (i32, i32) {
    %c0_i32 = arith.constant 0 : i32
    %c0_i32_0 = arith.constant 0 : i32
    %c0_i32_1 = arith.constant 0 : i32
    return %c0_i32, %c0_i32_0 : i32, i32
  }
  func.func @transform_3(%arg0: i32) -> (i32, i32) {
    %c0_i32 = arith.constant 0 : i32
    %c0_i32_0 = arith.constant 0 : i32
    return %c0_i32, %arg0 : i32, i32
  }
}

</mosaic_0001>

<bundles_post_ra>
// kernel: squeeze.2
= control target key start
LH: loop header
LB: loop body
LE: loop exit
PB: predicated region body
PF: predicated region fallthrough
CT: control target
= control target key end

     0   :  { %s11_s6 = smov 3  ;;  %s25_s9 = smov 3  ;;  %vm6_vm0 = vcmask 1042434   ;;  %vm8_vm1 = vcmask 64512   ;;  %vm15_vm2 = vcmask 1048512   ;;  %vm22_vm3 = vcmask 982912   ;;  %s315_s0 = inlined_call_operand.vmem [shape: f32[1,5,8,8], index: 0, kind: input, shape index: {}]   ;;  %s316_s1 = inlined_call_operand.vmem [shape: f32[1,320], index: 1, kind: output, shape index: {}]  }
   0x1   :  { %v162_v0 = vld [vmem:[%s315_s0 + $0xf] ss:$16 sm:%s11_s6]   ;;  %s201_s10 = smov 120   ;;  %v164_v1 = vld [vmem:[%s315_s0 + $0xd] ss:$16 sm:%s25_s9]   ;;  %s18_s13 = smov 3 }
   0x2   :  { %13 = vrot.lane.b32.xlu0 %v162_v0, %s201_s10  ;;  %s202_s14 = smov 104   ;;  %v163_v2 = vld [vmem:[%s315_s0 + $0xe] ss:$16 sm:%s18_s13]   ;;  %s32_s17 = smov 3  ;;  %v171_v7 = vld [vmem:[%s315_s0 + $0x25] sm:$0x4]  }
   0x3   :  { %27 = vrot.lane.b32.xlu1 %v164_v1, %s202_s14  ;;  %v165_v3 = vld [vmem:[%s315_s0 + $0xc] ss:$16 sm:%s32_s17]   ;;  %s39_s20 = smov 3  ;;  %s46_s21 = smov 3  ;;  %v173_v11 = vld [vmem:[%s315_s0 + $0x24] sm:$0x4]  }
   0x4   :  { %s203_s22 = smov 112   ;;  %s204_s23 = smov 96   ;;  %v166_v4 = vld [vmem:[%s315_s0 + $0xb] ss:$16 sm:%s39_s20]   ;;  %v167_v5 = vld [vmem:[%s315_s0 + $0xa] ss:$16 sm:%s46_s21]  }
   0x5   :  { %s53_s28 = smov 3  ;;  %s60_s29 = smov 3  ;;  %v161_v12 = vld [vmem:[%s315_s0 + $0x1e] sm:$0x4]   ;;  %v175_v14 = vld [vmem:[%s315_s0 + $0x23] sm:$0x4]  }
   0x6   :  { %20 = vrot.lane.b32.xlu0 %v163_v2, %s203_s22  ;;  %s67_s30 = smov 3  ;;  %s205_s2 = smov 88   ;;  %v168_v6 = vld [vmem:[%s315_s0 + $0x9] ss:$16 sm:%s53_s28]   ;;  %v177_v19 = vld [vmem:[%s315_s0 + $0x22] sm:$0x4]  }
   0x7   :  { %34 = vrot.lane.b32.xlu1 %v165_v3, %s204_s23  ;;  %s78_s3 = smov 3  ;;  %s206_s4 = smov 80   ;;  %v169_v8 = vld [vmem:[%s315_s0 + $0x8] ss:$16 sm:%s60_s29]   ;;  %v179_v24 = vld [vmem:[%s315_s0 + $0x21] sm:$0x4]  }
   0x8   :  { %v170_v9 = vld [vmem:[%s315_s0 + $0x7] ss:$16 sm:%s67_s30]   ;;  %v172_v10 = vld [vmem:[%s315_s0 + $0x6] ss:$16 sm:%s78_s3]   ;;  %s89_s17 = smov 3  ;;  %s207_s18 = smov 72  }
   0x9   :  { %s100_s19 = smov 3  ;;  %s208_s22 = smov 64   ;;  %v72_v13 = vsel %vm6_vm0, %v171_v7, %v170_v9  ;;  %v83_v15 = vsel %vm6_vm0, %v173_v11, %v172_v10  ;;  %v174_v16 = vld [vmem:[%s315_s0 + $0x5] ss:$16 sm:%s89_s17]   ;;  %v181_v26 = vld [vmem:[%s315_s0 + $0x20] sm:$0x4]  }
   0xa   :  { %41 = vrot.lane.b32.xlu0 %v166_v4, %s205_s2  ;;  %s2_s25 = smov 3  ;;  %v176_v18 = vld [vmem:[%s315_s0 + $0x4] ss:$16 sm:%s100_s19]   ;;  %s111_s5 = smov 3  ;;  %v94_v21 = vsel %vm6_vm0, %v175_v14, %v174_v16  ;;  %v183_v30 = vld [vmem:[%s315_s0 + $0x1f] sm:$0x4]  }
   0xb   :  { %48 = vrot.lane.b32.xlu1 %v167_v5, %s206_s4  ;;  %v3_v17 = vld [vmem:[%s315_s0] ss:$16 sm:%s2_s25]   ;;  %s209_s6 = smov 56   ;;  %s122_s7 = smov 3  ;;  %v105_v22 = vsel %vm6_vm0, %v177_v19, %v176_v18  ;;  %vm29_vm4 = vcmask 917312   ;;  %vm36_vm5 = vcmask 851712  }
   0xc   :  { %v7_v20 = vsel %vm6_vm0, %v161_v12, %v3_v17  ;;  %s210_s8 = smov 48   ;;  %v178_v23 = vld [vmem:[%s315_s0 + $0x3] ss:$16 sm:%s111_s5]   ;;  %v180_v25 = vld [vmem:[%s315_s0 + $0x2] ss:$16 sm:%s122_s7]   ;;  %s133_s17 = smov 3 }
   0xd   :  { %9 = vst.msk [vmem:[#allocation0] ss:$8 sm:$0x7] %vm8_vm1, %v7_v20   ;;  %s212_s19 = smov 32   ;;  %v116_v27 = vsel %vm6_vm0, %v179_v24, %v178_v23  ;;  %v127_v28 = vsel %vm6_vm0, %v181_v26, %v180_v25  ;;  %v182_v29 = vld [vmem:[%s315_s0 + $0x1] ss:$16 sm:%s133_s17]  }
   0xe   :  { %55 = vrot.lane.b32.xlu0 %v168_v6, %s207_s18  ;;  %s211_s18 = smov 40   ;;  %s213_s0 = smov 24   ;;  %v138_v31 = vsel %vm6_vm0, %v183_v30, %v182_v29  ;;  %vm43_vm6 = vcmask 786112   ;;  %vm50_vm7 = vcmask 720512   ;;  %vm57_vm8 = vcmask 654912  }
   0xf   :  { %62 = vrot.lane.b32.xlu1 %v169_v8, %s208_s22  ;;  %s214_s24 = smov 16   ;;  %s215_s25 = smov 8   ;;  %vm64_vm9 = vcmask 589312   ;;  %vm75_vm10 = vcmask 523712   ;;  %vm86_vm11 = vcmask 458112   ;;  %vm97_vm12 = vcmask 392512  }
  0x10   :  { %vm108_vm13 = vcmask 326912   ;;  %vm119_vm14 = vcmask 261312   ;;  %vm130_vm15 = vcmask 195712   ;;  %vm141_vm0 = vcmask 130112  }
  0x12   :  { %73 = vrot.lane.b32.xlu0 %v72_v13, %s209_s6 }
  0x13   :  { %84 = vrot.lane.b32.xlu1 %v83_v15, %s210_s8 }
  0x16   :  { %95 = vrot.lane.b32.xlu0 %v94_v21, %s211_s18 }
  0x17   :  { %106 = vrot.lane.b32.xlu1 %v105_v22, %s212_s19 }
  0x1a   :  { %117 = vrot.lane.b32.xlu0 %v116_v27, %s213_s0 }
  0x1b   :  { %128 = vrot.lane.b32.xlu1 %v127_v28, %s214_s24 }
  0x1e   :  { %139 = vrot.lane.b32.xlu0 %v138_v31, %s215_s25 }
  0x74   :  { %v14_v32 = vpop.permute.xlu0 %13  }
  0x75   :  { %16 = vst.msk [vmem:[#allocation0] ss:$8 sm:$0x3] %vm15_vm2, %v14_v32   ;;  %v28_v33 = vpop.permute.xlu1 %27  }
  0x78   :  { %v21_v34 = vpop.permute.xlu0 %20  }
  0x79   :  { %23 = vst.msk [vmem:[#allocation0] ss:$8 sm:$0x3] %vm22_vm3, %v21_v34   ;;  %v35_v35 = vpop.permute.xlu1 %34  }
  0x7a   :  { %30 = vst.msk [vmem:[#allocation0] ss:$8 sm:$0x3] %vm29_vm4, %v28_v33  }
  0x7b   :  { %37 = vst.msk [vmem:[#allocation0] ss:$8 sm:$0x3] %vm36_vm5, %v35_v35  }
  0x7c   :  { %v42_v36 = vpop.permute.xlu0 %41  }
  0x7d   :  { %44 = vst.msk [vmem:[#allocation0] ss:$8 sm:$0x3] %vm43_vm6, %v42_v36   ;;  %v49_v37 = vpop.permute.xlu1 %48  }
  0x7e   :  { %51 = vst.msk [vmem:[#allocation0] ss:$8 sm:$0x3] %vm50_vm7, %v49_v37  }
  0x80   :  { %v56_v38 = vpop.permute.xlu0 %55  }
  0x81   :  { %58 = vst.msk [vmem:[#allocation0] ss:$8 sm:$0x3] %vm57_vm8, %v56_v38   ;;  %v63_v39 = vpop.permute.xlu1 %62  }
  0x82   :  { %65 = vst.msk [vmem:[#allocation0] ss:$8 sm:$0x3] %vm64_vm9, %v63_v39  }
  0x84   :  { %v74_v40 = vpop.permute.xlu0 %73  }
  0x85   :  { %76 = vst.msk [vmem:[#allocation0] ss:$8 sm:$0x7] %vm75_vm10, %v74_v40   ;;  %v85_v41 = vpop.permute.xlu1 %84  }
  0x86   :  { %87 = vst.msk [vmem:[#allocation0] ss:$8 sm:$0x7] %vm86_vm11, %v85_v41  }
  0x88   :  { %v96_v42 = vpop.permute.xlu0 %95  }
  0x89   :  { %98 = vst.msk [vmem:[#allocation0] ss:$8 sm:$0x7] %vm97_vm12, %v96_v42   ;;  %v107_v43 = vpop.permute.xlu1 %106  }
  0x8a   :  { %109 = vst.msk [vmem:[#allocation0] ss:$8 sm:$0x7] %vm108_vm13, %v107_v43  }
  0x8c   :  { %v118_v44 = vpop.permute.xlu0 %117  }
  0x8d   :  { %120 = vst.msk [vmem:[#allocation0] ss:$8 sm:$0x7] %vm119_vm14, %v118_v44   ;;  %v129_v45 = vpop.permute.xlu1 %128  }
  0x8e   :  { %131 = vst.msk [vmem:[#allocation0] ss:$8 sm:$0x7] %vm130_vm15, %v129_v45  }
  0x90   :  { %v140_v46 = vpop.permute.xlu0 %139  }
  0x91   :  { %142 = vst.msk [vmem:[#allocation0] ss:$8 sm:$0x7] %vm141_vm0, %v140_v46  }
  0x98   :  { %v146_v47 = vld [vmem:[#allocation0] sm:$0x1]  ;;  %v150_v48 = vld [vmem:[#allocation0 + $0x8] sm:$0x1]  ;;  %v155_v49 = vld [vmem:[#allocation0 + $0x10] sm:$0x1] }
  0x99   :  { %148 = vst [vmem:[%s316_s1] sm:$0x1] %v146_v47  ;;  %184 = vst [vmem:[%s316_s1 + $0x1] sm:$0x1] %v150_v48 }
  0x9a   :  { %185 = vst [vmem:[%s316_s1 + $0x2] sm:$0x1] %v155_v49 }

// kernel: _ob_path_batched.12
= control target key start
LH: loop header
LB: loop body
LE: loop exit
PB: predicated region body
PF: predicated region fallthrough
CT: control target
= control target key end

     0   :  { %s469_s12 = smov 0   ;;  %s471_s13 = smov 0   ;;  %s527_s0 = inlined_call_operand.vmem [shape: bf16[8,27], index: 0, kind: input, shape index: {}]   ;;  %s528_s1 = inlined_call_operand.vmem [shape: bf16[27,512], index: 1, kind: input, shape index: {}]   ;;  %s529_s2 = inlined_call_operand.vmem [shape: f32[8,1], index: 2, kind: input, shape index: {}]   ;;  %s530_s3 = inlined_call_operand.vmem [shape: f32[8,512], index: 3, kind: output, shape index: {}]  }
   0x1   :  { %s473_s14 = smov 0  }
   0x2 LB: > { %s371_s15 = sadd.s32 4294967295, %s445_s14   ;;  %s486_s16 = sadd.s32 1, %s445_s14   ;;  %s445_s14 = sphi %s473_s14, %s533_s14   ;;  %s441_s13 = sphi %s471_s13, %s532_s13   ;;  %s437_s12 = sphi %s469_s12, %s531_s12  }
   0x3   : > { %s38_s17 = ssub.s32 %s445_s14, %s486_s16  ;;  %s41_s18 = sadd.s32 1, %s441_s13 }
   0x4   : > { %p39_p0 = scmp.eq.s32.totalorder %s38_s17, 0  ;;  %p48_p1 = scmp.ne.s32.totalorder %s441_s13, %s437_s12 }
   0x5   : > { %p49_p2 = scmp.eq.s32.totalorder %s445_s14, 0  ;;  %p374_p4 = scmp.ge.s32.totalorder %s445_s14, 2 }
   0x6   : > { %s495_s19 = scalar_select %p39_p0, %s441_s13, %s41_s18  }
   0x7   : > { %p50_p3 = por %p49_p2, %p48_p1  ;;  %127 = sbr.rel (%p374_p4) target bundleno = 21 (0x15), region = 24 }
   0xe   : > { %130 = sbr.rel (!%p50_p3) target bundleno = 21 (0x15), region = 28  ;;  %s132_s20 = sand.u32 (%p50_p3), 1, %s441_s13  }
   0xf   : > { %s389_s21 = sshll.u32 (%p50_p3), %s445_s14, 3  ;;  %s375_s22 = sshll.u32 (%p50_p3), %s132_s20, 5 }
  0x10   : > { %s137_s25 = scalar_lea.vmem (%p50_p3), %s528_s1, %s389_s21  ;;  %s134_s26 = scalar_lea.vmem (%p50_p3), [#allocation2], %s375_s22 }
  0x11   : > { %v171_v0 = vld [vmem:[%s137_s25] sm:$0xff] (%p50_p3)  ;;  %v173_v1 = vld [vmem:[%s137_s25 + $0x10] sm:$0xff] (%p50_p3) }
  0x12   : > { %v175_v2 = vld [vmem:[%s137_s25 + $0x20] sm:$0xff] (%p50_p3)  ;;  %172 = vst [vmem:[%s134_s26] sm:$0xff] (%p50_p3), %v171_v0  ;;  %174 = vst [vmem:[%s134_s26 + $0x8] sm:$0xff] (%p50_p3), %v173_v1  ;;  %v177_v3 = vld [vmem:[%s137_s25 + $0x30] sm:$0xff] (%p50_p3) }
  0x13   : > { %176 = vst [vmem:[%s134_s26 + $0x10] sm:$0xff] (%p50_p3), %v175_v2  ;;  %178 = vst [vmem:[%s134_s26 + $0x18] sm:$0xff] (%p50_p3), %v177_v3 }
  0x15 PF: > { %p378_p5 = scmp.ge.s32.totalorder %s445_s14, 1  ;;  %p183_p6 = scmp.lt.s32.totalorder %s445_s14, 3 }
  0x17   : > { %p184_p7 = pnand %p378_p5, %p183_p6 }
  0x18   : > { %s190_s27 = sand.u32 (!%p184_p7), 1, %s437_s12   ;;  %vm254_vm0 = vcmask (!%p184_p7), 1044480   ;;  %v226_v4 = vld [vmem:[%s529_s2] sm:$0xff] (!%p184_p7)  ;;  %vm255_vm1 = vcmask (!%p184_p7), 1045504   ;;  %v447_v5 = vmov (!%p184_p7), 65535   ;;  %v448_v7 = vmov (!%p184_p7), 0  }
  0x19   : > { %187 = sbr.rel (%p184_p7) target bundleno = 254 (0xfe), region = 66  ;;  %s379_s30 = sshll.u32 (!%p184_p7), %s190_s27, 5  ;;  %v256_v6 = vsel (!%p184_p7), %vm254_vm0, 4294967295, %v447_v5  ;;  %296 = vmatprep.mubr.bf16.mxu0 (!%p184_p7), %v448_v7  ;;  %416 = vset.pattern.permute.xlu0 (!%p184_p7), %v448_v7  ;;  %v221_v15 = vld [vmem:[%s527_s0] sm:$0xf] (!%p184_p7)  ;;  %vm250_vm2 = vcmask (!%p184_p7), 220160  }
  0x1a   : > { %229 = vperm.xlu0 (!%p184_p7), %416, %v226_v4   ;;  %s192_s4 = scalar_lea.vmem (!%p184_p7), [#allocation2], %s379_s30  ;;  %v257_v10 = vsel (!%p184_p7), %vm255_vm1, %v256_v6, 0  ;;  %s380_s7 = sshll.u32 (!%p184_p7), %s371_s15, 1 }
  0x1b   : > { %v417_v8 = vld [vmem:[%s192_s4 + $0x4] ss:$8 sps:$4 sm:$0xff] (!%p184_p7)   ;;  %v419_v9 = vld [vmem:[%s192_s4] ss:$8 sps:$4 sm:$0xff] (!%p184_p7)   ;;  %p215_p8 = scmp.lt.s32.totalorder (!%p184_p7), %s380_s7, 3 }
  0x1c   : > { %264 = vmatprep.subr.bf16.mxu0 (!%p184_p7), %v417_v8  ;;  %v420_v11 = vld [vmem:[%s192_s4 + $0x14] ss:$8 sps:$4 sm:$0x3f] (!%p184_p7)   ;;  %v422_v12 = vld [vmem:[%s192_s4 + $0x10] ss:$8 sps:$4 sm:$0x3f] (!%p184_p7)  }
  0x1d   : > { %265 = vmatpush1.bf16.msra.mxu0 (!%p184_p7), %v419_v9  ;;  %v262_v13 = vand.u32 (!%p184_p7), %v420_v11, %v257_v10  ;;  %v259_v14 = vand.u32 (!%p184_p7), %v422_v12, %v257_v10 }
  0x1f   : > { %266 = vmatprep.subr.bf16.mxu0 (!%p184_p7), %v262_v13 }
  0x20   : > { %s535_s7 = smov (!%p215_p8, %s380_s7), 3 }
  0x21   : > { %267 = vmatpush1.bf16.msra.mxu0 %v259_v14  ;;  %s381_s8 = sshll.u32 %s535_s7, 3 }
  0x22   : > { %s218_s11 = scalar_lea.vmem %s530_s3, %s381_s8 }
  0x24   : > { %386 = vmatmul.mubr.msk.bf16.vlgmr.msra.gmra.mrb[0].mxu0 %vm250_vm2, %v221_v15 }
  0x99   : > { %v230_v16 = vpop.permute.xlu0 %229 }
  0xf7   : > { %v298_v17 = vpop.f32.mrb[0].mxu0 }
  0xf8   : > { %v299_v18 = vadd.f32 %v298_v17, %v230_v16  ;;  %v300_v19 = vpop.f32.mrb[1].mxu0 }
  0xf9   : > { %v301_v20 = vadd.f32 %v300_v19, %v230_v16  ;;  %v302_v21 = vpop.f32.mrb[2].mxu0 }
  0xfa   : > { %v305_v22 = vmax.f32 %v299_v18, 0.0  ;;  %v303_v23 = vpop.f32.mrb[3].mxu0 }
  0xfb   : > { %v306_v24 = vmax.f32 %v301_v20, 0.0 }
  0xfc   : > { %307 = vst [vmem:[%s218_s11] sm:$0xff] %v305_v22 }
  0xfd   : > { %308 = vst [vmem:[%s218_s11 + $0x8] sm:$0xff] %v306_v24 }
  0xfe PF: > { %p10_p9 = scmp.ge.s32.totalorder %s486_s16, 4   ;;  %s531_s12 = smov %s441_s13 }
  0xff   : > { %s532_s13 = smov %s495_s19  ;;  %s533_s14 = smov %s486_s16 }
 0x100   :  { %12 = sbr.rel (!%p10_p9) target bundleno = 2 (0x2), region = 105 }

// kernel: _ob_path_batched.13
= control target key start
LH: loop header
LB: loop body
LE: loop exit
PB: predicated region body
PF: predicated region fallthrough
CT: control target
= control target key end

     0   :  { %s541_s15 = smov 0   ;;  %s543_s16 = smov 0   ;;  %s602_s0 = inlined_call_operand.vmem [shape: bf16[8,27], index: 0, kind: input, shape index: {}]   ;;  %s603_s1 = inlined_call_operand.vmem [shape: bf16[27,512], index: 1, kind: input, shape index: {}]   ;;  %s604_s2 = inlined_call_operand.vmem [shape: f32[8,1], index: 2, kind: input, shape index: {}]   ;;  %s605_s3 = inlined_call_operand.vmem [shape: f32[8,512], index: 3, kind: input, shape index: {}]   ;;  %s606_s4 = inlined_call_operand.vmem [shape: f32[8,512], index: 4, kind: output, shape index: {}]  }
   0x1   :  { %s545_s17 = smov 0  }
   0x2 LB: > { %s436_s18 = sadd.s32 4294967295, %s512_s17   ;;  %s558_s19 = sadd.s32 1, %s512_s17   ;;  %s512_s17 = sphi %s545_s17, %s609_s17   ;;  %s508_s16 = sphi %s543_s16, %s608_s16   ;;  %s504_s15 = sphi %s541_s15, %s607_s15  }
   0x3   : > { %s39_s20 = ssub.s32 %s512_s17, %s558_s19  ;;  %s42_s21 = sadd.s32 1, %s508_s16 }
   0x4   : > { %p40_p0 = scmp.eq.s32.totalorder %s39_s20, 0  ;;  %p49_p1 = scmp.ne.s32.totalorder %s508_s16, %s504_s15 }
   0x5   : > { %p50_p2 = scmp.eq.s32.totalorder %s512_s17, 0  ;;  %p439_p4 = scmp.ge.s32.totalorder %s512_s17, 2 }
   0x6   : > { %s567_s22 = scalar_select %p40_p0, %s508_s16, %s42_s21  }
   0x7   : > { %p51_p3 = por %p50_p2, %p49_p1  ;;  %154 = sbr.rel (%p439_p4) target bundleno = 21 (0x15), region = 24 }
   0xe   : > { %157 = sbr.rel (!%p51_p3) target bundleno = 21 (0x15), region = 28  ;;  %s159_s23 = sand.u32 (%p51_p3), 1, %s508_s16  }
   0xf   : > { %s456_s24 = sshll.u32 (%p51_p3), %s512_s17, 3  ;;  %s440_s25 = sshll.u32 (%p51_p3), %s159_s23, 5 }
  0x10   : > { %s164_s28 = scalar_lea.vmem (%p51_p3), %s603_s1, %s456_s24  ;;  %s161_s29 = scalar_lea.vmem (%p51_p3), [#allocation2], %s440_s25 }
  0x11   : > { %v198_v0 = vld [vmem:[%s164_s28] sm:$0xff] (%p51_p3)  ;;  %v200_v1 = vld [vmem:[%s164_s28 + $0x10] sm:$0xff] (%p51_p3) }
  0x12   : > { %v202_v2 = vld [vmem:[%s164_s28 + $0x20] sm:$0xff] (%p51_p3)  ;;  %199 = vst [vmem:[%s161_s29] sm:$0xff] (%p51_p3), %v198_v0  ;;  %201 = vst [vmem:[%s161_s29 + $0x8] sm:$0xff] (%p51_p3), %v200_v1  ;;  %v204_v3 = vld [vmem:[%s164_s28 + $0x30] sm:$0xff] (%p51_p3) }
  0x13   : > { %203 = vst [vmem:[%s161_s29 + $0x10] sm:$0xff] (%p51_p3), %v202_v2  ;;  %205 = vst [vmem:[%s161_s29 + $0x18] sm:$0xff] (%p51_p3), %v204_v3 }
  0x15 PF: > { %p443_p5 = scmp.ge.s32.totalorder %s512_s17, 1  ;;  %p219_p6 = scmp.lt.s32.totalorder %s512_s17, 3 }
  0x17   : > { %p220_p7 = pnand %p443_p5, %p219_p6 }
  0x18   : > { %s226_s30 = sand.u32 (!%p220_p7), 1, %s504_s15   ;;  %vm303_vm0 = vcmask (!%p220_p7), 1044480   ;;  %v275_v4 = vld [vmem:[%s604_s2] sm:$0xff] (!%p220_p7)  ;;  %vm304_vm1 = vcmask (!%p220_p7), 1045504   ;;  %v514_v5 = vmov (!%p220_p7), 65535   ;;  %v515_v7 = vmov (!%p220_p7), 0  }
  0x19   : > { %223 = sbr.rel (%p220_p7) target bundleno = 256 (0x100), region = 70  ;;  %s444_s7 = sshll.u32 (!%p220_p7), %s226_s30, 5  ;;  %v305_v6 = vsel (!%p220_p7), %vm303_vm0, 4294967295, %v514_v5  ;;  %345 = vmatprep.mubr.bf16.mxu0 (!%p220_p7), %v515_v7  ;;  %483 = vset.pattern.permute.xlu0 (!%p220_p7), %v515_v7  ;;  %v270_v15 = vld [vmem:[%s602_s0] sm:$0xf] (!%p220_p7)  ;;  %vm299_vm2 = vcmask (!%p220_p7), 220160  }
  0x1a   : > { %278 = vperm.xlu0 (!%p220_p7), %483, %v275_v4   ;;  %s228_s8 = scalar_lea.vmem (!%p220_p7), [#allocation2], %s444_s7  ;;  %v306_v10 = vsel (!%p220_p7), %vm304_vm1, %v305_v6, 0  ;;  %s445_s11 = sshll.u32 (!%p220_p7), %s436_s18, 1 }
  0x1b   : > { %v484_v8 = vld [vmem:[%s228_s8 + $0x4] ss:$8 sps:$4 sm:$0xff] (!%p220_p7)   ;;  %v486_v9 = vld [vmem:[%s228_s8] ss:$8 sps:$4 sm:$0xff] (!%p220_p7)   ;;  %p258_p8 = scmp.lt.s32.totalorder (!%p220_p7), %s445_s11, 3 }
  0x1c   : > { %313 = vmatprep.subr.bf16.mxu0 (!%p220_p7), %v484_v8  ;;  %v487_v11 = vld [vmem:[%s228_s8 + $0x14] ss:$8 sps:$4 sm:$0x3f] (!%p220_p7)   ;;  %v489_v12 = vld [vmem:[%s228_s8 + $0x10] ss:$8 sps:$4 sm:$0x3f] (!%p220_p7)  }
  0x1d   : > { %314 = vmatpush1.bf16.msra.mxu0 (!%p220_p7), %v486_v9  ;;  %v311_v13 = vand.u32 (!%p220_p7), %v487_v11, %v306_v10  ;;  %v308_v14 = vand.u32 (!%p220_p7), %v489_v12, %v306_v10 }
  0x1f   : > { %315 = vmatprep.subr.bf16.mxu0 (!%p220_p7), %v311_v13 }
  0x20   : > { %s611_s11 = smov (!%p258_p8, %s445_s11), 3 }
  0x21   : > { %316 = vmatpush1.bf16.msra.mxu0 %v308_v14  ;;  %s446_s12 = sshll.u32 %s611_s11, 3 }
  0x22   : > { %s261_s15 = scalar_lea.vmem %s605_s3, %s446_s12  ;;  %s267_s18 = scalar_lea.vmem %s606_s4, %s446_s12 }
  0x23   : > { %v354_v18 = vld [vmem:[%s261_s15] sm:$0xff]  ;;  %v355_v21 = vld [vmem:[%s261_s15 + $0x8] sm:$0xff] }
  0x24   : > { %453 = vmatmul.mubr.msk.bf16.vlgmr.msra.gmra.mrb[0].mxu0 %vm299_vm2, %v270_v15 }
  0x99   : > { %v279_v16 = vpop.permute.xlu0 %278 }
  0xf7   : > { %v347_v17 = vpop.f32.mrb[0].mxu0 }
  0xf8   : > { %v348_v19 = vadd.f32 %v347_v17, %v279_v16  ;;  %v349_v20 = vpop.f32.mrb[1].mxu0 }
  0xf9   : > { %v350_v22 = vadd.f32 %v349_v20, %v279_v16  ;;  %v351_v23 = vpop.f32.mrb[2].mxu0 }
  0xfa   : > { %v356_v24 = vadd.f32 %v354_v18, %v348_v19  ;;  %v352_v25 = vpop.f32.mrb[3].mxu0 }
  0xfb   : > { %v357_v26 = vadd.f32 %v355_v21, %v350_v22 }
  0xfc   : > { %v358_v27 = vmax.f32 %v356_v24, 0.0 }
  0xfd   : > { %v359_v28 = vmax.f32 %v357_v26, 0.0 }
  0xfe   : > { %360 = vst [vmem:[%s267_s18] sm:$0xff] %v358_v27 }
  0xff   : > { %361 = vst [vmem:[%s267_s18 + $0x8] sm:$0xff] %v359_v28 }
 0x100 PF: > { %p11_p9 = scmp.ge.s32.totalorder %s558_s19, 4   ;;  %s607_s15 = smov %s508_s16 }
 0x101   : > { %s608_s16 = smov %s567_s22  ;;  %s609_s17 = smov %s558_s19 }
 0x102   :  { %13 = sbr.rel (!%p11_p9) target bundleno = 2 (0x2), region = 112 }

// kernel: _ob_path_batched.14
= control target key start
LH: loop header
LB: loop body
LE: loop exit
PB: predicated region body
PF: predicated region fallthrough
CT: control target
= control target key end

     0   :  { %v192_v0 = vmov 0.0   ;;  %vm193_vm0 = vmmov 0   ;;  %v194_v3 = vmov 0   ;;  %vm89_vm1 = vcmask 1045504   ;;  %s249_s1 = inlined_call_operand.vmem [shape: bf16[125,128], index: 1, kind: input, shape index: {}]   ;;  %s250_s2 = inlined_call_operand.vmem [shape: f32[8,1], index: 2, kind: input, shape index: {}]   ;;  %s251_s0 = inlined_call_operand.vmem [shape: bf16[8,125], index: 0, kind: input, shape index: {}]   ;;  %s252_s3 = inlined_call_operand.vmem [shape: f32[8,128], index: 3, kind: output, shape index: {}]  }
   0x1   :  { %159 = vmatprep.subr.bf16.mxu0 %v192_v0  ;;  %v184_v1 = vld [vmem:[%s249_s1] sm:$0xff]   ;;  %v185_v2 = vld [vmem:[%s249_s1 + $0x8] sm:$0xff]   ;;  %175 = vmatprep.mubr.msk.bf16.mxu0 %vm193_vm0, %v192_v0  ;;  %v186_v4 = vld [vmem:[%s249_s1 + $0x10] sm:$0xff]   ;;  %vm90_vm2 = vcmask 1046528   ;;  %v195_v9 = vmov 65535   ;;  %vm85_vm3 = vcmask 1022976  }
   0x2   :  { %160 = vmatpush3.bf16.msra.mxu0 %v184_v1  ;;  %183 = vset.pattern.permute.xlu0 %v194_v3  ;;  %v32_v5 = vld [vmem:[%s250_s2] sm:$0xff]  ;;  %v187_v6 = vld [vmem:[%s249_s1 + $0x18] sm:$0xff]   ;;  %v189_v8 = vld [vmem:[%s249_s1 + $0x28] sm:$0xff]   ;;  %v91_v10 = vsel %vm89_vm1, 4294967295, %v195_v9 }
   0x3   :  { %161 = vmatprep.subr.bf16.mxu0 %v192_v0  ;;  %35 = vperm.xlu0 %183, %v32_v5   ;;  %v188_v7 = vld [vmem:[%s249_s1 + $0x20] sm:$0xff]   ;;  %v190_v11 = vld [vmem:[%s249_s1 + $0x30] sm:$0xff]   ;;  %v191_v12 = vld [vmem:[%s249_s1 + $0x38] sm:$0x7f]   ;;  %v92_v13 = vsel %vm90_vm2, %v91_v10, 0 }
   0x4   :  { %v94_v14 = vand.u32 %v191_v12, %v92_v13  ;;  %v15_v15 = vld [vmem:[%s251_s0] sm:$0xf] }
   0x6   :  { %162 = vmatpush3.bf16.msra.mxu0 %v185_v2 }
   0x7   :  { %163 = vmatprep.subr.bf16.mxu0 %v192_v0 }
   0xa   :  { %164 = vmatpush3.bf16.msra.mxu0 %v186_v4 }
   0xb   :  { %165 = vmatprep.subr.bf16.mxu0 %v192_v0 }
   0xe   :  { %166 = vmatpush3.bf16.msra.mxu0 %v187_v6 }
   0xf   :  { %167 = vmatprep.subr.bf16.mxu0 %v192_v0 }
  0x12   :  { %168 = vmatpush3.bf16.msra.mxu0 %v188_v7 }
  0x13   :  { %169 = vmatprep.subr.bf16.mxu0 %v192_v0 }
  0x16   :  { %170 = vmatpush3.bf16.msra.mxu0 %v189_v8 }
  0x17   :  { %171 = vmatprep.subr.bf16.mxu0 %v192_v0 }
  0x1a   :  { %172 = vmatpush3.bf16.msra.mxu0 %v190_v11 }
  0x1b   :  { %173 = vmatprep.subr.bf16.mxu0 %v192_v0 }
  0x1e   :  { %174 = vmatpush3.bf16.msra.mxu0 %v94_v14 }
  0x21   :  { %176 = vmatmul.mubr.msk.bf16.vlgmr.msra.gmra.mrb[0].mxu0 %vm85_vm3, %v15_v15 }
  0x82   :  { %v36_v16 = vpop.permute.xlu0 %35 }
  0xf4   :  { %v130_v17 = vpop.f32.mrb[0].mxu0 }
  0xf5   :  { %v131_v18 = vadd.f32 %v130_v17, %v36_v16  ;;  %v177_v19 = vpop.f32.mrb[1].mxu0 }
  0xf6   :  { %v133_v20 = vpop.f32.mrb[2].mxu0 }
  0xf7   :  { %136 = vst [vmem:[%s252_s3] sm:$0xff] %v131_v18  ;;  %v178_v21 = vpop.f32.mrb[3].mxu0 }

// kernel: _ob_path_batched.15
= control target key start
LH: loop header
LB: loop body
LE: loop exit
PB: predicated region body
PF: predicated region fallthrough
CT: control target
= control target key end

     0   :  { %s2494_s12 = smov 0   ;;  %s2496_s13 = smov 0   ;;  %s3246_s0 = inlined_call_operand.vmem [shape: bf16[8,189], index: 0, kind: input, shape index: {}]   ;;  %s3247_s1 = inlined_call_operand.vmem [shape: bf16[189,12288], index: 1, kind: input, shape index: {}]   ;;  %s3248_s2 = inlined_call_operand.vmem [shape: f32[8,1], index: 2, kind: input, shape index: {}]   ;;  %s3249_s3 = inlined_call_operand.vmem [shape: f32[8,12288], index: 3, kind: output, shape index: {}]  }
   0x1   :  { %s2498_s14 = smov 0  }
   0x2 LB: > { %s2203_s15 = sadd.s32 4294967295, %s2470_s14   ;;  %s2511_s16 = sadd.s32 1, %s2470_s14   ;;  %s2470_s14 = sphi %s2498_s14, %s3252_s14   ;;  %s2466_s13 = sphi %s2496_s13, %s3251_s13   ;;  %s2462_s12 = sphi %s2494_s12, %s3250_s12  }
   0x3   : > { %s38_s17 = ssub.s32 %s2470_s14, %s2511_s16  ;;  %s41_s18 = sadd.s32 1, %s2466_s13 }
   0x4   : > { %p39_p0 = scmp.eq.s32.totalorder %s38_s17, 0  ;;  %p48_p1 = scmp.ne.s32.totalorder %s2466_s13, %s2462_s12 }
   0x5   : > { %p49_p2 = scmp.eq.s32.totalorder %s2470_s14, 0  ;;  %p2206_p4 = scmp.ge.s32.totalorder %s2470_s14, 6 }
   0x6   : > { %s2520_s19 = scalar_select %p39_p0, %s2466_s13, %s41_s18  }
   0x7   : > { %p50_p3 = por %p49_p2, %p48_p1  ;;  %127 = sbr.rel (%p2206_p4) target bundleno = 115 (0x73), region = 24 }
   0xe   : > { %130 = sbr.rel (!%p50_p3) target bundleno = 115 (0x73), region = 28  ;;  %s132_s20 = sand.u32 (%p50_p3), 1, %s2466_s13  }
   0xf   : > { %s2416_s21 = sshll.u32 (%p50_p3), %s2470_s14, 6  ;;  %s2417_s22 = smul.u32 (%p50_p3), 1536, %s132_s20 }
  0x10   : > { %s2528_s25 = scalar_lea.vmem (%p50_p3), %s3247_s1, %s2416_s21 }
  0x11   : > { %v150_v0 = vld [vmem:[%s2528_s25] sm:$0xff] (%p50_p3)  ;;  %v152_v1 = vld [vmem:[%s2528_s25 + $0x8] sm:$0xff] (%p50_p3)  ;;  %v154_v2 = vld [vmem:[%s2528_s25 + $0x10] sm:$0xff] (%p50_p3)  ;;  %s2536_s26 = scalar_lea.vmem (%p50_p3), [#allocation2], %s2417_s22 }
  0x12   : > { %v156_v3 = vld [vmem:[%s2528_s25 + $0x18] sm:$0xff] (%p50_p3)  ;;  %v158_v4 = vld [vmem:[%s2528_s25 + $0x20] sm:$0xff] (%p50_p3)  ;;  %v160_v5 = vld [vmem:[%s2528_s25 + $0x28] sm:$0xff] (%p50_p3)  ;;  %151 = vst [vmem:[%s2536_s26] sm:$0xff] (%p50_p3), %v150_v0 }
  0x13   : > { %153 = vst [vmem:[%s2536_s26 + $0x8] sm:$0xff] (%p50_p3), %v152_v1  ;;  %155 = vst [vmem:[%s2536_s26 + $0x10] sm:$0xff] (%p50_p3), %v154_v2  ;;  %v162_v6 = vld [vmem:[%s2528_s25 + $0x30] sm:$0xff] (%p50_p3)  ;;  %v164_v7 = vld [vmem:[%s2528_s25 + $0x38] sm:$0xff] (%p50_p3) }
  0x14   : > { %157 = vst [vmem:[%s2536_s26 + $0x18] sm:$0xff] (%p50_p3), %v156_v3  ;;  %159 = vst [vmem:[%s2536_s26 + $0x20] sm:$0xff] (%p50_p3), %v158_v4  ;;  %v166_v8 = vld [vmem:[%s2528_s25 + $0x180] sm:$0xff] (%p50_p3)  ;;  %v168_v9 = vld [vmem:[%s2528_s25 + $0x188] sm:$0xff] (%p50_p3) }
  0x15   : > { %161 = vst [vmem:[%s2536_s26 + $0x28] sm:$0xff] %v160_v5  ;;  %163 = vst [vmem:[%s2536_s26 + $0x30] sm:$0xff] %v162_v6  ;;  %v170_v10 = vld [vmem:[%s2528_s25 + $0x190] sm:$0xff]  ;;  %v172_v11 = vld [vmem:[%s2528_s25 + $0x198] sm:$0xff] }
  0x16   : > { %165 = vst [vmem:[%s2536_s26 + $0x38] sm:$0xff] %v164_v7  ;;  %167 = vst [vmem:[%s2536_s26 + $0x40] sm:$0xff] %v166_v8  ;;  %v174_v12 = vld [vmem:[%s2528_s25 + $0x1a0] sm:$0xff]  ;;  %v176_v13 = vld [vmem:[%s2528_s25 + $0x1a8] sm:$0xff] }
  0x17   : > { %169 = vst [vmem:[%s2536_s26 + $0x48] sm:$0xff] %v168_v9  ;;  %171 = vst [vmem:[%s2536_s26 + $0x50] sm:$0xff] %v170_v10  ;;  %v178_v14 = vld [vmem:[%s2528_s25 + $0x1b0] sm:$0xff]  ;;  %v180_v15 = vld [vmem:[%s2528_s25 + $0x1b8] sm:$0xff] }
  0x18   : > { %173 = vst [vmem:[%s2536_s26 + $0x58] sm:$0xff] %v172_v11  ;;  %175 = vst [vmem:[%s2536_s26 + $0x60] sm:$0xff] %v174_v12  ;;  %v182_v16 = vld [vmem:[%s2528_s25 + $0x300] sm:$0xff]  ;;  %v184_v17 = vld [vmem:[%s2528_s25 + $0x308] sm:$0xff] }
  0x19   : > { %177 = vst [vmem:[%s2536_s26 + $0x68] sm:$0xff] %v176_v13  ;;  %179 = vst [vmem:[%s2536_s26 + $0x70] sm:$0xff] %v178_v14  ;;  %v186_v18 = vld [vmem:[%s2528_s25 + $0x310] sm:$0xff]  ;;  %v188_v19 = vld [vmem:[%s2528_s25 + $0x318] sm:$0xff] }
  0x1a   : > { %181 = vst [vmem:[%s2536_s26 + $0x78] sm:$0xff] %v180_v15  ;;  %183 = vst [vmem:[%s2536_s26 + $0x80] sm:$0xff] %v182_v16  ;;  %v190_v20 = vld [vmem:[%s2528_s25 + $0x320] sm:$0xff]  ;;  %v192_v21 = vld [vmem:[%s2528_s25 + $0x328] sm:$0xff] }
  0x1b   : > { %185 = vst [vmem:[%s2536_s26 + $0x88] sm:$0xff] %v184_v17  ;;  %187 = vst [vmem:[%s2536_s26 + $0x90] sm:$0xff] %v186_v18  ;;  %v194_v22 = vld [vmem:[%s2528_s25 + $0x330] sm:$0xff]  ;;  %v196_v23 = vld [vmem:[%s2528_s25 + $0x338] sm:$0xff] }
  0x1c   : > { %189 = vst [vmem:[%s2536_s26 + $0x98] sm:$0xff] %v188_v19  ;;  %191 = vst [vmem:[%s2536_s26 + $0xa0] sm:$0xff] %v190_v20  ;;  %v198_v24 = vld [vmem:[%s2528_s25 + $0x480] sm:$0xff]  ;;  %v200_v25 = vld [vmem:[%s2528_s25 + $0x488] sm:$0xff] }
  0x1d   : > { %193 = vst [vmem:[%s2536_s26 + $0xa8] sm:$0xff] %v192_v21  ;;  %195 = vst [vmem:[%s2536_s26 + $0xb0] sm:$0xff] %v194_v22  ;;  %v202_v26 = vld [vmem:[%s2528_s25 + $0x490] sm:$0xff]  ;;  %v204_v27 = vld [vmem:[%s2528_s25 + $0x498] sm:$0xff] }
  0x1e   : > { %197 = vst [vmem:[%s2536_s26 + $0xb8] sm:$0xff] %v196_v23  ;;  %199 = vst [vmem:[%s2536_s26 + $0xc0] sm:$0xff] %v198_v24  ;;  %v206_v28 = vld [vmem:[%s2528_s25 + $0x4a0] sm:$0xff]  ;;  %v208_v29 = vld [vmem:[%s2528_s25 + $0x4a8] sm:$0xff] }
  0x1f   : > { %201 = vst [vmem:[%s2536_s26 + $0xc8] sm:$0xff] %v200_v25  ;;  %203 = vst [vmem:[%s2536_s26 + $0xd0] sm:$0xff] %v202_v26  ;;  %v210_v30 = vld [vmem:[%s2528_s25 + $0x4b0] sm:$0xff]  ;;  %v212_v31 = vld [vmem:[%s2528_s25 + $0x4b8] sm:$0xff] }
  0x20   : > { %205 = vst [vmem:[%s2536_s26 + $0xd8] sm:$0xff] %v204_v27  ;;  %207 = vst [vmem:[%s2536_s26 + $0xe0] sm:$0xff] %v206_v28  ;;  %v214_v32 = vld [vmem:[%s2528_s25 + $0x600] sm:$0xff]  ;;  %v216_v33 = vld [vmem:[%s2528_s25 + $0x608] sm:$0xff] }
  0x21   : > { %209 = vst [vmem:[%s2536_s26 + $0xe8] sm:$0xff] %v208_v29  ;;  %211 = vst [vmem:[%s2536_s26 + $0xf0] sm:$0xff] %v210_v30  ;;  %v218_v34 = vld [vmem:[%s2528_s25 + $0x610] sm:$0xff]  ;;  %v220_v35 = vld [vmem:[%s2528_s25 + $0x618] sm:$0xff] }
  0x22   : > { %213 = vst [vmem:[%s2536_s26 + $0xf8] sm:$0xff] %v212_v31  ;;  %215 = vst [vmem:[%s2536_s26 + $0x100] sm:$0xff] %v214_v32  ;;  %v222_v36 = vld [vmem:[%s2528_s25 + $0x620] sm:$0xff]  ;;  %v224_v37 = vld [vmem:[%s2528_s25 + $0x628] sm:$0xff] }
  0x23   : > { %217 = vst [vmem:[%s2536_s26 + $0x108] sm:$0xff] %v216_v33  ;;  %219 = vst [vmem:[%s2536_s26 + $0x110] sm:$0xff] %v218_v34  ;;  %v226_v38 = vld [vmem:[%s2528_s25 + $0x630] sm:$0xff]  ;;  %v228_v39 = vld [vmem:[%s2528_s25 + $0x638] sm:$0xff] }
  0x24   : > { %221 = vst [vmem:[%s2536_s26 + $0x118] sm:$0xff] %v220_v35  ;;  %223 = vst [vmem:[%s2536_s26 + $0x120] sm:$0xff] %v222_v36  ;;  %v230_v40 = vld [vmem:[%s2528_s25 + $0x780] sm:$0xff]  ;;  %v232_v41 = vld [vmem:[%s2528_s25 + $0x788] sm:$0xff] }
  0x25   : > { %225 = vst [vmem:[%s2536_s26 + $0x128] sm:$0xff] %v224_v37  ;;  %227 = vst [vmem:[%s2536_s26 + $0x130] sm:$0xff] %v226_v38  ;;  %v234_v42 = vld [vmem:[%s2528_s25 + $0x790] sm:$0xff]  ;;  %v236_v43 = vld [vmem:[%s2528_s25 + $0x798] sm:$0xff] }
  0x26   : > { %229 = vst [vmem:[%s2536_s26 + $0x138] sm:$0xff] %v228_v39  ;;  %231 = vst [vmem:[%s2536_s26 + $0x140] sm:$0xff] %v230_v40  ;;  %v238_v44 = vld [vmem:[%s2528_s25 + $0x7a0] sm:$0xff]  ;;  %v240_v45 = vld [vmem:[%s2528_s25 + $0x7a8] sm:$0xff] }
  0x27   : > { %233 = vst [vmem:[%s2536_s26 + $0x148] sm:$0xff] %v232_v41  ;;  %235 = vst [vmem:[%s2536_s26 + $0x150] sm:$0xff] %v234_v42  ;;  %v242_v46 = vld [vmem:[%s2528_s25 + $0x7b0] sm:$0xff]  ;;  %v244_v47 = vld [vmem:[%s2528_s25 + $0x7b8] sm:$0xff] }
  0x28   : > { %237 = vst [vmem:[%s2536_s26 + $0x158] sm:$0xff] %v236_v43  ;;  %239 = vst [vmem:[%s2536_s26 + $0x160] sm:$0xff] %v238_v44  ;;  %v246_v48 = vld [vmem:[%s2528_s25 + $0x900] sm:$0xff]  ;;  %v248_v49 = vld [vmem:[%s2528_s25 + $0x908] sm:$0xff] }
  0x29   : > { %241 = vst [vmem:[%s2536_s26 + $0x168] sm:$0xff] %v240_v45  ;;  %243 = vst [vmem:[%s2536_s26 + $0x170] sm:$0xff] %v242_v46  ;;  %v250_v50 = vld [vmem:[%s2528_s25 + $0x910] sm:$0xff]  ;;  %v252_v51 = vld [vmem:[%s2528_s25 + $0x918] sm:$0xff] }
  0x2a   : > { %245 = vst [vmem:[%s2536_s26 + $0x178] sm:$0xff] %v244_v47  ;;  %247 = vst [vmem:[%s2536_s26 + $0x180] sm:$0xff] %v246_v48  ;;  %v254_v52 = vld [vmem:[%s2528_s25 + $0x920] sm:$0xff]  ;;  %v256_v53 = vld [vmem:[%s2528_s25 + $0x928] sm:$0xff] }
  0x2b   : > { %249 = vst [vmem:[%s2536_s26 + $0x188] sm:$0xff] %v248_v49  ;;  %251 = vst [vmem:[%s2536_s26 + $0x190] sm:$0xff] %v250_v50  ;;  %v258_v54 = vld [vmem:[%s2528_s25 + $0x930] sm:$0xff]  ;;  %v260_v55 = vld [vmem:[%s2528_s25 + $0x938] sm:$0xff] }
  0x2c   : > { %253 = vst [vmem:[%s2536_s26 + $0x198] sm:$0xff] %v252_v51  ;;  %255 = vst [vmem:[%s2536_s26 + $0x1a0] sm:$0xff] %v254_v52  ;;  %v262_v56 = vld [vmem:[%s2528_s25 + $0xa80] sm:$0xff]  ;;  %v264_v57 = vld [vmem:[%s2528_s25 + $0xa88] sm:$0xff] }
  0x2d   : > { %257 = vst [vmem:[%s2536_s26 + $0x1a8] sm:$0xff] %v256_v53  ;;  %259 = vst [vmem:[%s2536_s26 + $0x1b0] sm:$0xff] %v258_v54  ;;  %v266_v58 = vld [vmem:[%s2528_s25 + $0xa90] sm:$0xff]  ;;  %v268_v59 = vld [vmem:[%s2528_s25 + $0xa98] sm:$0xff] }
  0x2e   : > { %261 = vst [vmem:[%s2536_s26 + $0x1b8] sm:$0xff] %v260_v55  ;;  %263 = vst [vmem:[%s2536_s26 + $0x1c0] sm:$0xff] %v262_v56  ;;  %v270_v60 = vld [vmem:[%s2528_s25 + $0xaa0] sm:$0xff]  ;;  %v272_v61 = vld [vmem:[%s2528_s25 + $0xaa8] sm:$0xff] }
  0x2f   : > { %265 = vst [vmem:[%s2536_s26 + $0x1c8] sm:$0xff] %v264_v57  ;;  %267 = vst [vmem:[%s2536_s26 + $0x1d0] sm:$0xff] %v266_v58  ;;  %v274_v62 = vld [vmem:[%s2528_s25 + $0xab0] sm:$0xff]  ;;  %v276_v63 = vld [vmem:[%s2528_s25 + $0xab8] sm:$0xff] }
  0x30   : > { %269 = vst [vmem:[%s2536_s26 + $0x1d8] sm:$0xff] %v268_v59  ;;  %271 = vst [vmem:[%s2536_s26 + $0x1e0] sm:$0xff] %v270_v60  ;;  %v278_v0 = vld [vmem:[%s2528_s25 + $0xc00] sm:$0xff]  ;;  %v280_v1 = vld [vmem:[%s2528_s25 + $0xc08] sm:$0xff] }
  0x31   : > { %273 = vst [vmem:[%s2536_s26 + $0x1e8] sm:$0xff] %v272_v61  ;;  %275 = vst [vmem:[%s2536_s26 + $0x1f0] sm:$0xff] %v274_v62  ;;  %v282_v2 = vld [vmem:[%s2528_s25 + $0xc10] sm:$0xff]  ;;  %v284_v3 = vld [vmem:[%s2528_s25 + $0xc18] sm:$0xff] }
  0x32   : > { %277 = vst [vmem:[%s2536_s26 + $0x1f8] sm:$0xff] %v276_v63  ;;  %279 = vst [vmem:[%s2536_s26 + $0x200] sm:$0xff] %v278_v0  ;;  %v286_v4 = vld [vmem:[%s2528_s25 + $0xc20] sm:$0xff]  ;;  %v288_v5 = vld [vmem:[%s2528_s25 + $0xc28] sm:$0xff] }
  0x33   : > { %281 = vst [vmem:[%s2536_s26 + $0x208] sm:$0xff] %v280_v1  ;;  %283 = vst [vmem:[%s2536_s26 + $0x210] sm:$0xff] %v282_v2  ;;  %v290_v6 = vld [vmem:[%s2528_s25 + $0xc30] sm:$0xff]  ;;  %v292_v7 = vld [vmem:[%s2528_s25 + $0xc38] sm:$0xff] }
  0x34   : > { %285 = vst [vmem:[%s2536_s26 + $0x218] sm:$0xff] %v284_v3  ;;  %287 = vst [vmem:[%s2536_s26 + $0x220] sm:$0xff] %v286_v4  ;;  %v294_v8 = vld [vmem:[%s2528_s25 + $0xd80] sm:$0xff]  ;;  %v296_v9 = vld [vmem:[%s2528_s25 + $0xd88] sm:$0xff] }
  0x35   : > { %289 = vst [vmem:[%s2536_s26 + $0x228] sm:$0xff] %v288_v5  ;;  %291 = vst [vmem:[%s2536_s26 + $0x230] sm:$0xff] %v290_v6  ;;  %v298_v10 = vld [vmem:[%s2528_s25 + $0xd90] sm:$0xff]  ;;  %v300_v11 = vld [vmem:[%s2528_s25 + $0xd98] sm:$0xff] }
  0x36   : > { %293 = vst [vmem:[%s2536_s26 + $0x238] sm:$0xff] %v292_v7  ;;  %295 = vst [vmem:[%s2536_s26 + $0x240] sm:$0xff] %v294_v8  ;;  %v302_v12 = vld [vmem:[%s2528_s25 + $0xda0] sm:$0xff]  ;;  %v304_v13 = vld [vmem:[%s2528_s25 + $0xda8] sm:$0xff] }
  0x37   : > { %297 = vst [vmem:[%s2536_s26 + $0x248] sm:$0xff] %v296_v9  ;;  %299 = vst [vmem:[%s2536_s26 + $0x250] sm:$0xff] %v298_v10  ;;  %v306_v14 = vld [vmem:[%s2528_s25 + $0xdb0] sm:$0xff]  ;;  %v308_v15 = vld [vmem:[%s2528_s25 + $0xdb8] sm:$0xff] }
  0x38   : > { %301 = vst [vmem:[%s2536_s26 + $0x258] sm:$0xff] %v300_v11  ;;  %303 = vst [vmem:[%s2536_s26 + $0x260] sm:$0xff] %v302_v12  ;;  %v310_v16 = vld [vmem:[%s2528_s25 + $0xf00] sm:$0xff]  ;;  %v312_v17 = vld [vmem:[%s2528_s25 + $0xf08] sm:$0xff] }
  0x39   : > { %305 = vst [vmem:[%s2536_s26 + $0x268] sm:$0xff] %v304_v13  ;;  %307 = vst [vmem:[%s2536_s26 + $0x270] sm:$0xff] %v306_v14  ;;  %v314_v18 = vld [vmem:[%s2528_s25 + $0xf10] sm:$0xff]  ;;  %v316_v19 = vld [vmem:[%s2528_s25 + $0xf18] sm:$0xff] }
  0x3a   : > { %309 = vst [vmem:[%s2536_s26 + $0x278] sm:$0xff] %v308_v15  ;;  %311 = vst [vmem:[%s2536_s26 + $0x280] sm:$0xff] %v310_v16  ;;  %v318_v20 = vld [vmem:[%s2528_s25 + $0xf20] sm:$0xff]  ;;  %v320_v21 = vld [vmem:[%s2528_s25 + $0xf28] sm:$0xff] }
  0x3b   : > { %313 = vst [vmem:[%s2536_s26 + $0x288] sm:$0xff] %v312_v17  ;;  %315 = vst [vmem:[%s2536_s26 + $0x290] sm:$0xff] %v314_v18  ;;  %v322_v22 = vld [vmem:[%s2528_s25 + $0xf30] sm:$0xff]  ;;  %v324_v23 = vld [vmem:[%s2528_s25 + $0xf38] sm:$0xff] }
  0x3c   : > { %317 = vst [vmem:[%s2536_s26 + $0x298] sm:$0xff] %v316_v19  ;;  %319 = vst [vmem:[%s2536_s26 + $0x2a0] sm:$0xff] %v318_v20  ;;  %v326_v24 = vld [vmem:[%s2528_s25 + $0x1080] sm:$0xff]  ;;  %v328_v25 = vld [vmem:[%s2528_s25 + $0x1088] sm:$0xff] }
  0x3d   : > { %321 = vst [vmem:[%s2536_s26 + $0x2a8] sm:$0xff] %v320_v21  ;;  %323 = vst [vmem:[%s2536_s26 + $0x2b0] sm:$0xff] %v322_v22  ;;  %v330_v26 = vld [vmem:[%s2528_s25 + $0x1090] sm:$0xff]  ;;  %v332_v27 = vld [vmem:[%s2528_s25 + $0x1098] sm:$0xff] }
  0x3e   : > { %325 = vst [vmem:[%s2536_s26 + $0x2b8] sm:$0xff] %v324_v23  ;;  %327 = vst [vmem:[%s2536_s26 + $0x2c0] sm:$0xff] %v326_v24  ;;  %v334_v28 = vld [vmem:[%s2528_s25 + $0x10a0] sm:$0xff]  ;;  %v336_v29 = vld [vmem:[%s2528_s25 + $0x10a8] sm:$0xff] }
  0x3f   : > { %329 = vst [vmem:[%s2536_s26 + $0x2c8] sm:$0xff] %v328_v25  ;;  %331 = vst [vmem:[%s2536_s26 + $0x2d0] sm:$0xff] %v330_v26  ;;  %v338_v30 = vld [vmem:[%s2528_s25 + $0x10b0] sm:$0xff]  ;;  %v340_v31 = vld [vmem:[%s2528_s25 + $0x10b8] sm:$0xff] }
  0x40   : > { %333 = vst [vmem:[%s2536_s26 + $0x2d8] sm:$0xff] %v332_v27  ;;  %335 = vst [vmem:[%s2536_s26 + $0x2e0] sm:$0xff] %v334_v28  ;;  %v342_v32 = vld [vmem:[%s2528_s25 + $0x1200] sm:$0xff]  ;;  %v344_v33 = vld [vmem:[%s2528_s25 + $0x1208] sm:$0xff] }
  0x41   : > { %337 = vst [vmem:[%s2536_s26 + $0x2e8] sm:$0xff] %v336_v29  ;;  %339 = vst [vmem:[%s2536_s26 + $0x2f0] sm:$0xff] %v338_v30  ;;  %v346_v34 = vld [vmem:[%s2528_s25 + $0x1210] sm:$0xff]  ;;  %v348_v35 = vld [vmem:[%s2528_s25 + $0x1218] sm:$0xff] }
  0x42   : > { %341 = vst [vmem:[%s2536_s26 + $0x2f8] sm:$0xff] %v340_v31  ;;  %343 = vst [vmem:[%s2536_s26 + $0x300] sm:$0xff] %v342_v32  ;;  %v350_v36 = vld [vmem:[%s2528_s25 + $0x1220] sm:$0xff]  ;;  %v352_v37 = vld [vmem:[%s2528_s25 + $0x1228] sm:$0xff] }
  0x43   : > { %345 = vst [vmem:[%s2536_s26 + $0x308] sm:$0xff] %v344_v33  ;;  %347 = vst [vmem:[%s2536_s26 + $0x310] sm:$0xff] %v346_v34  ;;  %v354_v38 = vld [vmem:[%s2528_s25 + $0x1230] sm:$0xff]  ;;  %v356_v39 = vld [vmem:[%s2528_s25 + $0x1238] sm:$0xff] }
  0x44   : > { %349 = vst [vmem:[%s2536_s26 + $0x318] sm:$0xff] %v348_v35  ;;  %351 = vst [vmem:[%s2536_s26 + $0x320] sm:$0xff] %v350_v36  ;;  %v358_v40 = vld [vmem:[%s2528_s25 + $0x1380] sm:$0xff]  ;;  %v360_v41 = vld [vmem:[%s2528_s25 + $0x1388] sm:$0xff] }
  0x45   : > { %353 = vst [vmem:[%s2536_s26 + $0x328] sm:$0xff] %v352_v37  ;;  %355 = vst [vmem:[%s2536_s26 + $0x330] sm:$0xff] %v354_v38  ;;  %v362_v42 = vld [vmem:[%s2528_s25 + $0x1390] sm:$0xff]  ;;  %v364_v43 = vld [vmem:[%s2528_s25 + $0x1398] sm:$0xff] }
  0x46   : > { %357 = vst [vmem:[%s2536_s26 + $0x338] sm:$0xff] %v356_v39  ;;  %359 = vst [vmem:[%s2536_s26 + $0x340] sm:$0xff] %v358_v40  ;;  %v366_v44 = vld [vmem:[%s2528_s25 + $0x13a0] sm:$0xff]  ;;  %v368_v45 = vld [vmem:[%s2528_s25 + $0x13a8] sm:$0xff] }
  0x47   : > { %361 = vst [vmem:[%s2536_s26 + $0x348] sm:$0xff] %v360_v41  ;;  %363 = vst [vmem:[%s2536_s26 + $0x350] sm:$0xff] %v362_v42  ;;  %v370_v46 = vld [vmem:[%s2528_s25 + $0x13b0] sm:$0xff]  ;;  %v372_v47 = vld [vmem:[%s2528_s25 + $0x13b8] sm:$0xff] }
  0x48   : > { %365 = vst [vmem:[%s2536_s26 + $0x358] sm:$0xff] %v364_v43  ;;  %367 = vst [vmem:[%s2536_s26 + $0x360] sm:$0xff] %v366_v44  ;;  %v374_v48 = vld [vmem:[%s2528_s25 + $0x1500] sm:$0xff]  ;;  %v376_v49 = vld [vmem:[%s2528_s25 + $0x1508] sm:$0xff] }
  0x49   : > { %369 = vst [vmem:[%s2536_s26 + $0x368] sm:$0xff] %v368_v45  ;;  %371 = vst [vmem:[%s2536_s26 + $0x370] sm:$0xff] %v370_v46  ;;  %v378_v50 = vld [vmem:[%s2528_s25 + $0x1510] sm:$0xff]  ;;  %v380_v51 = vld [vmem:[%s2528_s25 + $0x1518] sm:$0xff] }
  0x4a   : > { %373 = vst [vmem:[%s2536_s26 + $0x378] sm:$0xff] %v372_v47  ;;  %375 = vst [vmem:[%s2536_s26 + $0x380] sm:$0xff] %v374_v48  ;;  %v382_v52 = vld [vmem:[%s2528_s25 + $0x1520] sm:$0xff]  ;;  %v384_v53 = vld [vmem:[%s2528_s25 + $0x1528] sm:$0xff] }
  0x4b   : > { %377 = vst [vmem:[%s2536_s26 + $0x388] sm:$0xff] %v376_v49  ;;  %379 = vst [vmem:[%s2536_s26 + $0x390] sm:$0xff] %v378_v50  ;;  %v386_v54 = vld [vmem:[%s2528_s25 + $0x1530] sm:$0xff]  ;;  %v388_v55 = vld [vmem:[%s2528_s25 + $0x1538] sm:$0xff] }
  0x4c   : > { %381 = vst [vmem:[%s2536_s26 + $0x398] sm:$0xff] %v380_v51  ;;  %383 = vst [vmem:[%s2536_s26 + $0x3a0] sm:$0xff] %v382_v52  ;;  %v390_v56 = vld [vmem:[%s2528_s25 + $0x1680] sm:$0xff]  ;;  %v392_v57 = vld [vmem:[%s2528_s25 + $0x1688] sm:$0xff] }
  0x4d   : > { %385 = vst [vmem:[%s2536_s26 + $0x3a8] sm:$0xff] %v384_v53  ;;  %387 = vst [vmem:[%s2536_s26 + $0x3b0] sm:$0xff] %v386_v54  ;;  %v394_v58 = vld [vmem:[%s2528_s25 + $0x1690] sm:$0xff]  ;;  %v396_v59 = vld [vmem:[%s2528_s25 + $0x1698] sm:$0xff] }
  0x4e   : > { %389 = vst [vmem:[%s2536_s26 + $0x3b8] sm:$0xff] %v388_v55  ;;  %391 = vst [vmem:[%s2536_s26 + $0x3c0] sm:$0xff] %v390_v56  ;;  %v398_v60 = vld [vmem:[%s2528_s25 + $0x16a0] sm:$0xff]  ;;  %v400_v61 = vld [vmem:[%s2528_s25 + $0x16a8] sm:$0xff] }
  0x4f   : > { %393 = vst [vmem:[%s2536_s26 + $0x3c8] sm:$0xff] %v392_v57  ;;  %395 = vst [vmem:[%s2536_s26 + $0x3d0] sm:$0xff] %v394_v58  ;;  %v402_v62 = vld [vmem:[%s2528_s25 + $0x16b0] sm:$0xff]  ;;  %v404_v63 = vld [vmem:[%s2528_s25 + $0x16b8] sm:$0xff] }
  0x50   : > { %397 = vst [vmem:[%s2536_s26 + $0x3d8] sm:$0xff] %v396_v59  ;;  %399 = vst [vmem:[%s2536_s26 + $0x3e0] sm:$0xff] %v398_v60  ;;  %v406_v0 = vld [vmem:[%s2528_s25 + $0x1800] sm:$0xff]  ;;  %v408_v1 = vld [vmem:[%s2528_s25 + $0x1808] sm:$0xff] }
  0x51   : > { %401 = vst [vmem:[%s2536_s26 + $0x3e8] sm:$0xff] %v400_v61  ;;  %403 = vst [vmem:[%s2536_s26 + $0x3f0] sm:$0xff] %v402_v62  ;;  %v410_v2 = vld [vmem:[%s2528_s25 + $0x1810] sm:$0xff]  ;;  %v412_v3 = vld [vmem:[%s2528_s25 + $0x1818] sm:$0xff] }
  0x52   : > { %405 = vst [vmem:[%s2536_s26 + $0x3f8] sm:$0xff] %v404_v63  ;;  %407 = vst [vmem:[%s2536_s26 + $0x400] sm:$0xff] %v406_v0  ;;  %v414_v4 = vld [vmem:[%s2528_s25 + $0x1820] sm:$0xff]  ;;  %v416_v5 = vld [vmem:[%s2528_s25 + $0x1828] sm:$0xff] }
  0x53   : > { %409 = vst [vmem:[%s2536_s26 + $0x408] sm:$0xff] %v408_v1  ;;  %411 = vst [vmem:[%s2536_s26 + $0x410] sm:$0xff] %v410_v2  ;;  %v418_v6 = vld [vmem:[%s2528_s25 + $0x1830] sm:$0xff]  ;;  %v420_v7 = vld [vmem:[%s2528_s25 + $0x1838] sm:$0xff] }
  0x54   : > { %413 = vst [vmem:[%s2536_s26 + $0x418] sm:$0xff] %v412_v3  ;;  %415 = vst [vmem:[%s2536_s26 + $0x420] sm:$0xff] %v414_v4  ;;  %v422_v8 = vld [vmem:[%s2528_s25 + $0x1980] sm:$0xff]  ;;  %v424_v9 = vld [vmem:[%s2528_s25 + $0x1988] sm:$0xff] }
  0x55   : > { %417 = vst [vmem:[%s2536_s26 + $0x428] sm:$0xff] %v416_v5  ;;  %419 = vst [vmem:[%s2536_s26 + $0x430] sm:$0xff] %v418_v6  ;;  %v426_v10 = vld [vmem:[%s2528_s25 + $0x1990] sm:$0xff]  ;;  %v428_v11 = vld [vmem:[%s2528_s25 + $0x1998] sm:$0xff] }
  0x56   : > { %421 = vst [vmem:[%s2536_s26 + $0x438] sm:$0xff] %v420_v7  ;;  %423 = vst [vmem:[%s2536_s26 + $0x440] sm:$0xff] %v422_v8  ;;  %v430_v12 = vld [vmem:[%s2528_s25 + $0x19a0] sm:$0xff]  ;;  %v432_v13 = vld [vmem:[%s2528_s25 + $0x19a8] sm:$0xff] }
  0x57   : > { %425 = vst [vmem:[%s2536_s26 + $0x448] sm:$0xff] %v424_v9  ;;  %427 = vst [vmem:[%s2536_s26 + $0x450] sm:$0xff] %v426_v10  ;;  %v434_v14 = vld [vmem:[%s2528_s25 + $0x19b0] sm:$0xff]  ;;  %v436_v15 = vld [vmem:[%s2528_s25 + $0x19b8] sm:$0xff] }
  0x58   : > { %429 = vst [vmem:[%s2536_s26 + $0x458] sm:$0xff] %v428_v11  ;;  %431 = vst [vmem:[%s2536_s26 + $0x460] sm:$0xff] %v430_v12  ;;  %v438_v16 = vld [vmem:[%s2528_s25 + $0x1b00] sm:$0xff]  ;;  %v440_v17 = vld [vmem:[%s2528_s25 + $0x1b08] sm:$0xff] }
  0x59   : > { %433 = vst [vmem:[%s2536_s26 + $0x468] sm:$0xff] %v432_v13  ;;  %435 = vst [vmem:[%s2536_s26 + $0x470] sm:$0xff] %v434_v14  ;;  %v442_v18 = vld [vmem:[%s2528_s25 + $0x1b10] sm:$0xff]  ;;  %v444_v19 = vld [vmem:[%s2528_s25 + $0x1b18] sm:$0xff] }
  0x5a   : > { %437 = vst [vmem:[%s2536_s26 + $0x478] sm:$0xff] %v436_v15  ;;  %439 = vst [vmem:[%s2536_s26 + $0x480] sm:$0xff] %v438_v16  ;;  %v446_v20 = vld [vmem:[%s2528_s25 + $0x1b20] sm:$0xff]  ;;  %v448_v21 = vld [vmem:[%s2528_s25 + $0x1b28] sm:$0xff] }
  0x5b   : > { %441 = vst [vmem:[%s2536_s26 + $0x488] sm:$0xff] %v440_v17  ;;  %443 = vst [vmem:[%s2536_s26 + $0x490] sm:$0xff] %v442_v18  ;;  %v450_v22 = vld [vmem:[%s2528_s25 + $0x1b30] sm:$0xff]  ;;  %v452_v23 = vld [vmem:[%s2528_s25 + $0x1b38] sm:$0xff] }
  0x5c   : > { %445 = vst [vmem:[%s2536_s26 + $0x498] sm:$0xff] %v444_v19  ;;  %447 = vst [vmem:[%s2536_s26 + $0x4a0] sm:$0xff] %v446_v20  ;;  %v454_v24 = vld [vmem:[%s2528_s25 + $0x1c80] sm:$0xff]  ;;  %v456_v25 = vld [vmem:[%s2528_s25 + $0x1c88] sm:$0xff] }
  0x5d   : > { %449 = vst [vmem:[%s2536_s26 + $0x4a8] sm:$0xff] %v448_v21  ;;  %451 = vst [vmem:[%s2536_s26 + $0x4b0] sm:$0xff] %v450_v22  ;;  %v458_v26 = vld [vmem:[%s2528_s25 + $0x1c90] sm:$0xff]  ;;  %v460_v27 = vld [vmem:[%s2528_s25 + $0x1c98] sm:$0xff] }
  0x5e   : > { %453 = vst [vmem:[%s2536_s26 + $0x4b8] sm:$0xff] %v452_v23  ;;  %455 = vst [vmem:[%s2536_s26 + $0x4c0] sm:$0xff] %v454_v24  ;;  %v462_v28 = vld [vmem:[%s2528_s25 + $0x1ca0] sm:$0xff]  ;;  %v464_v29 = vld [vmem:[%s2528_s25 + $0x1ca8] sm:$0xff] }
  0x5f   : > { %457 = vst [vmem:[%s2536_s26 + $0x4c8] sm:$0xff] %v456_v25  ;;  %459 = vst [vmem:[%s2536_s26 + $0x4d0] sm:$0xff] %v458_v26  ;;  %v466_v30 = vld [vmem:[%s2528_s25 + $0x1cb0] sm:$0xff]  ;;  %v468_v31 = vld [vmem:[%s2528_s25 + $0x1cb8] sm:$0xff] }
  0x60   : > { %461 = vst [vmem:[%s2536_s26 + $0x4d8] sm:$0xff] %v460_v27  ;;  %463 = vst [vmem:[%s2536_s26 + $0x4e0] sm:$0xff] %v462_v28  ;;  %v470_v32 = vld [vmem:[%s2528_s25 + $0x1e00] sm:$0xff]  ;;  %v472_v33 = vld [vmem:[%s2528_s25 + $0x1e08] sm:$0xff] }
  0x61   : > { %465 = vst [vmem:[%s2536_s26 + $0x4e8] sm:$0xff] %v464_v29  ;;  %467 = vst [vmem:[%s2536_s26 + $0x4f0] sm:$0xff] %v466_v30  ;;  %v474_v34 = vld [vmem:[%s2528_s25 + $0x1e10] sm:$0xff]  ;;  %v476_v35 = vld [vmem:[%s2528_s25 + $0x1e18] sm:$0xff] }
  0x62   : > { %469 = vst [vmem:[%s2536_s26 + $0x4f8] sm:$0xff] %v468_v31  ;;  %471 = vst [vmem:[%s2536_s26 + $0x500] sm:$0xff] %v470_v32  ;;  %v478_v36 = vld [vmem:[%s2528_s25 + $0x1e20] sm:$0xff]  ;;  %v480_v37 = vld [vmem:[%s2528_s25 + $0x1e28] sm:$0xff] }
  0x63   : > { %473 = vst [vmem:[%s2536_s26 + $0x508] sm:$0xff] %v472_v33  ;;  %475 = vst [vmem:[%s2536_s26 + $0x510] sm:$0xff] %v474_v34  ;;  %v482_v38 = vld [vmem:[%s2528_s25 + $0x1e30] sm:$0xff]  ;;  %v484_v39 = vld [vmem:[%s2528_s25 + $0x1e38] sm:$0xff] }
  0x64   : > { %477 = vst [vmem:[%s2536_s26 + $0x518] sm:$0xff] %v476_v35  ;;  %479 = vst [vmem:[%s2536_s26 + $0x520] sm:$0xff] %v478_v36  ;;  %v486_v40 = vld [vmem:[%s2528_s25 + $0x1f80] sm:$0xff]  ;;  %v488_v41 = vld [vmem:[%s2528_s25 + $0x1f88] sm:$0xff] }
  0x65   : > { %481 = vst [vmem:[%s2536_s26 + $0x528] sm:$0xff] %v480_v37  ;;  %483 = vst [vmem:[%s2536_s26 + $0x530] sm:$0xff] %v482_v38  ;;  %v490_v42 = vld [vmem:[%s2528_s25 + $0x1f90] sm:$0xff]  ;;  %v492_v43 = vld [vmem:[%s2528_s25 + $0x1f98] sm:$0xff] }
  0x66   : > { %485 = vst [vmem:[%s2536_s26 + $0x538] sm:$0xff] %v484_v39  ;;  %487 = vst [vmem:[%s2536_s26 + $0x540] sm:$0xff] %v486_v40  ;;  %v494_v44 = vld [vmem:[%s2528_s25 + $0x1fa0] sm:$0xff]  ;;  %v496_v45 = vld [vmem:[%s2528_s25 + $0x1fa8] sm:$0xff] }
  0x67   : > { %489 = vst [vmem:[%s2536_s26 + $0x548] sm:$0xff] %v488_v41  ;;  %491 = vst [vmem:[%s2536_s26 + $0x550] sm:$0xff] %v490_v42  ;;  %v498_v46 = vld [vmem:[%s2528_s25 + $0x1fb0] sm:$0xff]  ;;  %v500_v47 = vld [vmem:[%s2528_s25 + $0x1fb8] sm:$0xff] }
  0x68   : > { %493 = vst [vmem:[%s2536_s26 + $0x558] sm:$0xff] %v492_v43  ;;  %495 = vst [vmem:[%s2536_s26 + $0x560] sm:$0xff] %v494_v44  ;;  %v502_v48 = vld [vmem:[%s2528_s25 + $0x2100] sm:$0xff]  ;;  %v504_v49 = vld [vmem:[%s2528_s25 + $0x2108] sm:$0xff] }
  0x69   : > { %497 = vst [vmem:[%s2536_s26 + $0x568] sm:$0xff] %v496_v45  ;;  %499 = vst [vmem:[%s2536_s26 + $0x570] sm:$0xff] %v498_v46  ;;  %v506_v50 = vld [vmem:[%s2528_s25 + $0x2110] sm:$0xff]  ;;  %v508_v51 = vld [vmem:[%s2528_s25 + $0x2118] sm:$0xff] }
  0x6a   : > { %501 = vst [vmem:[%s2536_s26 + $0x578] sm:$0xff] %v500_v47  ;;  %503 = vst [vmem:[%s2536_s26 + $0x580] sm:$0xff] %v502_v48  ;;  %v510_v52 = vld [vmem:[%s2528_s25 + $0x2120] sm:$0xff]  ;;  %v512_v53 = vld [vmem:[%s2528_s25 + $0x2128] sm:$0xff] }
  0x6b   : > { %505 = vst [vmem:[%s2536_s26 + $0x588] sm:$0xff] %v504_v49  ;;  %507 = vst [vmem:[%s2536_s26 + $0x590] sm:$0xff] %v506_v50  ;;  %v514_v54 = vld [vmem:[%s2528_s25 + $0x2130] sm:$0xff]  ;;  %v516_v55 = vld [vmem:[%s2528_s25 + $0x2138] sm:$0xff] }
  0x6c   : > { %509 = vst [vmem:[%s2536_s26 + $0x598] sm:$0xff] %v508_v51  ;;  %511 = vst [vmem:[%s2536_s26 + $0x5a0] sm:$0xff] %v510_v52  ;;  %v518_v56 = vld [vmem:[%s2528_s25 + $0x2280] sm:$0xff]  ;;  %v520_v57 = vld [vmem:[%s2528_s25 + $0x2288] sm:$0xff] }
  0x6d   : > { %513 = vst [vmem:[%s2536_s26 + $0x5a8] sm:$0xff] %v512_v53  ;;  %515 = vst [vmem:[%s2536_s26 + $0x5b0] sm:$0xff] %v514_v54  ;;  %v522_v58 = vld [vmem:[%s2528_s25 + $0x2290] sm:$0xff]  ;;  %v524_v59 = vld [vmem:[%s2528_s25 + $0x2298] sm:$0xff] }
  0x6e   : > { %517 = vst [vmem:[%s2536_s26 + $0x5b8] sm:$0xff] %v516_v55  ;;  %519 = vst [vmem:[%s2536_s26 + $0x5c0] sm:$0xff] %v518_v56  ;;  %v526_v60 = vld [vmem:[%s2528_s25 + $0x22a0] sm:$0xff]  ;;  %v528_v61 = vld [vmem:[%s2528_s25 + $0x22a8] sm:$0xff] }
  0x6f   : > { %521 = vst [vmem:[%s2536_s26 + $0x5c8] sm:$0xff] %v520_v57  ;;  %523 = vst [vmem:[%s2536_s26 + $0x5d0] sm:$0xff] %v522_v58  ;;  %v530_v62 = vld [vmem:[%s2528_s25 + $0x22b0] sm:$0xff]  ;;  %v532_v63 = vld [vmem:[%s2528_s25 + $0x22b8] sm:$0xff] }
  0x70   : > { %525 = vst [vmem:[%s2536_s26 + $0x5d8] sm:$0xff] %v524_v59  ;;  %527 = vst [vmem:[%s2536_s26 + $0x5e0] sm:$0xff] %v526_v60 }
  0x71   : > { %529 = vst [vmem:[%s2536_s26 + $0x5e8] sm:$0xff] %v528_v61  ;;  %531 = vst [vmem:[%s2536_s26 + $0x5f0] sm:$0xff] %v530_v62 }
  0x72   : > { %533 = vst [vmem:[%s2536_s26 + $0x5f8] sm:$0xff] %v532_v63 }
  0x73 PF: > { %p2209_p5 = scmp.ge.s32.totalorder %s2470_s14, 1  ;;  %p538_p6 = scmp.lt.s32.totalorder %s2470_s14, 7 }
  0x75   : > { %p539_p7 = pnand %p2209_p5, %p538_p6 }
  0x76   : > { %s545_s27 = sand.u32 (!%p539_p7), 1, %s2462_s12   ;;  %v2922_v0 = vld [vmem:[%s3246_s0] sm:$0xff] (!%p539_p7)  ;;  %vm1725_vm0 = vcmask (!%p539_p7), 498688   ;;  %v2472_v28 = vmov (!%p539_p7), 0   ;;  %vm1729_vm1 = vcmask (!%p539_p7), 1045504   ;;  %vm1730_vm2 = vcmask (!%p539_p7), 1046528  }
  0x77   : > { %542 = sbr.rel (%p539_p7) target bundleno = 537 (0x219), region = 51  ;;  %v2926_v1 = vcombine.high (!%p539_p7), %v2922_v0, %v2922_v0  ;;  %2445 = vset.pattern.permute.xlu0 (!%p539_p7), %v2472_v28  ;;  %s2210_s7 = sshll.u32 (!%p539_p7), %s2203_s15, 4 }
  0x78   : > { %s2418_s30 = smul.u32 (!%p539_p7), 1536, %s545_s27  ;;  %p570_p8 = scmp.lt.s32.totalorder (!%p539_p7), %s2210_s7, 95 }
  0x79   : > { %2406 = vmatprep.mubr.msk.bf16.mxu0 (!%p539_p7), %vm1725_vm0, %v2926_v1  ;;  %2407 = vmatprep.mubr.msk.bf16.mxu1 (!%p539_p7), %vm1725_vm0, %v2926_v1 }
  0x7a   : > { %s2932_s4 = scalar_lea.vmem (!%p539_p7), [#allocation2], %s2418_s30 }
  0x7b   : > { %v577_v2 = vld [vmem:[%s2932_s4] sm:$0xff] (!%p539_p7)  ;;  %v578_v4 = vld [vmem:[%s2932_s4 + $0x8] sm:$0xff] (!%p539_p7) }
  0x7c   : > { %v585_v3 = vld [vmem:[%s2932_s4 + $0x40] sm:$0xff] (!%p539_p7)  ;;  %v586_v6 = vld [vmem:[%s2932_s4 + $0x48] sm:$0xff] (!%p539_p7) }
  0x7d   : > { %v2215_v5 = vcombine.high (!%p539_p7), %v577_v2, %v585_v3  ;;  %v2214_v7 = vcombine.low (!%p539_p7), %v577_v2, %v585_v3  ;;  %v593_v8 = vld [vmem:[%s2932_s4 + $0x80] sm:$0xff] (!%p539_p7)  ;;  %v2217_v10 = vcombine.high (!%p539_p7), %v578_v4, %v586_v6  ;;  %v2216_v11 = vcombine.low (!%p539_p7), %v578_v4, %v586_v6  ;;  %v594_v13 = vld [vmem:[%s2932_s4 + $0x88] sm:$0xff] (!%p539_p7) }
  0x7e   : > { %v601_v9 = vld [vmem:[%s2932_s4 + $0xc0] sm:$0xff]  ;;  %v602_v14 = vld [vmem:[%s2932_s4 + $0xc8] sm:$0xff]  ;;  %s3254_s7 = smov (!%p570_p8, %s2210_s7), 95 }
  0x7f   : > { %v2231_v12 = vcombine.high %v593_v8, %v601_v9  ;;  %v609_v15 = vld [vmem:[%s2932_s4 + $0x100] sm:$0xff]  ;;  %1781 = vmatprep.subr.bf16.mxu0 %v2215_v5  ;;  %v2233_v16 = vcombine.high %v594_v13, %v602_v14  ;;  %v610_v18 = vld [vmem:[%s2932_s4 + $0x108] sm:$0xff]  ;;  %1822 = vmatprep.subr.bf16.mxu1 %v2217_v10  ;;  %v2230_v20 = vcombine.low %v593_v8, %v601_v9  ;;  %s2211_s8 = sshll.u32 %s3254_s7, 3 }
  0x80   : > { %v617_v17 = vld [vmem:[%s2932_s4 + $0x140] sm:$0xff]  ;;  %v618_v19 = vld [vmem:[%s2932_s4 + $0x148] sm:$0xff]  ;;  %1782 = vmatpush1.bf16.msra.mxu0 %v2214_v7  ;;  %1823 = vmatpush1.bf16.msra.mxu1 %v2216_v11  ;;  %v2232_v21 = vcombine.low %v594_v13, %v602_v14  ;;  %s3203_s11 = scalar_lea.vmem %s3249_s3, %s2211_s8 }
  0x81   : > { %1783 = vmatprep.subr.bf16.mxu0 %v2231_v12  ;;  %v2247_v22 = vcombine.high %v609_v15, %v617_v17  ;;  %1824 = vmatprep.subr.bf16.mxu1 %v2233_v16  ;;  %v2249_v23 = vcombine.high %v610_v18, %v618_v19  ;;  %v625_v24 = vld [vmem:[%s2932_s4 + $0x180] sm:$0xff]  ;;  %v626_v26 = vld [vmem:[%s2932_s4 + $0x188] sm:$0xff]  ;;  %v2246_v29 = vcombine.low %v609_v15, %v617_v17 }
  0x82   : > { %v633_v25 = vld [vmem:[%s2932_s4 + $0x1c0] sm:$0xff]  ;;  %v634_v27 = vld [vmem:[%s2932_s4 + $0x1c8] sm:$0xff]  ;;  %v2248_v30 = vcombine.low %v610_v18, %v618_v19 }
  0x83   : > { %v2263_v31 = vcombine.high %v625_v24, %v633_v25  ;;  %v2265_v32 = vcombine.high %v626_v26, %v634_v27  ;;  %v641_v33 = vld [vmem:[%s2932_s4 + $0x200] sm:$0xff]  ;;  %v642_v35 = vld [vmem:[%s2932_s4 + $0x208] sm:$0xff]  ;;  %v2262_v37 = vcombine.low %v625_v24, %v633_v25  ;;  %v2264_v38 = vcombine.low %v626_v26, %v634_v27 }
  0x84   : > { %1784 = vmatpush1.bf16.msra.mxu0 %v2230_v20  ;;  %1825 = vmatpush1.bf16.msra.mxu1 %v2232_v21  ;;  %v649_v34 = vld [vmem:[%s2932_s4 + $0x240] sm:$0xff]  ;;  %v650_v36 = vld [vmem:[%s2932_s4 + $0x248] sm:$0xff]  ;;  %v2473_v25 = vmov 65535  }
  0x85   : > { %1785 = vmatprep.subr.bf16.mxu0 %v2247_v22  ;;  %1826 = vmatprep.subr.bf16.mxu1 %v2249_v23  ;;  %v2279_v39 = vcombine.high %v641_v33, %v649_v34  ;;  %v2281_v40 = vcombine.high %v642_v35, %v650_v36  ;;  %v657_v41 = vld [vmem:[%s2932_s4 + $0x280] sm:$0xff]  ;;  %v658_v43 = vld [vmem:[%s2932_s4 + $0x288] sm:$0xff]  ;;  %v2278_v45 = vcombine.low %v641_v33, %v649_v34  ;;  %v1731_v26 = vsel %vm1729_vm1, 4294967295, %v2473_v25  ;;  %v643_v25 = vld [vmem:[%s2932_s4 + $0x210] sm:$0xff] }
  0x86   : > { %v665_v42 = vld [vmem:[%s2932_s4 + $0x2c0] sm:$0xff]  ;;  %v666_v44 = vld [vmem:[%s2932_s4 + $0x2c8] sm:$0xff]  ;;  %v2280_v46 = vcombine.low %v642_v35, %v650_v36  ;;  %v2982_v34 = vsel %vm1730_vm2, %v1731_v26, 0  ;;  %v651_v26 = vld [vmem:[%s2932_s4 + $0x250] sm:$0xff] }
  0x87   : > { %v2295_v47 = vcombine.high %v657_v41, %v665_v42  ;;  %v2297_v48 = vcombine.high %v658_v43, %v666_v44  ;;  %v673_v49 = vld [vmem:[%s2932_s4 + $0x300] sm:$0xff]  ;;  %v674_v51 = vld [vmem:[%s2932_s4 + $0x308] sm:$0xff]  ;;  %v2294_v53 = vcombine.low %v657_v41, %v665_v42  ;;  %v2296_v54 = vcombine.low %v658_v43, %v666_v44  ;;  %v579_v42 = vld [vmem:[%s2932_s4 + $0x10] sm:$0xff] }
  0x88   : > { %1786 = vmatpush1.bf16.msra.mxu0 %v2246_v29  ;;  %1827 = vmatpush1.bf16.msra.mxu1 %v2248_v30  ;;  %v681_v50 = vld [vmem:[%s2932_s4 + $0x340] sm:$0xff]  ;;  %v682_v52 = vld [vmem:[%s2932_s4 + $0x348] sm:$0xff]  ;;  %v587_v43 = vld [vmem:[%s2932_s4 + $0x50] sm:$0xff] }
  0x89   : > { %1787 = vmatprep.subr.bf16.mxu0 %v2263_v31  ;;  %1828 = vmatprep.subr.bf16.mxu1 %v2265_v32  ;;  %v2311_v55 = vcombine.high %v673_v49, %v681_v50  ;;  %v2313_v56 = vcombine.high %v674_v51, %v682_v52  ;;  %v689_v57 = vld [vmem:[%s2932_s4 + $0x380] sm:$0xff]  ;;  %v690_v59 = vld [vmem:[%s2932_s4 + $0x388] sm:$0xff]  ;;  %v2310_v61 = vcombine.low %v673_v49, %v681_v50  ;;  %v580_v44 = vld [vmem:[%s2932_s4 + $0x18] sm:$0xff] }
  0x8a   : > { %v697_v58 = vld [vmem:[%s2932_s4 + $0x3c0] sm:$0xff]  ;;  %v698_v60 = vld [vmem:[%s2932_s4 + $0x3c8] sm:$0xff]  ;;  %v2312_v62 = vcombine.low %v674_v51, %v682_v52  ;;  %v595_v49 = vld [vmem:[%s2932_s4 + $0x90] sm:$0xff] }
  0x8b   : > { %v2327_v63 = vcombine.high %v689_v57, %v697_v58  ;;  %v2329_v2 = vcombine.high %v690_v59, %v698_v60  ;;  %v705_v3 = vld [vmem:[%s2932_s4 + $0x400] sm:$0xff]  ;;  %v706_v5 = vld [vmem:[%s2932_s4 + $0x408] sm:$0xff]  ;;  %v2326_v7 = vcombine.low %v689_v57, %v697_v58  ;;  %v2328_v8 = vcombine.low %v690_v59, %v698_v60  ;;  %v603_v52 = vld [vmem:[%s2932_s4 + $0xd0] sm:$0xff] }
  0x8c   : > { %1788 = vmatpush1.bf16.msra.mxu0 %v2262_v37  ;;  %1829 = vmatpush1.bf16.msra.mxu1 %v2264_v38  ;;  %v713_v4 = vld [vmem:[%s2932_s4 + $0x440] sm:$0xff]  ;;  %v714_v6 = vld [vmem:[%s2932_s4 + $0x448] sm:$0xff]  ;;  %v2218_v59 = vcombine.low %v579_v42, %v587_v43 }
  0x8d   : > { %1789 = vmatprep.subr.bf16.mxu0 %v2279_v39  ;;  %1830 = vmatprep.subr.bf16.mxu1 %v2281_v40  ;;  %v2343_v9 = vcombine.high %v705_v3, %v713_v4  ;;  %v2345_v10 = vcombine.high %v706_v5, %v714_v6  ;;  %v721_v11 = vld [vmem:[%s2932_s4 + $0x480] sm:$0xff]  ;;  %v722_v13 = vld [vmem:[%s2932_s4 + $0x488] sm:$0xff]  ;;  %v2342_v15 = vcombine.low %v705_v3, %v713_v4 }
  0x8e   : > { %v729_v12 = vld [vmem:[%s2932_s4 + $0x4c0] sm:$0xff]  ;;  %v730_v14 = vld [vmem:[%s2932_s4 + $0x4c8] sm:$0xff]  ;;  %v2344_v16 = vcombine.low %v706_v5, %v714_v6  ;;  %v611_v5 = vld [vmem:[%s2932_s4 + $0x110] sm:$0xff] }
  0x8f   : > { %v2359_v17 = vcombine.high %v721_v11, %v729_v12  ;;  %v737_v18 = vld [vmem:[%s2932_s4 + $0x500] sm:$0xff]  ;;  %v2361_v20 = vcombine.high %v722_v13, %v730_v14  ;;  %v738_v21 = vld [vmem:[%s2932_s4 + $0x508] sm:$0xff]  ;;  %v2358_v29 = vcombine.low %v721_v11, %v729_v12  ;;  %v2360_v30 = vcombine.low %v722_v13, %v730_v14  ;;  %v619_v6 = vld [vmem:[%s2932_s4 + $0x150] sm:$0xff] }
  0x90   : > { %1790 = vmatpush1.bf16.msra.mxu0 %v2278_v45  ;;  %1831 = vmatpush1.bf16.msra.mxu1 %v2280_v46  ;;  %v745_v19 = vld [vmem:[%s2932_s4 + $0x540] sm:$0xff]  ;;  %v746_v24 = vld [vmem:[%s2932_s4 + $0x548] sm:$0xff]  ;;  %v588_v45 = vld [vmem:[%s2932_s4 + $0x58] sm:$0xff]  ;;  %v2234_v13 = vcombine.low %v595_v49, %v603_v52 }
  0x91   : > { %1791 = vmatprep.subr.bf16.mxu0 %v2295_v47  ;;  %1832 = vmatprep.subr.bf16.mxu1 %v2297_v48  ;;  %v753_v22 = vld [vmem:[%s2932_s4 + $0x580] sm:$0xff]  ;;  %v754_v27 = vld [vmem:[%s2932_s4 + $0x588] sm:$0xff]  ;;  %v2375_v31 = vcombine.high %v737_v18, %v745_v19  ;;  %v2377_v33 = vcombine.high %v738_v21, %v746_v24  ;;  %v2374_v36 = vcombine.low %v737_v18, %v745_v19  ;;  %v635_v18 = vld [vmem:[%s2932_s4 + $0x1d0] sm:$0xff] }
  0x92   : > { %v761_v23 = vld [vmem:[%s2932_s4 + $0x5c0] sm:$0x77]  ;;  %v762_v28 = vld [vmem:[%s2932_s4 + $0x5c8] sm:$0x77]  ;;  %v2376_v38 = vcombine.low %v738_v21, %v746_v24  ;;  %v2219_v48 = vcombine.high %v579_v42, %v587_v43  ;;  %v2221_v51 = vcombine.high %v580_v44, %v588_v45  ;;  %v2220_v60 = vcombine.low %v580_v44, %v588_v45  ;;  %v628_v19 = vld [vmem:[%s2932_s4 + $0x198] sm:$0xff] }
  0x93   : > { %v2391_v32 = vcombine.high %v753_v22, %v761_v23  ;;  %v2393_v35 = vcombine.high %v754_v27, %v762_v28  ;;  %v2390_v37 = vcombine.low %v753_v22, %v761_v23  ;;  %v2392_v40 = vcombine.low %v754_v27, %v762_v28  ;;  %v769_v50 = vld [vmem:[%s3248_s2] sm:$0xff]  ;;  %v758_v58 = vld [vmem:[%s2932_s4 + $0x5a8] sm:$0xff]  ;;  %v644_v27 = vld [vmem:[%s2932_s4 + $0x218] sm:$0xff] }
  0x94   : > { %1792 = vmatpush1.bf16.msra.mxu0 %v2294_v53  ;;  %1833 = vmatpush1.bf16.msra.mxu1 %v2296_v54  ;;  %v596_v53 = vld [vmem:[%s2932_s4 + $0x98] sm:$0xff]  ;;  %v765_v57 = vld [vmem:[%s2932_s4 + $0x5e0] sm:$0x77]  ;;  %v2250_v21 = vcombine.low %v611_v5, %v619_v6 }
  0x95   : > { %1793 = vmatprep.subr.bf16.mxu0 %v2311_v55  ;;  %1834 = vmatprep.subr.bf16.mxu1 %v2313_v56  ;;  %v1737_v39 = vand.u32 %v2391_v32, %v2982_v34  ;;  %v1743_v41 = vand.u32 %v2393_v35, %v2982_v34  ;;  %v1734_v46 = vand.u32 %v2390_v37, %v2982_v34  ;;  %v604_v54 = vld [vmem:[%s2932_s4 + $0xd8] sm:$0xff]  ;;  %v757_v56 = vld [vmem:[%s2932_s4 + $0x5a0] sm:$0xff]  ;;  %v659_v32 = vld [vmem:[%s2932_s4 + $0x290] sm:$0xff] }
  0x96   : > { %v1740_v47 = vand.u32 %v2392_v40, %v2982_v34  ;;  %772 = vperm.xlu0 %2445, %v769_v50   ;;  %v3001_v55 = vcombine.low %v2922_v0, %v2922_v0  ;;  %v2237_v0 = vcombine.high %v596_v53, %v604_v54  ;;  %v2236_v14 = vcombine.low %v596_v53, %v604_v54  ;;  %v652_v28 = vld [vmem:[%s2932_s4 + $0x258] sm:$0xff]  ;;  %v667_v35 = vld [vmem:[%s2932_s4 + $0x2d0] sm:$0xff] }
  0x97   : > { %v668_v37 = vld [vmem:[%s2932_s4 + $0x2d8] sm:$0xff]  ;;  %v2284_v42 = vcombine.low %v644_v27, %v652_v28  ;;  %v675_v50 = vld [vmem:[%s2932_s4 + $0x310] sm:$0xff] }
  0x98   : > { %1794 = vmatpush1.bf16.msra.mxu0 %v2310_v61  ;;  %1835 = vmatpush1.bf16.msra.mxu1 %v2312_v62  ;;  %v2398_v61 = vcombine.low %v757_v56, %v765_v57  ;;  %v2399_v62 = vcombine.high %v757_v56, %v765_v57  ;;  %v760_v40 = vld [vmem:[%s2932_s4 + $0x5b8] sm:$0xff] }
  0x99   : > { %1795 = vmatprep.subr.bf16.mxu0 %v2327_v63  ;;  %1836 = vmatprep.subr.bf16.mxu1 %v2329_v2  ;;  %v766_v63 = vld [vmem:[%s2932_s4 + $0x5e8] sm:$0x77]  ;;  %v2235_v2 = vcombine.high %v595_v49, %v603_v52  ;;  %v768_v45 = vld [vmem:[%s2932_s4 + $0x5f8] sm:$0x77] }
  0x9a   : > { %v2400_v3 = vcombine.low %v758_v58, %v766_v63  ;;  %v2401_v4 = vcombine.high %v758_v58, %v766_v63  ;;  %v676_v54 = vld [vmem:[%s2932_s4 + $0x318] sm:$0xff]  ;;  %v691_v63 = vld [vmem:[%s2932_s4 + $0x390] sm:$0xff] }
  0x9b   : > { %v684_v56 = vld [vmem:[%s2932_s4 + $0x358] sm:$0xff] }
  0x9c   : > { %1796 = vmatpush1.bf16.msra.mxu0 %v2326_v7  ;;  %1837 = vmatpush1.bf16.msra.mxu1 %v2328_v8  ;;  %v3010_v7 = vand.u32 %v2399_v62, %v2982_v34  ;;  %v3013_v8 = vand.u32 %v2398_v61, %v2982_v34  ;;  %v3019_v11 = vand.u32 %v2401_v4, %v2982_v34  ;;  %v700_v4 = vld [vmem:[%s2932_s4 + $0x3d8] sm:$0xff] }
  0x9d   : > { %1797 = vmatprep.subr.bf16.mxu0 %v2343_v9  ;;  %1838 = vmatprep.subr.bf16.mxu1 %v2345_v10  ;;  %v612_v9 = vld [vmem:[%s2932_s4 + $0x118] sm:$0xff]  ;;  %v3022_v12 = vand.u32 %v2400_v3, %v2982_v34  ;;  %v2317_v62 = vcombine.high %v676_v54, %v684_v56 }
  0x9e   : > { %v620_v10 = vld [vmem:[%s2932_s4 + $0x158] sm:$0xff] }
  0x9f   : > { %v2252_v22 = vcombine.low %v612_v9, %v620_v10  ;;  %v692_v3 = vld [vmem:[%s2932_s4 + $0x398] sm:$0xff] }
  0xa0   : > { %1798 = vmatpush1.bf16.msra.mxu0 %v2342_v15  ;;  %1839 = vmatpush1.bf16.msra.mxu1 %v2344_v16  ;;  %v2251_v15 = vcombine.high %v611_v5, %v619_v6  ;;  %v2253_v16 = vcombine.high %v612_v9, %v620_v10  ;;  %v2316_v5 = vcombine.low %v676_v54, %v684_v56  ;;  %v707_v10 = vld [vmem:[%s2932_s4 + $0x410] sm:$0xff]  ;;  %v590_v54 = vld [vmem:[%s2932_s4 + $0x68] sm:$0xff] }
  0xa1   : > { %1799 = vmatprep.subr.bf16.mxu0 %v2359_v17  ;;  %1840 = vmatprep.subr.bf16.mxu1 %v2361_v20  ;;  %v627_v17 = vld [vmem:[%s2932_s4 + $0x190] sm:$0xff]  ;;  %v636_v20 = vld [vmem:[%s2932_s4 + $0x1d8] sm:$0xff]  ;;  %v2333_v9 = vcombine.high %v692_v3, %v700_v4 }
  0xa2   : > { %v2267_v23 = vcombine.high %v627_v17, %v635_v18  ;;  %v2269_v24 = vcombine.high %v628_v19, %v636_v20 }
  0xa4   : > { %1800 = vmatpush1.bf16.msra.mxu0 %v2358_v29  ;;  %1841 = vmatpush1.bf16.msra.mxu1 %v2360_v30  ;;  %v2266_v29 = vcombine.low %v627_v17, %v635_v18  ;;  %v2268_v30 = vcombine.low %v628_v19, %v636_v20  ;;  %v2332_v17 = vcombine.low %v692_v3, %v700_v4  ;;  %v723_v20 = vld [vmem:[%s2932_s4 + $0x490] sm:$0xff]  ;;  %v606_v3 = vld [vmem:[%s2932_s4 + $0xe8] sm:$0xff] }
  0xa5   : > { %1801 = vmatprep.subr.bf16.mxu0 %v2375_v31  ;;  %1842 = vmatprep.subr.bf16.mxu1 %v2377_v33  ;;  %v2283_v31 = vcombine.high %v643_v25, %v651_v26  ;;  %v2285_v33 = vcombine.high %v644_v27, %v652_v28  ;;  %v739_v27 = vld [vmem:[%s2932_s4 + $0x510] sm:$0xff] }
  0xa6   : > { %v747_v28 = vld [vmem:[%s2932_s4 + $0x550] sm:$0xff] }
  0xa8   : > { %1802 = vmatpush1.bf16.msra.mxu0 %v2374_v36  ;;  %1843 = vmatpush1.bf16.msra.mxu1 %v2376_v38  ;;  %v660_v36 = vld [vmem:[%s2932_s4 + $0x298] sm:$0xff]  ;;  %v759_v38 = vld [vmem:[%s2932_s4 + $0x5b0] sm:$0xff] }
  0xa9   : > { %1803 = vmatprep.subr.bf16.mxu0 %v1737_v39  ;;  %1844 = vmatprep.subr.bf16.mxu1 %v1743_v41  ;;  %v767_v39 = vld [vmem:[%s2932_s4 + $0x5f0] sm:$0x77]  ;;  %v2282_v41 = vcombine.low %v643_v25, %v651_v26  ;;  %v2301_v49 = vcombine.high %v660_v36, %v668_v37 }
  0xaa   : > { %v2402_v43 = vcombine.low %v759_v38, %v767_v39  ;;  %v2403_v44 = vcombine.high %v759_v38, %v767_v39  ;;  %v2379_v39 = vcombine.high %v739_v27, %v747_v28 }
  0xac   : > { %1804 = vmatpush1.bf16.msra.mxu0 %v1734_v46  ;;  %1845 = vmatpush1.bf16.msra.mxu1 %v1740_v47  ;;  %v2299_v46 = vcombine.high %v659_v32, %v667_v35  ;;  %v2404_v47 = vcombine.low %v760_v40, %v768_v45  ;;  %v3048_v52 = vand.u32 %v2403_v44, %v2982_v34 }
  0xad   : > { %1863 = vmatprep.subr.bf16.mxu0 %v2219_v48  ;;  %1904 = vmatprep.subr.bf16.mxu1 %v2221_v51  ;;  %v2405_v48 = vcombine.high %v760_v40, %v768_v45  ;;  %v683_v51 = vld [vmem:[%s2932_s4 + $0x350] sm:$0xff]  ;;  %v3051_v53 = vand.u32 %v2402_v43, %v2982_v34  ;;  %v2378_v43 = vcombine.low %v739_v27, %v747_v28  ;;  %v653_v27 = vld [vmem:[%s2932_s4 + $0x260] sm:$0xff]  ;;  %v646_v28 = vld [vmem:[%s2932_s4 + $0x228] sm:$0xff] }
  0xae   : > { %v3059_v58 = vand.u32 %v2404_v47, %v2982_v34  ;;  %v2315_v61 = vcombine.high %v675_v50, %v683_v51 }
  0xaf   : > { %1814 = vmatmul.mubr.bf16.vlgmr.msra.gmra.mrb[0].mxu0 %v3001_v55  ;;  %1855 = vmatmul.mubr.bf16.vlgmr.msra.gmra.mrb[0].mxu1 %v3001_v55  ;;  %v3056_v57 = vand.u32 %v2405_v48, %v2982_v34 }
  0xb0   : > { %1864 = vmatpush1.bf16.msra.mxu0 %v2218_v59  ;;  %1905 = vmatpush1.bf16.msra.mxu1 %v2220_v60  ;;  %v2298_v59 = vcombine.low %v659_v32, %v667_v35  ;;  %v2300_v60 = vcombine.low %v660_v36, %v668_v37  ;;  %v763_v32 = vld [vmem:[%s2932_s4 + $0x5d0] sm:$0x77]  ;;  %v756_v35 = vld [vmem:[%s2932_s4 + $0x598] sm:$0xff] }
  0xb1   : > { %1865 = vmatprep.subr.bf16.mxu0 %v2235_v2  ;;  %1906 = vmatprep.subr.bf16.mxu1 %v2237_v0  ;;  %v699_v2 = vld [vmem:[%s2932_s4 + $0x3d0] sm:$0xff]  ;;  %v2314_v0 = vcombine.low %v675_v50, %v683_v51  ;;  %v764_v36 = vld [vmem:[%s2932_s4 + $0x5d8] sm:$0x77]  ;;  %v589_v50 = vld [vmem:[%s2932_s4 + $0x60] sm:$0xff] }
  0xb2   : > { %2408 = vmatprep.mubr.msk.bf16.mxu0 %vm1725_vm0, %v2926_v1  ;;  %2409 = vmatprep.mubr.msk.bf16.mxu1 %vm1725_vm0, %v2926_v1  ;;  %v2331_v6 = vcombine.high %v691_v63, %v699_v2  ;;  %v2396_v47 = vcombine.low %v756_v35, %v764_v36  ;;  %v582_v51 = vld [vmem:[%s2932_s4 + $0x28] sm:$0xff] }
  0xb4   : > { %1866 = vmatpush1.bf16.msra.mxu0 %v2234_v13  ;;  %1907 = vmatpush1.bf16.msra.mxu1 %v2236_v14  ;;  %v715_v13 = vld [vmem:[%s2932_s4 + $0x450] sm:$0xff]  ;;  %v708_v14 = vld [vmem:[%s2932_s4 + $0x418] sm:$0xff] }
  0xb5   : > { %1867 = vmatprep.subr.bf16.mxu0 %v2251_v15  ;;  %1908 = vmatprep.subr.bf16.mxu1 %v2253_v16  ;;  %v716_v15 = vld [vmem:[%s2932_s4 + $0x458] sm:$0xff]  ;;  %v2330_v16 = vcombine.low %v691_v63, %v699_v2  ;;  %v2347_v18 = vcombine.high %v707_v10, %v715_v13  ;;  %v605_v63 = vld [vmem:[%s2932_s4 + $0xe0] sm:$0xff]  ;;  %v598_v2 = vld [vmem:[%s2932_s4 + $0xa8] sm:$0xff] }
  0xb6   : > { %v2349_v19 = vcombine.high %v708_v14, %v716_v15  ;;  %v2348_v25 = vcombine.low %v708_v14, %v716_v15  ;;  %v2240_v15 = vcombine.low %v598_v2, %v606_v3 }
  0xb8   : > { %1868 = vmatpush1.bf16.msra.mxu0 %v2250_v21  ;;  %1909 = vmatpush1.bf16.msra.mxu1 %v2252_v22  ;;  %v731_v21 = vld [vmem:[%s2932_s4 + $0x4d0] sm:$0xff]  ;;  %v724_v22 = vld [vmem:[%s2932_s4 + $0x498] sm:$0xff] }
  0xb9   : > { %1869 = vmatprep.subr.bf16.mxu0 %v2267_v23  ;;  %1910 = vmatprep.subr.bf16.mxu1 %v2269_v24  ;;  %v732_v23 = vld [vmem:[%s2932_s4 + $0x4d8] sm:$0xff]  ;;  %v2346_v24 = vcombine.low %v707_v10, %v715_v13  ;;  %v2363_v26 = vcombine.high %v723_v20, %v731_v21  ;;  %v2362_v37 = vcombine.low %v723_v20, %v731_v21  ;;  %v614_v10 = vld [vmem:[%s2932_s4 + $0x128] sm:$0xff] }
  0xba   : > { %v2364_v38 = vcombine.low %v724_v22, %v732_v23  ;;  %v622_v13 = vld [vmem:[%s2932_s4 + $0x168] sm:$0xff] }
  0xbb   : > { %v630_v20 = vld [vmem:[%s2932_s4 + $0x1a8] sm:$0xff] }
  0xbc   : > { %1870 = vmatpush1.bf16.msra.mxu0 %v2266_v29  ;;  %1911 = vmatpush1.bf16.msra.mxu1 %v2268_v30  ;;  %v2365_v29 = vcombine.high %v724_v22, %v732_v23  ;;  %v740_v30 = vld [vmem:[%s2932_s4 + $0x518] sm:$0xff]  ;;  %v638_v21 = vld [vmem:[%s2932_s4 + $0x1e8] sm:$0xff]  ;;  %v2256_v23 = vcombine.low %v614_v10, %v622_v13 }
  0xbd   : > { %1871 = vmatprep.subr.bf16.mxu0 %v2283_v31  ;;  %1912 = vmatprep.subr.bf16.mxu1 %v2285_v33  ;;  %v755_v31 = vld [vmem:[%s2932_s4 + $0x590] sm:$0xff]  ;;  %v748_v33 = vld [vmem:[%s2932_s4 + $0x558] sm:$0xff] }
  0xbe   : > { %v2395_v40 = vcombine.high %v755_v31, %v763_v32  ;;  %v2394_v44 = vcombine.low %v755_v31, %v763_v32  ;;  %v2380_v45 = vcombine.low %v740_v30, %v748_v33  ;;  %v2272_v31 = vcombine.low %v630_v20, %v638_v21 }
  0xc0   : > { %1872 = vmatpush1.bf16.msra.mxu0 %v2282_v41  ;;  %1913 = vmatpush1.bf16.msra.mxu1 %v2284_v42  ;;  %v2381_v41 = vcombine.high %v740_v30, %v748_v33  ;;  %v2397_v42 = vcombine.high %v756_v35, %v764_v36  ;;  %v1746_v56 = vand.u32 %v2394_v44, %v2982_v34  ;;  %v661_v35 = vld [vmem:[%s2932_s4 + $0x2a0] sm:$0xff] }
  0xc1   : > { %1873 = vmatprep.subr.bf16.mxu0 %v2299_v46  ;;  %1914 = vmatprep.subr.bf16.mxu1 %v2301_v49  ;;  %v1749_v46 = vand.u32 %v2395_v40, %v2982_v34  ;;  %v581_v49 = vld [vmem:[%s2932_s4 + $0x20] sm:$0xff] }
  0xc2   : > { %v1755_v48 = vand.u32 %v2397_v42, %v2982_v34  ;;  %v2222_v4 = vcombine.low %v581_v49, %v589_v50  ;;  %v669_v36 = vld [vmem:[%s2932_s4 + $0x2e0] sm:$0xff] }
  0xc3   : > { %v685_v44 = vld [vmem:[%s2932_s4 + $0x360] sm:$0xff] }
  0xc4   : > { %1874 = vmatpush1.bf16.msra.mxu0 %v2298_v59  ;;  %1915 = vmatpush1.bf16.msra.mxu1 %v2300_v60  ;;  %v1752_v59 = vand.u32 %v2396_v47, %v2982_v34  ;;  %v2223_v60 = vcombine.high %v581_v49, %v589_v50  ;;  %v2241_v34 = vcombine.high %v598_v2, %v606_v3  ;;  %v709_v2 = vld [vmem:[%s2932_s4 + $0x420] sm:$0xff] }
  0xc5   : > { %1875 = vmatprep.subr.bf16.mxu0 %v2315_v61  ;;  %1916 = vmatprep.subr.bf16.mxu1 %v2317_v62  ;;  %v2225_v61 = vcombine.high %v582_v51, %v590_v54  ;;  %v597_v62 = vld [vmem:[%s2932_s4 + $0xa0] sm:$0xff]  ;;  %v2302_v47 = vcombine.low %v661_v35, %v669_v36 }
  0xc6   : > { %v2238_v14 = vcombine.low %v597_v62, %v605_v63  ;;  %v717_v3 = vld [vmem:[%s2932_s4 + $0x460] sm:$0xff] }
  0xc8   : > { %1876 = vmatpush1.bf16.msra.mxu0 %v2314_v0  ;;  %1917 = vmatpush1.bf16.msra.mxu1 %v2316_v5  ;;  %v2224_v0 = vcombine.low %v582_v51, %v590_v54  ;;  %v2239_v5 = vcombine.high %v597_v62, %v605_v63  ;;  %v693_v51 = vld [vmem:[%s2932_s4 + $0x3a0] sm:$0xff] }
  0xc9   : > { %1877 = vmatprep.subr.bf16.mxu0 %v2331_v6  ;;  %1918 = vmatprep.subr.bf16.mxu1 %v2333_v9  ;;  %v613_v6 = vld [vmem:[%s2932_s4 + $0x120] sm:$0xff] }
  0xca   : > { %v621_v9 = vld [vmem:[%s2932_s4 + $0x160] sm:$0xff] }
  0xcb   : > { %v2254_v22 = vcombine.low %v613_v6, %v621_v9  ;;  %v701_v54 = vld [vmem:[%s2932_s4 + $0x3e0] sm:$0xff] }
  0xcc   : > { %1878 = vmatpush1.bf16.msra.mxu0 %v2330_v16  ;;  %1919 = vmatpush1.bf16.msra.mxu1 %v2332_v17  ;;  %v2255_v16 = vcombine.high %v613_v6, %v621_v9  ;;  %v2257_v17 = vcombine.high %v614_v10, %v622_v13  ;;  %v2335_v62 = vcombine.high %v693_v51, %v701_v54  ;;  %v725_v10 = vld [vmem:[%s2932_s4 + $0x4a0] sm:$0xff] }
  0xcd   : > { %1879 = vmatprep.subr.bf16.mxu0 %v2347_v18  ;;  %1920 = vmatprep.subr.bf16.mxu1 %v2349_v19  ;;  %v629_v18 = vld [vmem:[%s2932_s4 + $0x1a0] sm:$0xff]  ;;  %v2351_v6 = vcombine.high %v709_v2, %v717_v3 }
  0xce   : > { %v637_v19 = vld [vmem:[%s2932_s4 + $0x1e0] sm:$0xff] }
  0xcf   : > { %v2270_v30 = vcombine.low %v629_v18, %v637_v19  ;;  %v733_v13 = vld [vmem:[%s2932_s4 + $0x4e0] sm:$0xff] }
  0xd0   : > { %1880 = vmatpush1.bf16.msra.mxu0 %v2346_v24  ;;  %1921 = vmatpush1.bf16.msra.mxu1 %v2348_v25  ;;  %v2271_v24 = vcombine.high %v629_v18, %v637_v19  ;;  %v2273_v25 = vcombine.high %v630_v20, %v638_v21  ;;  %v2367_v18 = vcombine.high %v725_v10, %v733_v13  ;;  %v741_v20 = vld [vmem:[%s2932_s4 + $0x520] sm:$0xff] }
  0xd1   : > { %1881 = vmatprep.subr.bf16.mxu0 %v2363_v26  ;;  %1922 = vmatprep.subr.bf16.mxu1 %v2365_v29  ;;  %v645_v26 = vld [vmem:[%s2932_s4 + $0x220] sm:$0xff]  ;;  %v654_v29 = vld [vmem:[%s2932_s4 + $0x268] sm:$0xff] }
  0xd2   : > { %v2287_v32 = vcombine.high %v645_v26, %v653_v27  ;;  %v2289_v33 = vcombine.high %v646_v28, %v654_v29  ;;  %v2288_v40 = vcombine.low %v646_v28, %v654_v29  ;;  %v749_v21 = vld [vmem:[%s2932_s4 + $0x560] sm:$0xff] }
  0xd3   : > { %v2382_v28 = vcombine.low %v741_v20, %v749_v21 }
  0xd4   : > { %1882 = vmatpush1.bf16.msra.mxu0 %v2362_v37  ;;  %1923 = vmatpush1.bf16.msra.mxu1 %v2364_v38  ;;  %v662_v37 = vld [vmem:[%s2932_s4 + $0x2a8] sm:$0xff] }
  0xd5   : > { %1883 = vmatprep.subr.bf16.mxu0 %v2379_v39  ;;  %1924 = vmatprep.subr.bf16.mxu1 %v2381_v41  ;;  %v670_v38 = vld [vmem:[%s2932_s4 + $0x2e8] sm:$0xff]  ;;  %v2286_v39 = vcombine.low %v645_v26, %v653_v27  ;;  %v2303_v41 = vcombine.high %v661_v35, %v669_v36  ;;  %v2383_v26 = vcombine.high %v741_v20, %v749_v21  ;;  %v688_v20 = vld [vmem:[%s2932_s4 + $0x378] sm:$0xff] }
  0xd6   : > { %v2305_v42 = vcombine.high %v662_v37, %v670_v38 }
  0xd8   : > { %1884 = vmatpush1.bf16.msra.mxu0 %v2378_v43  ;;  %1925 = vmatpush1.bf16.msra.mxu1 %v2380_v45  ;;  %v677_v43 = vld [vmem:[%s2932_s4 + $0x320] sm:$0xff]  ;;  %v678_v45 = vld [vmem:[%s2932_s4 + $0x328] sm:$0xff] }
  0xd9   : > { %1885 = vmatprep.subr.bf16.mxu0 %v1749_v46  ;;  %1926 = vmatprep.subr.bf16.mxu1 %v1755_v48  ;;  %v686_v46 = vld [vmem:[%s2932_s4 + $0x368] sm:$0xff]  ;;  %v2304_v48 = vcombine.low %v662_v37, %v670_v38  ;;  %v2319_v49 = vcombine.high %v677_v43, %v685_v44  ;;  %v599_v37 = vld [vmem:[%s2932_s4 + $0xb0] sm:$0xff] }
  0xda   : > { %v2321_v50 = vcombine.high %v678_v45, %v686_v46  ;;  %v607_v38 = vld [vmem:[%s2932_s4 + $0xf0] sm:$0xff] }
  0xdc   : > { %1886 = vmatpush1.bf16.msra.mxu0 %v1746_v56  ;;  %1927 = vmatpush1.bf16.msra.mxu1 %v1752_v59  ;;  %v694_v56 = vld [vmem:[%s2932_s4 + $0x3a8] sm:$0xff] }
  0xdd   : > { %1945 = vmatprep.subr.bf16.mxu0 %v2223_v60  ;;  %1986 = vmatprep.subr.bf16.mxu1 %v2225_v61  ;;  %v702_v59 = vld [vmem:[%s2932_s4 + $0x3e8] sm:$0xff]  ;;  %v2318_v60 = vcombine.low %v677_v43, %v685_v44  ;;  %v2320_v61 = vcombine.low %v678_v45, %v686_v46  ;;  %v623_v44 = vld [vmem:[%s2932_s4 + $0x170] sm:$0xff]  ;;  %v616_v45 = vld [vmem:[%s2932_s4 + $0x138] sm:$0xff] }
  0xde   : > { %v2337_v63 = vcombine.high %v694_v56, %v702_v59  ;;  %v624_v46 = vld [vmem:[%s2932_s4 + $0x178] sm:$0xff] }
  0xdf   : > { %1896 = vmatmul.mubr.bf16.vlgmr.msra.gmra.mrb[4].mxu0 %v3001_v55  ;;  %1937 = vmatmul.mubr.bf16.vlgmr.msra.gmra.mrb[4].mxu1 %v3001_v55 }
  0xe0   : > { %1946 = vmatpush1.bf16.msra.mxu0 %v2222_v4  ;;  %1987 = vmatpush1.bf16.msra.mxu1 %v2224_v0  ;;  %v710_v4 = vld [vmem:[%s2932_s4 + $0x428] sm:$0xff] }
  0xe1   : > { %1947 = vmatprep.subr.bf16.mxu0 %v2239_v5  ;;  %1988 = vmatprep.subr.bf16.mxu1 %v2241_v34  ;;  %v718_v0 = vld [vmem:[%s2932_s4 + $0x468] sm:$0xff]  ;;  %v2334_v5 = vcombine.low %v693_v51, %v701_v54  ;;  %v2336_v34 = vcombine.low %v694_v56, %v702_v59  ;;  %v632_v51 = vld [vmem:[%s2932_s4 + $0x1b8] sm:$0xff]  ;;  %v2260_v59 = vcombine.low %v616_v45, %v624_v46 }
  0xe2   : > { %2410 = vmatprep.mubr.msk.bf16.mxu0 %vm1725_vm0, %v2926_v1  ;;  %2411 = vmatprep.mubr.msk.bf16.mxu1 %vm1725_vm0, %v2926_v1  ;;  %v2353_v9 = vcombine.high %v710_v4, %v718_v0  ;;  %v640_v54 = vld [vmem:[%s2932_s4 + $0x1f8] sm:$0xff] }
  0xe4   : > { %1948 = vmatpush1.bf16.msra.mxu0 %v2238_v14  ;;  %1989 = vmatpush1.bf16.msra.mxu1 %v2240_v15  ;;  %v726_v14 = vld [vmem:[%s2932_s4 + $0x4a8] sm:$0xff] }
  0xe5   : > { %1949 = vmatprep.subr.bf16.mxu0 %v2255_v16  ;;  %1990 = vmatprep.subr.bf16.mxu1 %v2257_v17  ;;  %v734_v15 = vld [vmem:[%s2932_s4 + $0x4e8] sm:$0xff]  ;;  %v2350_v16 = vcombine.low %v709_v2, %v717_v3  ;;  %v2352_v17 = vcombine.low %v710_v4, %v718_v0  ;;  %v648_v2 = vld [vmem:[%s2932_s4 + $0x238] sm:$0xff] }
  0xe6   : > { %v2369_v19 = vcombine.high %v726_v14, %v734_v15  ;;  %v656_v3 = vld [vmem:[%s2932_s4 + $0x278] sm:$0xff] }
  0xe8   : > { %1950 = vmatpush1.bf16.msra.mxu0 %v2254_v22  ;;  %1991 = vmatpush1.bf16.msra.mxu1 %v2256_v23  ;;  %v742_v22 = vld [vmem:[%s2932_s4 + $0x528] sm:$0xff] }
  0xe9   : > { %1951 = vmatprep.subr.bf16.mxu0 %v2271_v24  ;;  %1992 = vmatprep.subr.bf16.mxu1 %v2273_v25  ;;  %v750_v23 = vld [vmem:[%s2932_s4 + $0x568] sm:$0xff]  ;;  %v2366_v24 = vcombine.low %v725_v10, %v733_v13  ;;  %v2368_v25 = vcombine.low %v726_v14, %v734_v15  ;;  %v672_v10 = vld [vmem:[%s2932_s4 + $0x2f8] sm:$0xff]  ;;  %v2292_v14 = vcombine.low %v648_v2, %v656_v3 }
  0xea   : > { %v2385_v27 = vcombine.high %v742_v22, %v750_v23  ;;  %v2384_v29 = vcombine.low %v742_v22, %v750_v23 }
  0xec   : > { %1952 = vmatpush1.bf16.msra.mxu0 %v2270_v30  ;;  %1993 = vmatpush1.bf16.msra.mxu1 %v2272_v31  ;;  %v583_v30 = vld [vmem:[%s2932_s4 + $0x30] sm:$0xff] }
  0xed   : > { %1953 = vmatprep.subr.bf16.mxu0 %v2287_v32  ;;  %1994 = vmatprep.subr.bf16.mxu1 %v2289_v33  ;;  %v591_v31 = vld [vmem:[%s2932_s4 + $0x70] sm:$0xff]  ;;  %v584_v32 = vld [vmem:[%s2932_s4 + $0x38] sm:$0xff] }
  0xee   : > { %v592_v33 = vld [vmem:[%s2932_s4 + $0x78] sm:$0xff]  ;;  %v2227_v35 = vcombine.high %v583_v30, %v591_v31 }
  0xef   : > { %v2229_v36 = vcombine.high %v584_v32, %v592_v33 }
  0xf0   : > { %1954 = vmatpush1.bf16.msra.mxu0 %v2286_v39  ;;  %1995 = vmatpush1.bf16.msra.mxu1 %v2288_v40  ;;  %v600_v39 = vld [vmem:[%s2932_s4 + $0xb8] sm:$0xff] }
  0xf1   : > { %1955 = vmatprep.subr.bf16.mxu0 %v2303_v41  ;;  %1996 = vmatprep.subr.bf16.mxu1 %v2305_v42  ;;  %v608_v40 = vld [vmem:[%s2932_s4 + $0xf8] sm:$0xff]  ;;  %v2226_v41 = vcombine.low %v583_v30, %v591_v31  ;;  %v2228_v42 = vcombine.low %v584_v32, %v592_v33  ;;  %v711_v33 = vld [vmem:[%s2932_s4 + $0x430] sm:$0xff] }
  0xf2   : > { %v2245_v43 = vcombine.high %v600_v39, %v608_v40 }
  0xf4   : > { %1956 = vmatpush1.bf16.msra.mxu0 %v2302_v47  ;;  %1997 = vmatpush1.bf16.msra.mxu1 %v2304_v48  ;;  %v2261_v48 = vcombine.high %v616_v45, %v624_v46 }
  0xf5   : > { %1957 = vmatprep.subr.bf16.mxu0 %v2319_v49  ;;  %1998 = vmatprep.subr.bf16.mxu1 %v2321_v50  ;;  %v631_v49 = vld [vmem:[%s2932_s4 + $0x1b0] sm:$0xff] }
  0xf6   : > { %v639_v50 = vld [vmem:[%s2932_s4 + $0x1f0] sm:$0xff] }
  0xf7   : > { %v2274_v4 = vcombine.low %v631_v49, %v639_v50 }
  0xf8   : > { %1958 = vmatpush1.bf16.msra.mxu0 %v2318_v60  ;;  %1999 = vmatpush1.bf16.msra.mxu1 %v2320_v61  ;;  %v2275_v60 = vcombine.high %v631_v49, %v639_v50  ;;  %v2277_v61 = vcombine.high %v632_v51, %v640_v54  ;;  %v752_v49 = vld [vmem:[%s2932_s4 + $0x578] sm:$0xff] }
  0xf9   : > { %1959 = vmatprep.subr.bf16.mxu0 %v2335_v62  ;;  %2000 = vmatprep.subr.bf16.mxu1 %v2337_v63  ;;  %v647_v62 = vld [vmem:[%s2932_s4 + $0x230] sm:$0xff] }
  0xfa   : > { %v655_v63 = vld [vmem:[%s2932_s4 + $0x270] sm:$0xff] }
  0xfb   : > { %v2291_v0 = vcombine.high %v647_v62, %v655_v63  ;;  %v2290_v13 = vcombine.low %v647_v62, %v655_v63 }
  0xfc   : > { %1960 = vmatpush1.bf16.msra.mxu0 %v2334_v5  ;;  %2001 = vmatpush1.bf16.msra.mxu1 %v2336_v34  ;;  %v2293_v5 = vcombine.high %v648_v2, %v656_v3  ;;  %v663_v34 = vld [vmem:[%s2932_s4 + $0x2b0] sm:$0xff] }
  0xfd   : > { %1961 = vmatprep.subr.bf16.mxu0 %v2351_v6  ;;  %2002 = vmatprep.subr.bf16.mxu1 %v2353_v9  ;;  %v671_v6 = vld [vmem:[%s2932_s4 + $0x2f0] sm:$0xff]  ;;  %v664_v9 = vld [vmem:[%s2932_s4 + $0x2b8] sm:$0xff] }
  0xfe   : > { %v2307_v15 = vcombine.high %v663_v34, %v671_v6  ;;  %v2306_v21 = vcombine.low %v663_v34, %v671_v6  ;;  %v2308_v22 = vcombine.low %v664_v9, %v672_v10 }
 0x100   : > { %1962 = vmatpush1.bf16.msra.mxu0 %v2350_v16  ;;  %2003 = vmatpush1.bf16.msra.mxu1 %v2352_v17  ;;  %v2309_v16 = vcombine.high %v664_v9, %v672_v10  ;;  %v679_v17 = vld [vmem:[%s2932_s4 + $0x330] sm:$0xff] }
 0x101   : > { %1963 = vmatprep.subr.bf16.mxu0 %v2367_v18  ;;  %2004 = vmatprep.subr.bf16.mxu1 %v2369_v19  ;;  %v687_v18 = vld [vmem:[%s2932_s4 + $0x370] sm:$0xff]  ;;  %v680_v19 = vld [vmem:[%s2932_s4 + $0x338] sm:$0xff] }
 0x102   : > { %v2323_v23 = vcombine.high %v679_v17, %v687_v18  ;;  %v2324_v30 = vcombine.low %v680_v19, %v688_v20 }
 0x104   : > { %1964 = vmatpush1.bf16.msra.mxu0 %v2366_v24  ;;  %2005 = vmatpush1.bf16.msra.mxu1 %v2368_v25  ;;  %v2325_v24 = vcombine.high %v680_v19, %v688_v20  ;;  %v695_v25 = vld [vmem:[%s2932_s4 + $0x3b0] sm:$0xff] }
 0x105   : > { %1965 = vmatprep.subr.bf16.mxu0 %v2383_v26  ;;  %2006 = vmatprep.subr.bf16.mxu1 %v2385_v27  ;;  %v703_v26 = vld [vmem:[%s2932_s4 + $0x3f0] sm:$0xff]  ;;  %v696_v27 = vld [vmem:[%s2932_s4 + $0x3b8] sm:$0xff] }
 0x106   : > { %v2339_v31 = vcombine.high %v695_v25, %v703_v26 }
 0x108   : > { %1966 = vmatpush1.bf16.msra.mxu0 %v2382_v28  ;;  %2007 = vmatpush1.bf16.msra.mxu1 %v2384_v29  ;;  %v704_v28 = vld [vmem:[%s2932_s4 + $0x3f8] sm:$0xff]  ;;  %v2322_v29 = vcombine.low %v679_v17, %v687_v18 }
 0x109   : > { %1967 = vmatprep.subr.bf16.mxu0 %v3010_v7  ;;  %2008 = vmatprep.subr.bf16.mxu1 %v3019_v11  ;;  %v2243_v7 = vcombine.high %v599_v37, %v607_v38  ;;  %v615_v11 = vld [vmem:[%s2932_s4 + $0x130] sm:$0xff]  ;;  %v2341_v32 = vcombine.high %v696_v27, %v704_v28 }
 0x10a   : > { %v2259_v47 = vcombine.high %v615_v11, %v623_v44  ;;  %v2258_v56 = vcombine.low %v615_v11, %v623_v44  ;;  %v736_v11 = vld [vmem:[%s2932_s4 + $0x4f8] sm:$0xff] }
 0x10c   : > { %1968 = vmatpush1.bf16.msra.mxu0 %v3013_v8  ;;  %2009 = vmatpush1.bf16.msra.mxu1 %v3022_v12  ;;  %v2242_v8 = vcombine.low %v599_v37, %v607_v38  ;;  %v2244_v12 = vcombine.low %v600_v39, %v608_v40  ;;  %v720_v37 = vld [vmem:[%s2932_s4 + $0x478] sm:$0xff]  ;;  %v2338_v38 = vcombine.low %v695_v25, %v703_v26 }
 0x10d   : > { %2027 = vmatprep.subr.bf16.mxu0 %v2227_v35  ;;  %2068 = vmatprep.subr.bf16.mxu1 %v2229_v36  ;;  %v719_v35 = vld [vmem:[%s2932_s4 + $0x470] sm:$0xff]  ;;  %v712_v36 = vld [vmem:[%s2932_s4 + $0x438] sm:$0xff]  ;;  %v2340_v39 = vcombine.low %v696_v27, %v704_v28 }
 0x10e   : > { %v2355_v40 = vcombine.high %v711_v33, %v719_v35  ;;  %v2354_v44 = vcombine.low %v711_v33, %v719_v35  ;;  %v2356_v45 = vcombine.low %v712_v36, %v720_v37 }
 0x10f   : > { %1978 = vmatmul.mubr.bf16.vlgmr.msra.gmra.mrb[8].mxu0 %v3001_v55  ;;  %2019 = vmatmul.mubr.bf16.vlgmr.msra.gmra.mrb[8].mxu1 %v3001_v55 }
 0x110   : > { %2028 = vmatpush1.bf16.msra.mxu0 %v2226_v41  ;;  %2069 = vmatpush1.bf16.msra.mxu1 %v2228_v42  ;;  %v2357_v41 = vcombine.high %v712_v36, %v720_v37  ;;  %v727_v42 = vld [vmem:[%s2932_s4 + $0x4b0] sm:$0xff] }
 0x111   : > { %2029 = vmatprep.subr.bf16.mxu0 %v2243_v7  ;;  %2070 = vmatprep.subr.bf16.mxu1 %v2245_v43  ;;  %v735_v7 = vld [vmem:[%s2932_s4 + $0x4f0] sm:$0xff]  ;;  %v728_v43 = vld [vmem:[%s2932_s4 + $0x4b8] sm:$0xff] }
 0x112   : > { %2412 = vmatprep.mubr.msk.bf16.mxu0 %vm1725_vm0, %v2926_v1  ;;  %2413 = vmatprep.mubr.msk.bf16.mxu1 %vm1725_vm0, %v2926_v1  ;;  %v2276_v1 = vcombine.low %v632_v51, %v640_v54  ;;  %v2371_v46 = vcombine.high %v727_v42, %v735_v7  ;;  %v2370_v50 = vcombine.low %v727_v42, %v735_v7 }
 0x113   : > { %v2372_v51 = vcombine.low %v728_v43, %v736_v11 }
 0x114   : > { %2030 = vmatpush1.bf16.msra.mxu0 %v2242_v8  ;;  %2071 = vmatpush1.bf16.msra.mxu1 %v2244_v12  ;;  %v2373_v8 = vcombine.high %v728_v43, %v736_v11  ;;  %v743_v12 = vld [vmem:[%s2932_s4 + $0x530] sm:$0xff] }
 0x115   : > { %2031 = vmatprep.subr.bf16.mxu0 %v2259_v47  ;;  %2072 = vmatprep.subr.bf16.mxu1 %v2261_v48  ;;  %v751_v47 = vld [vmem:[%s2932_s4 + $0x570] sm:$0xff]  ;;  %v744_v48 = vld [vmem:[%s2932_s4 + $0x538] sm:$0xff] }
 0x116   : > { %v2387_v54 = vcombine.high %v743_v12, %v751_v47 }
 0x118   : > { %2032 = vmatpush1.bf16.msra.mxu0 %v2258_v56  ;;  %2073 = vmatpush1.bf16.msra.mxu1 %v2260_v59  ;;  %v2389_v56 = vcombine.high %v744_v48, %v752_v49  ;;  %v2386_v59 = vcombine.low %v743_v12, %v751_v47 }
 0x119   : > { %2033 = vmatprep.subr.bf16.mxu0 %v2275_v60  ;;  %2074 = vmatprep.subr.bf16.mxu1 %v2277_v61  ;;  %v2388_v60 = vcombine.low %v744_v48, %v752_v49  ;;  %v3197_v61 = vpop.permute.xlu0 %772 }
 0x11c   : > { %2034 = vmatpush1.bf16.msra.mxu0 %v2274_v4  ;;  %2075 = vmatpush1.bf16.msra.mxu1 %v2276_v1 }
 0x11d   : > { %2035 = vmatprep.subr.bf16.mxu0 %v2291_v0  ;;  %2076 = vmatprep.subr.bf16.mxu1 %v2293_v5 }
 0x120   : > { %2036 = vmatpush1.bf16.msra.mxu0 %v2290_v13  ;;  %2077 = vmatpush1.bf16.msra.mxu1 %v2292_v14 }
 0x121   : > { %2037 = vmatprep.subr.bf16.mxu0 %v2307_v15  ;;  %2078 = vmatprep.subr.bf16.mxu1 %v2309_v16 }
 0x124   : > { %2038 = vmatpush1.bf16.msra.mxu0 %v2306_v21  ;;  %2079 = vmatpush1.bf16.msra.mxu1 %v2308_v22 }
 0x125   : > { %2039 = vmatprep.subr.bf16.mxu0 %v2323_v23  ;;  %2080 = vmatprep.subr.bf16.mxu1 %v2325_v24 }
 0x128   : > { %2040 = vmatpush1.bf16.msra.mxu0 %v2322_v29  ;;  %2081 = vmatpush1.bf16.msra.mxu1 %v2324_v30 }
 0x129   : > { %2041 = vmatprep.subr.bf16.mxu0 %v2339_v31  ;;  %2082 = vmatprep.subr.bf16.mxu1 %v2341_v32 }
 0x12c   : > { %2042 = vmatpush1.bf16.msra.mxu0 %v2338_v38  ;;  %2083 = vmatpush1.bf16.msra.mxu1 %v2340_v39 }
 0x12d   : > { %2043 = vmatprep.subr.bf16.mxu0 %v2355_v40  ;;  %2084 = vmatprep.subr.bf16.mxu1 %v2357_v41 }
 0x130   : > { %2044 = vmatpush1.bf16.msra.mxu0 %v2354_v44  ;;  %2085 = vmatpush1.bf16.msra.mxu1 %v2356_v45 }
 0x131   : > { %2045 = vmatprep.subr.bf16.mxu0 %v2371_v46  ;;  %2086 = vmatprep.subr.bf16.mxu1 %v2373_v8 }
 0x134   : > { %2046 = vmatpush1.bf16.msra.mxu0 %v2370_v50  ;;  %2087 = vmatpush1.bf16.msra.mxu1 %v2372_v51 }
 0x135   : > { %2047 = vmatprep.subr.bf16.mxu0 %v2387_v54  ;;  %2088 = vmatprep.subr.bf16.mxu1 %v2389_v56 }
 0x138   : > { %2048 = vmatpush1.bf16.msra.mxu0 %v2386_v59  ;;  %2089 = vmatpush1.bf16.msra.mxu1 %v2388_v60 }
 0x139   : > { %2049 = vmatprep.subr.bf16.mxu0 %v3048_v52  ;;  %2090 = vmatprep.subr.bf16.mxu1 %v3056_v57 }
 0x13c   : > { %2050 = vmatpush1.bf16.msra.mxu0 %v3051_v53  ;;  %2091 = vmatpush1.bf16.msra.mxu1 %v3059_v58 }
 0x13f   : > { %2060 = vmatmul.mubr.bf16.vlgmr.msra.gmra.mrb[12].mxu0 %v3001_v55  ;;  %2101 = vmatmul.mubr.bf16.vlgmr.msra.gmra.mrb[12].mxu1 %v3001_v55 }
 0x182   : > { %v1815_v62 = vpop.f32.mrb[0].mxu0  ;;  %v1856_v63 = vpop.f32.mrb[0].mxu1 }
 0x183   : > { %v1816_v52 = vadd.f32 %v1815_v62, %v3197_v61  ;;  %v1817_v57 = vpop.f32.mrb[1].mxu0  ;;  %v1857_v55 = vadd.f32 %v1856_v63, %v3197_v61  ;;  %v1858_v58 = vpop.f32.mrb[1].mxu1 }
 0x184   : > { %v1818_v53 = vadd.f32 %v1817_v57, %v3197_v61  ;;  %v1819_v2 = vpop.f32.mrb[2].mxu0  ;;  %v1859_v4 = vadd.f32 %v1858_v58, %v3197_v61  ;;  %v1860_v1 = vpop.f32.mrb[2].mxu1 }
 0x185   : > { %v2109_v3 = vmax.f32 %v1816_v52, 0.0  ;;  %v1820_v0 = vpop.f32.mrb[3].mxu0  ;;  %v2111_v5 = vmax.f32 %v1857_v55, 0.0  ;;  %v1861_v6 = vpop.f32.mrb[3].mxu1 }
 0x186   : > { %v2110_v34 = vmax.f32 %v1818_v53, 0.0  ;;  %v2112_v9 = vmax.f32 %v1859_v4, 0.0 }
 0x187   : > { %2125 = vst [vmem:[%s3203_s11] sm:$0xff] %v2109_v3  ;;  %2127 = vst [vmem:[%s3203_s11 + $0x10] sm:$0xff] %v2111_v5 }
 0x188   : > { %2126 = vst [vmem:[%s3203_s11 + $0x8] sm:$0xff] %v2110_v34  ;;  %2128 = vst [vmem:[%s3203_s11 + $0x18] sm:$0xff] %v2112_v9 }
 0x1b2   : > { %v1897_v10 = vpop.f32.mrb[4].mxu0  ;;  %v1938_v14 = vpop.f32.mrb[4].mxu1 }
 0x1b3   : > { %v1898_v13 = vadd.f32 %v1897_v10, %v3197_v61  ;;  %v1899_v15 = vpop.f32.mrb[5].mxu0  ;;  %v1939_v16 = vadd.f32 %v1938_v14, %v3197_v61  ;;  %v1940_v18 = vpop.f32.mrb[5].mxu1 }
 0x1b4   : > { %v1900_v17 = vadd.f32 %v1899_v15, %v3197_v61  ;;  %v1901_v19 = vpop.f32.mrb[6].mxu0  ;;  %v1941_v21 = vadd.f32 %v1940_v18, %v3197_v61  ;;  %v1942_v22 = vpop.f32.mrb[6].mxu1 }
 0x1b5   : > { %v2113_v20 = vmax.f32 %v1898_v13, 0.0  ;;  %v1902_v23 = vpop.f32.mrb[7].mxu0  ;;  %v2115_v24 = vmax.f32 %v1939_v16, 0.0  ;;  %v1943_v26 = vpop.f32.mrb[7].mxu1 }
 0x1b6   : > { %v2114_v25 = vmax.f32 %v1900_v17, 0.0  ;;  %v2116_v27 = vmax.f32 %v1941_v21, 0.0 }
 0x1b7   : > { %2129 = vst [vmem:[%s3203_s11 + $0x20] sm:$0xff] %v2113_v20  ;;  %2131 = vst [vmem:[%s3203_s11 + $0x30] sm:$0xff] %v2115_v24 }
 0x1b8   : > { %2130 = vst [vmem:[%s3203_s11 + $0x28] sm:$0xff] %v2114_v25  ;;  %2132 = vst [vmem:[%s3203_s11 + $0x38] sm:$0xff] %v2116_v27 }
 0x1e2   : > { %v1979_v28 = vpop.f32.mrb[8].mxu0  ;;  %v2020_v30 = vpop.f32.mrb[8].mxu1 }
 0x1e3   : > { %v1980_v29 = vadd.f32 %v1979_v28, %v3197_v61  ;;  %v1981_v31 = vpop.f32.mrb[9].mxu0  ;;  %v2021_v32 = vadd.f32 %v2020_v30, %v3197_v61  ;;  %v2022_v35 = vpop.f32.mrb[9].mxu1 }
 0x1e4   : > { %v1982_v33 = vadd.f32 %v1981_v31, %v3197_v61  ;;  %v1983_v36 = vpop.f32.mrb[10].mxu0  ;;  %v2023_v38 = vadd.f32 %v2022_v35, %v3197_v61  ;;  %v2024_v39 = vpop.f32.mrb[10].mxu1 }
 0x1e5   : > { %v2117_v37 = vmax.f32 %v1980_v29, 0.0  ;;  %v1984_v40 = vpop.f32.mrb[11].mxu0  ;;  %v2119_v41 = vmax.f32 %v2021_v32, 0.0  ;;  %v2025_v7 = vpop.f32.mrb[11].mxu1 }
 0x1e6   : > { %v2118_v42 = vmax.f32 %v1982_v33, 0.0  ;;  %v2120_v43 = vmax.f32 %v2023_v38, 0.0 }
 0x1e7   : > { %2133 = vst [vmem:[%s3203_s11 + $0x40] sm:$0xff] %v2117_v37  ;;  %2135 = vst [vmem:[%s3203_s11 + $0x50] sm:$0xff] %v2119_v41 }
 0x1e8   : > { %2134 = vst [vmem:[%s3203_s11 + $0x48] sm:$0xff] %v2118_v42  ;;  %2136 = vst [vmem:[%s3203_s11 + $0x58] sm:$0xff] %v2120_v43 }
 0x212   : > { %v2061_v11 = vpop.f32.mrb[12].mxu0  ;;  %v2102_v45 = vpop.f32.mrb[12].mxu1 }
 0x213   : > { %v2062_v44 = vadd.f32 %v2061_v11, %v3197_v61  ;;  %v2063_v46 = vpop.f32.mrb[13].mxu0  ;;  %v2103_v8 = vadd.f32 %v2102_v45, %v3197_v61  ;;  %v2104_v47 = vpop.f32.mrb[13].mxu1 }
 0x214   : > { %v2064_v12 = vadd.f32 %v2063_v46, %v3197_v61  ;;  %v2065_v48 = vpop.f32.mrb[14].mxu0  ;;  %v2105_v50 = vadd.f32 %v2104_v47, %v3197_v61  ;;  %v2106_v51 = vpop.f32.mrb[14].mxu1 }
 0x215   : > { %v2121_v49 = vmax.f32 %v2062_v44, 0.0  ;;  %v2066_v54 = vpop.f32.mrb[15].mxu0  ;;  %v2123_v56 = vmax.f32 %v2103_v8, 0.0  ;;  %v2107_v60 = vpop.f32.mrb[15].mxu1 }
 0x216   : > { %v2122_v59 = vmax.f32 %v2064_v12, 0.0  ;;  %v2124_v62 = vmax.f32 %v2105_v50, 0.0 }
 0x217   : > { %2137 = vst [vmem:[%s3203_s11 + $0x60] sm:$0xff] %v2121_v49  ;;  %2139 = vst [vmem:[%s3203_s11 + $0x70] sm:$0xff] %v2123_v56 }
 0x218   : > { %2138 = vst [vmem:[%s3203_s11 + $0x68] sm:$0xff] %v2122_v59  ;;  %2140 = vst [vmem:[%s3203_s11 + $0x78] sm:$0xff] %v2124_v62 }
 0x219 PF: > { %p10_p9 = scmp.ge.s32.totalorder %s2511_s16, 8   ;;  %s3250_s12 = smov %s2466_s13 }
 0x21a   : > { %s3251_s13 = smov %s2520_s19  ;;  %s3252_s14 = smov %s2511_s16 }
 0x21b   :  { %12 = sbr.rel (!%p10_p9) target bundleno = 2 (0x2), region = 90 }

// kernel: _ob_path_batched.16
= control target key start
LH: loop header
LB: loop body
LE: loop exit
PB: predicated region body
PF: predicated region fallthrough
CT: control target
= control target key end

     0   :  { %s2594_s15 = smov 0   ;;  %s2596_s16 = smov 0   ;;  %s3367_s0 = inlined_call_operand.vmem [shape: bf16[8,189], index: 0, kind: input, shape index: {}]   ;;  %s3368_s1 = inlined_call_operand.vmem [shape: bf16[189,12288], index: 1, kind: input, shape index: {}]   ;;  %s3369_s2 = inlined_call_operand.vmem [shape: f32[8,1], index: 2, kind: input, shape index: {}]   ;;  %s3370_s3 = inlined_call_operand.vmem [shape: f32[8,12288], index: 3, kind: input, shape index: {}]   ;;  %s3371_s4 = inlined_call_operand.vmem [shape: f32[8,12288], index: 4, kind: output, shape index: {}]  }
   0x1   :  { %s2598_s17 = smov 0  }
   0x2 LB: > { %s2296_s18 = sadd.s32 4294967295, %s2565_s17   ;;  %s2611_s19 = sadd.s32 1, %s2565_s17   ;;  %s2565_s17 = sphi %s2598_s17, %s3374_s17   ;;  %s2561_s16 = sphi %s2596_s16, %s3373_s16   ;;  %s2557_s15 = sphi %s2594_s15, %s3372_s15  }
   0x3   : > { %s39_s20 = ssub.s32 %s2565_s17, %s2611_s19  ;;  %s42_s21 = sadd.s32 1, %s2561_s16 }
   0x4   : > { %p40_p0 = scmp.eq.s32.totalorder %s39_s20, 0  ;;  %p49_p1 = scmp.ne.s32.totalorder %s2561_s16, %s2557_s15 }
   0x5   : > { %p50_p2 = scmp.eq.s32.totalorder %s2565_s17, 0  ;;  %p2299_p4 = scmp.ge.s32.totalorder %s2565_s17, 6 }
   0x6   : > { %s2620_s22 = scalar_select %p40_p0, %s2561_s16, %s42_s21  }
   0x7   : > { %p51_p3 = por %p50_p2, %p49_p1  ;;  %154 = sbr.rel (%p2299_p4) target bundleno = 115 (0x73), region = 24 }
   0xe   : > { %157 = sbr.rel (!%p51_p3) target bundleno = 115 (0x73), region = 28  ;;  %s159_s23 = sand.u32 (%p51_p3), 1, %s2561_s16  }
   0xf   : > { %s2511_s24 = sshll.u32 (%p51_p3), %s2565_s17, 6  ;;  %s2512_s25 = smul.u32 (%p51_p3), 1536, %s159_s23 }
  0x10   : > { %s2628_s28 = scalar_lea.vmem (%p51_p3), %s3368_s1, %s2511_s24 }
  0x11   : > { %v177_v0 = vld [vmem:[%s2628_s28] sm:$0xff] (%p51_p3)  ;;  %v179_v1 = vld [vmem:[%s2628_s28 + $0x8] sm:$0xff] (%p51_p3)  ;;  %v181_v2 = vld [vmem:[%s2628_s28 + $0x10] sm:$0xff] (%p51_p3)  ;;  %s2636_s29 = scalar_lea.vmem (%p51_p3), [#allocation2], %s2512_s25 }
  0x12   : > { %v183_v3 = vld [vmem:[%s2628_s28 + $0x18] sm:$0xff] (%p51_p3)  ;;  %v185_v4 = vld [vmem:[%s2628_s28 + $0x20] sm:$0xff] (%p51_p3)  ;;  %v187_v5 = vld [vmem:[%s2628_s28 + $0x28] sm:$0xff] (%p51_p3)  ;;  %178 = vst [vmem:[%s2636_s29] sm:$0xff] (%p51_p3), %v177_v0 }
  0x13   : > { %180 = vst [vmem:[%s2636_s29 + $0x8] sm:$0xff] (%p51_p3), %v179_v1  ;;  %182 = vst [vmem:[%s2636_s29 + $0x10] sm:$0xff] (%p51_p3), %v181_v2  ;;  %v189_v6 = vld [vmem:[%s2628_s28 + $0x30] sm:$0xff] (%p51_p3)  ;;  %v191_v7 = vld [vmem:[%s2628_s28 + $0x38] sm:$0xff] (%p51_p3) }
  0x14   : > { %184 = vst [vmem:[%s2636_s29 + $0x18] sm:$0xff] (%p51_p3), %v183_v3  ;;  %186 = vst [vmem:[%s2636_s29 + $0x20] sm:$0xff] (%p51_p3), %v185_v4  ;;  %v193_v8 = vld [vmem:[%s2628_s28 + $0x180] sm:$0xff] (%p51_p3)  ;;  %v195_v9 = vld [vmem:[%s2628_s28 + $0x188] sm:$0xff] (%p51_p3) }
  0x15   : > { %188 = vst [vmem:[%s2636_s29 + $0x28] sm:$0xff] %v187_v5  ;;  %190 = vst [vmem:[%s2636_s29 + $0x30] sm:$0xff] %v189_v6  ;;  %v197_v10 = vld [vmem:[%s2628_s28 + $0x190] sm:$0xff]  ;;  %v199_v11 = vld [vmem:[%s2628_s28 + $0x198] sm:$0xff] }
  0x16   : > { %192 = vst [vmem:[%s2636_s29 + $0x38] sm:$0xff] %v191_v7  ;;  %194 = vst [vmem:[%s2636_s29 + $0x40] sm:$0xff] %v193_v8  ;;  %v201_v12 = vld [vmem:[%s2628_s28 + $0x1a0] sm:$0xff]  ;;  %v203_v13 = vld [vmem:[%s2628_s28 + $0x1a8] sm:$0xff] }
  0x17   : > { %196 = vst [vmem:[%s2636_s29 + $0x48] sm:$0xff] %v195_v9  ;;  %198 = vst [vmem:[%s2636_s29 + $0x50] sm:$0xff] %v197_v10  ;;  %v205_v14 = vld [vmem:[%s2628_s28 + $0x1b0] sm:$0xff]  ;;  %v207_v15 = vld [vmem:[%s2628_s28 + $0x1b8] sm:$0xff] }
  0x18   : > { %200 = vst [vmem:[%s2636_s29 + $0x58] sm:$0xff] %v199_v11  ;;  %202 = vst [vmem:[%s2636_s29 + $0x60] sm:$0xff] %v201_v12  ;;  %v209_v16 = vld [vmem:[%s2628_s28 + $0x300] sm:$0xff]  ;;  %v211_v17 = vld [vmem:[%s2628_s28 + $0x308] sm:$0xff] }
  0x19   : > { %204 = vst [vmem:[%s2636_s29 + $0x68] sm:$0xff] %v203_v13  ;;  %206 = vst [vmem:[%s2636_s29 + $0x70] sm:$0xff] %v205_v14  ;;  %v213_v18 = vld [vmem:[%s2628_s28 + $0x310] sm:$0xff]  ;;  %v215_v19 = vld [vmem:[%s2628_s28 + $0x318] sm:$0xff] }
  0x1a   : > { %208 = vst [vmem:[%s2636_s29 + $0x78] sm:$0xff] %v207_v15  ;;  %210 = vst [vmem:[%s2636_s29 + $0x80] sm:$0xff] %v209_v16  ;;  %v217_v20 = vld [vmem:[%s2628_s28 + $0x320] sm:$0xff]  ;;  %v219_v21 = vld [vmem:[%s2628_s28 + $0x328] sm:$0xff] }
  0x1b   : > { %212 = vst [vmem:[%s2636_s29 + $0x88] sm:$0xff] %v211_v17  ;;  %214 = vst [vmem:[%s2636_s29 + $0x90] sm:$0xff] %v213_v18  ;;  %v221_v22 = vld [vmem:[%s2628_s28 + $0x330] sm:$0xff]  ;;  %v223_v23 = vld [vmem:[%s2628_s28 + $0x338] sm:$0xff] }
  0x1c   : > { %216 = vst [vmem:[%s2636_s29 + $0x98] sm:$0xff] %v215_v19  ;;  %218 = vst [vmem:[%s2636_s29 + $0xa0] sm:$0xff] %v217_v20  ;;  %v225_v24 = vld [vmem:[%s2628_s28 + $0x480] sm:$0xff]  ;;  %v227_v25 = vld [vmem:[%s2628_s28 + $0x488] sm:$0xff] }
  0x1d   : > { %220 = vst [vmem:[%s2636_s29 + $0xa8] sm:$0xff] %v219_v21  ;;  %222 = vst [vmem:[%s2636_s29 + $0xb0] sm:$0xff] %v221_v22  ;;  %v229_v26 = vld [vmem:[%s2628_s28 + $0x490] sm:$0xff]  ;;  %v231_v27 = vld [vmem:[%s2628_s28 + $0x498] sm:$0xff] }
  0x1e   : > { %224 = vst [vmem:[%s2636_s29 + $0xb8] sm:$0xff] %v223_v23  ;;  %226 = vst [vmem:[%s2636_s29 + $0xc0] sm:$0xff] %v225_v24  ;;  %v233_v28 = vld [vmem:[%s2628_s28 + $0x4a0] sm:$0xff]  ;;  %v235_v29 = vld [vmem:[%s2628_s28 + $0x4a8] sm:$0xff] }
  0x1f   : > { %228 = vst [vmem:[%s2636_s29 + $0xc8] sm:$0xff] %v227_v25  ;;  %230 = vst [vmem:[%s2636_s29 + $0xd0] sm:$0xff] %v229_v26  ;;  %v237_v30 = vld [vmem:[%s2628_s28 + $0x4b0] sm:$0xff]  ;;  %v239_v31 = vld [vmem:[%s2628_s28 + $0x4b8] sm:$0xff] }
  0x20   : > { %232 = vst [vmem:[%s2636_s29 + $0xd8] sm:$0xff] %v231_v27  ;;  %234 = vst [vmem:[%s2636_s29 + $0xe0] sm:$0xff] %v233_v28  ;;  %v241_v32 = vld [vmem:[%s2628_s28 + $0x600] sm:$0xff]  ;;  %v243_v33 = vld [vmem:[%s2628_s28 + $0x608] sm:$0xff] }
  0x21   : > { %236 = vst [vmem:[%s2636_s29 + $0xe8] sm:$0xff] %v235_v29  ;;  %238 = vst [vmem:[%s2636_s29 + $0xf0] sm:$0xff] %v237_v30  ;;  %v245_v34 = vld [vmem:[%s2628_s28 + $0x610] sm:$0xff]  ;;  %v247_v35 = vld [vmem:[%s2628_s28 + $0x618] sm:$0xff] }
  0x22   : > { %240 = vst [vmem:[%s2636_s29 + $0xf8] sm:$0xff] %v239_v31  ;;  %242 = vst [vmem:[%s2636_s29 + $0x100] sm:$0xff] %v241_v32  ;;  %v249_v36 = vld [vmem:[%s2628_s28 + $0x620] sm:$0xff]  ;;  %v251_v37 = vld [vmem:[%s2628_s28 + $0x628] sm:$0xff] }
  0x23   : > { %244 = vst [vmem:[%s2636_s29 + $0x108] sm:$0xff] %v243_v33  ;;  %246 = vst [vmem:[%s2636_s29 + $0x110] sm:$0xff] %v245_v34  ;;  %v253_v38 = vld [vmem:[%s2628_s28 + $0x630] sm:$0xff]  ;;  %v255_v39 = vld [vmem:[%s2628_s28 + $0x638] sm:$0xff] }
  0x24   : > { %248 = vst [vmem:[%s2636_s29 + $0x118] sm:$0xff] %v247_v35  ;;  %250 = vst [vmem:[%s2636_s29 + $0x120] sm:$0xff] %v249_v36  ;;  %v257_v40 = vld [vmem:[%s2628_s28 + $0x780] sm:$0xff]  ;;  %v259_v41 = vld [vmem:[%s2628_s28 + $0x788] sm:$0xff] }
  0x25   : > { %252 = vst [vmem:[%s2636_s29 + $0x128] sm:$0xff] %v251_v37  ;;  %254 = vst [vmem:[%s2636_s29 + $0x130] sm:$0xff] %v253_v38  ;;  %v261_v42 = vld [vmem:[%s2628_s28 + $0x790] sm:$0xff]  ;;  %v263_v43 = vld [vmem:[%s2628_s28 + $0x798] sm:$0xff] }
  0x26   : > { %256 = vst [vmem:[%s2636_s29 + $0x138] sm:$0xff] %v255_v39  ;;  %258 = vst [vmem:[%s2636_s29 + $0x140] sm:$0xff] %v257_v40  ;;  %v265_v44 = vld [vmem:[%s2628_s28 + $0x7a0] sm:$0xff]  ;;  %v267_v45 = vld [vmem:[%s2628_s28 + $0x7a8] sm:$0xff] }
  0x27   : > { %260 = vst [vmem:[%s2636_s29 + $0x148] sm:$0xff] %v259_v41  ;;  %262 = vst [vmem:[%s2636_s29 + $0x150] sm:$0xff] %v261_v42  ;;  %v269_v46 = vld [vmem:[%s2628_s28 + $0x7b0] sm:$0xff]  ;;  %v271_v47 = vld [vmem:[%s2628_s28 + $0x7b8] sm:$0xff] }
  0x28   : > { %264 = vst [vmem:[%s2636_s29 + $0x158] sm:$0xff] %v263_v43  ;;  %266 = vst [vmem:[%s2636_s29 + $0x160] sm:$0xff] %v265_v44  ;;  %v273_v48 = vld [vmem:[%s2628_s28 + $0x900] sm:$0xff]  ;;  %v275_v49 = vld [vmem:[%s2628_s28 + $0x908] sm:$0xff] }
  0x29   : > { %268 = vst [vmem:[%s2636_s29 + $0x168] sm:$0xff] %v267_v45  ;;  %270 = vst [vmem:[%s2636_s29 + $0x170] sm:$0xff] %v269_v46  ;;  %v277_v50 = vld [vmem:[%s2628_s28 + $0x910] sm:$0xff]  ;;  %v279_v51 = vld [vmem:[%s2628_s28 + $0x918] sm:$0xff] }
  0x2a   : > { %272 = vst [vmem:[%s2636_s29 + $0x178] sm:$0xff] %v271_v47  ;;  %274 = vst [vmem:[%s2636_s29 + $0x180] sm:$0xff] %v273_v48  ;;  %v281_v52 = vld [vmem:[%s2628_s28 + $0x920] sm:$0xff]  ;;  %v283_v53 = vld [vmem:[%s2628_s28 + $0x928] sm:$0xff] }
  0x2b   : > { %276 = vst [vmem:[%s2636_s29 + $0x188] sm:$0xff] %v275_v49  ;;  %278 = vst [vmem:[%s2636_s29 + $0x190] sm:$0xff] %v277_v50  ;;  %v285_v54 = vld [vmem:[%s2628_s28 + $0x930] sm:$0xff]  ;;  %v287_v55 = vld [vmem:[%s2628_s28 + $0x938] sm:$0xff] }
  0x2c   : > { %280 = vst [vmem:[%s2636_s29 + $0x198] sm:$0xff] %v279_v51  ;;  %282 = vst [vmem:[%s2636_s29 + $0x1a0] sm:$0xff] %v281_v52  ;;  %v289_v56 = vld [vmem:[%s2628_s28 + $0xa80] sm:$0xff]  ;;  %v291_v57 = vld [vmem:[%s2628_s28 + $0xa88] sm:$0xff] }
  0x2d   : > { %284 = vst [vmem:[%s2636_s29 + $0x1a8] sm:$0xff] %v283_v53  ;;  %286 = vst [vmem:[%s2636_s29 + $0x1b0] sm:$0xff] %v285_v54  ;;  %v293_v58 = vld [vmem:[%s2628_s28 + $0xa90] sm:$0xff]  ;;  %v295_v59 = vld [vmem:[%s2628_s28 + $0xa98] sm:$0xff] }
  0x2e   : > { %288 = vst [vmem:[%s2636_s29 + $0x1b8] sm:$0xff] %v287_v55  ;;  %290 = vst [vmem:[%s2636_s29 + $0x1c0] sm:$0xff] %v289_v56  ;;  %v297_v60 = vld [vmem:[%s2628_s28 + $0xaa0] sm:$0xff]  ;;  %v299_v61 = vld [vmem:[%s2628_s28 + $0xaa8] sm:$0xff] }
  0x2f   : > { %292 = vst [vmem:[%s2636_s29 + $0x1c8] sm:$0xff] %v291_v57  ;;  %294 = vst [vmem:[%s2636_s29 + $0x1d0] sm:$0xff] %v293_v58  ;;  %v301_v62 = vld [vmem:[%s2628_s28 + $0xab0] sm:$0xff]  ;;  %v303_v63 = vld [vmem:[%s2628_s28 + $0xab8] sm:$0xff] }
  0x30   : > { %296 = vst [vmem:[%s2636_s29 + $0x1d8] sm:$0xff] %v295_v59  ;;  %298 = vst [vmem:[%s2636_s29 + $0x1e0] sm:$0xff] %v297_v60  ;;  %v305_v0 = vld [vmem:[%s2628_s28 + $0xc00] sm:$0xff]  ;;  %v307_v1 = vld [vmem:[%s2628_s28 + $0xc08] sm:$0xff] }
  0x31   : > { %300 = vst [vmem:[%s2636_s29 + $0x1e8] sm:$0xff] %v299_v61  ;;  %302 = vst [vmem:[%s2636_s29 + $0x1f0] sm:$0xff] %v301_v62  ;;  %v309_v2 = vld [vmem:[%s2628_s28 + $0xc10] sm:$0xff]  ;;  %v311_v3 = vld [vmem:[%s2628_s28 + $0xc18] sm:$0xff] }
  0x32   : > { %304 = vst [vmem:[%s2636_s29 + $0x1f8] sm:$0xff] %v303_v63  ;;  %306 = vst [vmem:[%s2636_s29 + $0x200] sm:$0xff] %v305_v0  ;;  %v313_v4 = vld [vmem:[%s2628_s28 + $0xc20] sm:$0xff]  ;;  %v315_v5 = vld [vmem:[%s2628_s28 + $0xc28] sm:$0xff] }
  0x33   : > { %308 = vst [vmem:[%s2636_s29 + $0x208] sm:$0xff] %v307_v1  ;;  %310 = vst [vmem:[%s2636_s29 + $0x210] sm:$0xff] %v309_v2  ;;  %v317_v6 = vld [vmem:[%s2628_s28 + $0xc30] sm:$0xff]  ;;  %v319_v7 = vld [vmem:[%s2628_s28 + $0xc38] sm:$0xff] }
  0x34   : > { %312 = vst [vmem:[%s2636_s29 + $0x218] sm:$0xff] %v311_v3  ;;  %314 = vst [vmem:[%s2636_s29 + $0x220] sm:$0xff] %v313_v4  ;;  %v321_v8 = vld [vmem:[%s2628_s28 + $0xd80] sm:$0xff]  ;;  %v323_v9 = vld [vmem:[%s2628_s28 + $0xd88] sm:$0xff] }
  0x35   : > { %316 = vst [vmem:[%s2636_s29 + $0x228] sm:$0xff] %v315_v5  ;;  %318 = vst [vmem:[%s2636_s29 + $0x230] sm:$0xff] %v317_v6  ;;  %v325_v10 = vld [vmem:[%s2628_s28 + $0xd90] sm:$0xff]  ;;  %v327_v11 = vld [vmem:[%s2628_s28 + $0xd98] sm:$0xff] }
  0x36   : > { %320 = vst [vmem:[%s2636_s29 + $0x238] sm:$0xff] %v319_v7  ;;  %322 = vst [vmem:[%s2636_s29 + $0x240] sm:$0xff] %v321_v8  ;;  %v329_v12 = vld [vmem:[%s2628_s28 + $0xda0] sm:$0xff]  ;;  %v331_v13 = vld [vmem:[%s2628_s28 + $0xda8] sm:$0xff] }
  0x37   : > { %324 = vst [vmem:[%s2636_s29 + $0x248] sm:$0xff] %v323_v9  ;;  %326 = vst [vmem:[%s2636_s29 + $0x250] sm:$0xff] %v325_v10  ;;  %v333_v14 = vld [vmem:[%s2628_s28 + $0xdb0] sm:$0xff]  ;;  %v335_v15 = vld [vmem:[%s2628_s28 + $0xdb8] sm:$0xff] }
  0x38   : > { %328 = vst [vmem:[%s2636_s29 + $0x258] sm:$0xff] %v327_v11  ;;  %330 = vst [vmem:[%s2636_s29 + $0x260] sm:$0xff] %v329_v12  ;;  %v337_v16 = vld [vmem:[%s2628_s28 + $0xf00] sm:$0xff]  ;;  %v339_v17 = vld [vmem:[%s2628_s28 + $0xf08] sm:$0xff] }
  0x39   : > { %332 = vst [vmem:[%s2636_s29 + $0x268] sm:$0xff] %v331_v13  ;;  %334 = vst [vmem:[%s2636_s29 + $0x270] sm:$0xff] %v333_v14  ;;  %v341_v18 = vld [vmem:[%s2628_s28 + $0xf10] sm:$0xff]  ;;  %v343_v19 = vld [vmem:[%s2628_s28 + $0xf18] sm:$0xff] }
  0x3a   : > { %336 = vst [vmem:[%s2636_s29 + $0x278] sm:$0xff] %v335_v15  ;;  %338 = vst [vmem:[%s2636_s29 + $0x280] sm:$0xff] %v337_v16  ;;  %v345_v20 = vld [vmem:[%s2628_s28 + $0xf20] sm:$0xff]  ;;  %v347_v21 = vld [vmem:[%s2628_s28 + $0xf28] sm:$0xff] }
  0x3b   : > { %340 = vst [vmem:[%s2636_s29 + $0x288] sm:$0xff] %v339_v17  ;;  %342 = vst [vmem:[%s2636_s29 + $0x290] sm:$0xff] %v341_v18  ;;  %v349_v22 = vld [vmem:[%s2628_s28 + $0xf30] sm:$0xff]  ;;  %v351_v23 = vld [vmem:[%s2628_s28 + $0xf38] sm:$0xff] }
  0x3c   : > { %344 = vst [vmem:[%s2636_s29 + $0x298] sm:$0xff] %v343_v19  ;;  %346 = vst [vmem:[%s2636_s29 + $0x2a0] sm:$0xff] %v345_v20  ;;  %v353_v24 = vld [vmem:[%s2628_s28 + $0x1080] sm:$0xff]  ;;  %v355_v25 = vld [vmem:[%s2628_s28 + $0x1088] sm:$0xff] }
  0x3d   : > { %348 = vst [vmem:[%s2636_s29 + $0x2a8] sm:$0xff] %v347_v21  ;;  %350 = vst [vmem:[%s2636_s29 + $0x2b0] sm:$0xff] %v349_v22  ;;  %v357_v26 = vld [vmem:[%s2628_s28 + $0x1090] sm:$0xff]  ;;  %v359_v27 = vld [vmem:[%s2628_s28 + $0x1098] sm:$0xff] }
  0x3e   : > { %352 = vst [vmem:[%s2636_s29 + $0x2b8] sm:$0xff] %v351_v23  ;;  %354 = vst [vmem:[%s2636_s29 + $0x2c0] sm:$0xff] %v353_v24  ;;  %v361_v28 = vld [vmem:[%s2628_s28 + $0x10a0] sm:$0xff]  ;;  %v363_v29 = vld [vmem:[%s2628_s28 + $0x10a8] sm:$0xff] }
  0x3f   : > { %356 = vst [vmem:[%s2636_s29 + $0x2c8] sm:$0xff] %v355_v25  ;;  %358 = vst [vmem:[%s2636_s29 + $0x2d0] sm:$0xff] %v357_v26  ;;  %v365_v30 = vld [vmem:[%s2628_s28 + $0x10b0] sm:$0xff]  ;;  %v367_v31 = vld [vmem:[%s2628_s28 + $0x10b8] sm:$0xff] }
  0x40   : > { %360 = vst [vmem:[%s2636_s29 + $0x2d8] sm:$0xff] %v359_v27  ;;  %362 = vst [vmem:[%s2636_s29 + $0x2e0] sm:$0xff] %v361_v28  ;;  %v369_v32 = vld [vmem:[%s2628_s28 + $0x1200] sm:$0xff]  ;;  %v371_v33 = vld [vmem:[%s2628_s28 + $0x1208] sm:$0xff] }
  0x41   : > { %364 = vst [vmem:[%s2636_s29 + $0x2e8] sm:$0xff] %v363_v29  ;;  %366 = vst [vmem:[%s2636_s29 + $0x2f0] sm:$0xff] %v365_v30  ;;  %v373_v34 = vld [vmem:[%s2628_s28 + $0x1210] sm:$0xff]  ;;  %v375_v35 = vld [vmem:[%s2628_s28 + $0x1218] sm:$0xff] }
  0x42   : > { %368 = vst [vmem:[%s2636_s29 + $0x2f8] sm:$0xff] %v367_v31  ;;  %370 = vst [vmem:[%s2636_s29 + $0x300] sm:$0xff] %v369_v32  ;;  %v377_v36 = vld [vmem:[%s2628_s28 + $0x1220] sm:$0xff]  ;;  %v379_v37 = vld [vmem:[%s2628_s28 + $0x1228] sm:$0xff] }
  0x43   : > { %372 = vst [vmem:[%s2636_s29 + $0x308] sm:$0xff] %v371_v33  ;;  %374 = vst [vmem:[%s2636_s29 + $0x310] sm:$0xff] %v373_v34  ;;  %v381_v38 = vld [vmem:[%s2628_s28 + $0x1230] sm:$0xff]  ;;  %v383_v39 = vld [vmem:[%s2628_s28 + $0x1238] sm:$0xff] }
  0x44   : > { %376 = vst [vmem:[%s2636_s29 + $0x318] sm:$0xff] %v375_v35  ;;  %378 = vst [vmem:[%s2636_s29 + $0x320] sm:$0xff] %v377_v36  ;;  %v385_v40 = vld [vmem:[%s2628_s28 + $0x1380] sm:$0xff]  ;;  %v387_v41 = vld [vmem:[%s2628_s28 + $0x1388] sm:$0xff] }
  0x45   : > { %380 = vst [vmem:[%s2636_s29 + $0x328] sm:$0xff] %v379_v37  ;;  %382 = vst [vmem:[%s2636_s29 + $0x330] sm:$0xff] %v381_v38  ;;  %v389_v42 = vld [vmem:[%s2628_s28 + $0x1390] sm:$0xff]  ;;  %v391_v43 = vld [vmem:[%s2628_s28 + $0x1398] sm:$0xff] }
  0x46   : > { %384 = vst [vmem:[%s2636_s29 + $0x338] sm:$0xff] %v383_v39  ;;  %386 = vst [vmem:[%s2636_s29 + $0x340] sm:$0xff] %v385_v40  ;;  %v393_v44 = vld [vmem:[%s2628_s28 + $0x13a0] sm:$0xff]  ;;  %v395_v45 = vld [vmem:[%s2628_s28 + $0x13a8] sm:$0xff] }
  0x47   : > { %388 = vst [vmem:[%s2636_s29 + $0x348] sm:$0xff] %v387_v41  ;;  %390 = vst [vmem:[%s2636_s29 + $0x350] sm:$0xff] %v389_v42  ;;  %v397_v46 = vld [vmem:[%s2628_s28 + $0x13b0] sm:$0xff]  ;;  %v399_v47 = vld [vmem:[%s2628_s28 + $0x13b8] sm:$0xff] }
  0x48   : > { %392 = vst [vmem:[%s2636_s29 + $0x358] sm:$0xff] %v391_v43  ;;  %394 = vst [vmem:[%s2636_s29 + $0x360] sm:$0xff] %v393_v44  ;;  %v401_v48 = vld [vmem:[%s2628_s28 + $0x1500] sm:$0xff]  ;;  %v403_v49 = vld [vmem:[%s2628_s28 + $0x1508] sm:$0xff] }
  0x49   : > { %396 = vst [vmem:[%s2636_s29 + $0x368] sm:$0xff] %v395_v45  ;;  %398 = vst [vmem:[%s2636_s29 + $0x370] sm:$0xff] %v397_v46  ;;  %v405_v50 = vld [vmem:[%s2628_s28 + $0x1510] sm:$0xff]  ;;  %v407_v51 = vld [vmem:[%s2628_s28 + $0x1518] sm:$0xff] }
  0x4a   : > { %400 = vst [vmem:[%s2636_s29 + $0x378] sm:$0xff] %v399_v47  ;;  %402 = vst [vmem:[%s2636_s29 + $0x380] sm:$0xff] %v401_v48  ;;  %v409_v52 = vld [vmem:[%s2628_s28 + $0x1520] sm:$0xff]  ;;  %v411_v53 = vld [vmem:[%s2628_s28 + $0x1528] sm:$0xff] }
  0x4b   : > { %404 = vst [vmem:[%s2636_s29 + $0x388] sm:$0xff] %v403_v49  ;;  %406 = vst [vmem:[%s2636_s29 + $0x390] sm:$0xff] %v405_v50  ;;  %v413_v54 = vld [vmem:[%s2628_s28 + $0x1530] sm:$0xff]  ;;  %v415_v55 = vld [vmem:[%s2628_s28 + $0x1538] sm:$0xff] }
  0x4c   : > { %408 = vst [vmem:[%s2636_s29 + $0x398] sm:$0xff] %v407_v51  ;;  %410 = vst [vmem:[%s2636_s29 + $0x3a0] sm:$0xff] %v409_v52  ;;  %v417_v56 = vld [vmem:[%s2628_s28 + $0x1680] sm:$0xff]  ;;  %v419_v57 = vld [vmem:[%s2628_s28 + $0x1688] sm:$0xff] }
  0x4d   : > { %412 = vst [vmem:[%s2636_s29 + $0x3a8] sm:$0xff] %v411_v53  ;;  %414 = vst [vmem:[%s2636_s29 + $0x3b0] sm:$0xff] %v413_v54  ;;  %v421_v58 = vld [vmem:[%s2628_s28 + $0x1690] sm:$0xff]  ;;  %v423_v59 = vld [vmem:[%s2628_s28 + $0x1698] sm:$0xff] }
  0x4e   : > { %416 = vst [vmem:[%s2636_s29 + $0x3b8] sm:$0xff] %v415_v55  ;;  %418 = vst [vmem:[%s2636_s29 + $0x3c0] sm:$0xff] %v417_v56  ;;  %v425_v60 = vld [vmem:[%s2628_s28 + $0x16a0] sm:$0xff]  ;;  %v427_v61 = vld [vmem:[%s2628_s28 + $0x16a8] sm:$0xff] }
  0x4f   : > { %420 = vst [vmem:[%s2636_s29 + $0x3c8] sm:$0xff] %v419_v57  ;;  %422 = vst [vmem:[%s2636_s29 + $0x3d0] sm:$0xff] %v421_v58  ;;  %v429_v62 = vld [vmem:[%s2628_s28 + $0x16b0] sm:$0xff]  ;;  %v431_v63 = vld [vmem:[%s2628_s28 + $0x16b8] sm:$0xff] }
  0x50   : > { %424 = vst [vmem:[%s2636_s29 + $0x3d8] sm:$0xff] %v423_v59  ;;  %426 = vst [vmem:[%s2636_s29 + $0x3e0] sm:$0xff] %v425_v60  ;;  %v433_v0 = vld [vmem:[%s2628_s28 + $0x1800] sm:$0xff]  ;;  %v435_v1 = vld [vmem:[%s2628_s28 + $0x1808] sm:$0xff] }
  0x51   : > { %428 = vst [vmem:[%s2636_s29 + $0x3e8] sm:$0xff] %v427_v61  ;;  %430 = vst [vmem:[%s2636_s29 + $0x3f0] sm:$0xff] %v429_v62  ;;  %v437_v2 = vld [vmem:[%s2628_s28 + $0x1810] sm:$0xff]  ;;  %v439_v3 = vld [vmem:[%s2628_s28 + $0x1818] sm:$0xff] }
  0x52   : > { %432 = vst [vmem:[%s2636_s29 + $0x3f8] sm:$0xff] %v431_v63  ;;  %434 = vst [vmem:[%s2636_s29 + $0x400] sm:$0xff] %v433_v0  ;;  %v441_v4 = vld [vmem:[%s2628_s28 + $0x1820] sm:$0xff]  ;;  %v443_v5 = vld [vmem:[%s2628_s28 + $0x1828] sm:$0xff] }
  0x53   : > { %436 = vst [vmem:[%s2636_s29 + $0x408] sm:$0xff] %v435_v1  ;;  %438 = vst [vmem:[%s2636_s29 + $0x410] sm:$0xff] %v437_v2  ;;  %v445_v6 = vld [vmem:[%s2628_s28 + $0x1830] sm:$0xff]  ;;  %v447_v7 = vld [vmem:[%s2628_s28 + $0x1838] sm:$0xff] }
  0x54   : > { %440 = vst [vmem:[%s2636_s29 + $0x418] sm:$0xff] %v439_v3  ;;  %442 = vst [vmem:[%s2636_s29 + $0x420] sm:$0xff] %v441_v4  ;;  %v449_v8 = vld [vmem:[%s2628_s28 + $0x1980] sm:$0xff]  ;;  %v451_v9 = vld [vmem:[%s2628_s28 + $0x1988] sm:$0xff] }
  0x55   : > { %444 = vst [vmem:[%s2636_s29 + $0x428] sm:$0xff] %v443_v5  ;;  %446 = vst [vmem:[%s2636_s29 + $0x430] sm:$0xff] %v445_v6  ;;  %v453_v10 = vld [vmem:[%s2628_s28 + $0x1990] sm:$0xff]  ;;  %v455_v11 = vld [vmem:[%s2628_s28 + $0x1998] sm:$0xff] }
  0x56   : > { %448 = vst [vmem:[%s2636_s29 + $0x438] sm:$0xff] %v447_v7  ;;  %450 = vst [vmem:[%s2636_s29 + $0x440] sm:$0xff] %v449_v8  ;;  %v457_v12 = vld [vmem:[%s2628_s28 + $0x19a0] sm:$0xff]  ;;  %v459_v13 = vld [vmem:[%s2628_s28 + $0x19a8] sm:$0xff] }
  0x57   : > { %452 = vst [vmem:[%s2636_s29 + $0x448] sm:$0xff] %v451_v9  ;;  %454 = vst [vmem:[%s2636_s29 + $0x450] sm:$0xff] %v453_v10  ;;  %v461_v14 = vld [vmem:[%s2628_s28 + $0x19b0] sm:$0xff]  ;;  %v463_v15 = vld [vmem:[%s2628_s28 + $0x19b8] sm:$0xff] }
  0x58   : > { %456 = vst [vmem:[%s2636_s29 + $0x458] sm:$0xff] %v455_v11  ;;  %458 = vst [vmem:[%s2636_s29 + $0x460] sm:$0xff] %v457_v12  ;;  %v465_v16 = vld [vmem:[%s2628_s28 + $0x1b00] sm:$0xff]  ;;  %v467_v17 = vld [vmem:[%s2628_s28 + $0x1b08] sm:$0xff] }
  0x59   : > { %460 = vst [vmem:[%s2636_s29 + $0x468] sm:$0xff] %v459_v13  ;;  %462 = vst [vmem:[%s2636_s29 + $0x470] sm:$0xff] %v461_v14  ;;  %v469_v18 = vld [vmem:[%s2628_s28 + $0x1b10] sm:$0xff]  ;;  %v471_v19 = vld [vmem:[%s2628_s28 + $0x1b18] sm:$0xff] }
  0x5a   : > { %464 = vst [vmem:[%s2636_s29 + $0x478] sm:$0xff] %v463_v15  ;;  %466 = vst [vmem:[%s2636_s29 + $0x480] sm:$0xff] %v465_v16  ;;  %v473_v20 = vld [vmem:[%s2628_s28 + $0x1b20] sm:$0xff]  ;;  %v475_v21 = vld [vmem:[%s2628_s28 + $0x1b28] sm:$0xff] }
  0x5b   : > { %468 = vst [vmem:[%s2636_s29 + $0x488] sm:$0xff] %v467_v17  ;;  %470 = vst [vmem:[%s2636_s29 + $0x490] sm:$0xff] %v469_v18  ;;  %v477_v22 = vld [vmem:[%s2628_s28 + $0x1b30] sm:$0xff]  ;;  %v479_v23 = vld [vmem:[%s2628_s28 + $0x1b38] sm:$0xff] }
  0x5c   : > { %472 = vst [vmem:[%s2636_s29 + $0x498] sm:$0xff] %v471_v19  ;;  %474 = vst [vmem:[%s2636_s29 + $0x4a0] sm:$0xff] %v473_v20  ;;  %v481_v24 = vld [vmem:[%s2628_s28 + $0x1c80] sm:$0xff]  ;;  %v483_v25 = vld [vmem:[%s2628_s28 + $0x1c88] sm:$0xff] }
  0x5d   : > { %476 = vst [vmem:[%s2636_s29 + $0x4a8] sm:$0xff] %v475_v21  ;;  %478 = vst [vmem:[%s2636_s29 + $0x4b0] sm:$0xff] %v477_v22  ;;  %v485_v26 = vld [vmem:[%s2628_s28 + $0x1c90] sm:$0xff]  ;;  %v487_v27 = vld [vmem:[%s2628_s28 + $0x1c98] sm:$0xff] }
  0x5e   : > { %480 = vst [vmem:[%s2636_s29 + $0x4b8] sm:$0xff] %v479_v23  ;;  %482 = vst [vmem:[%s2636_s29 + $0x4c0] sm:$0xff] %v481_v24  ;;  %v489_v28 = vld [vmem:[%s2628_s28 + $0x1ca0] sm:$0xff]  ;;  %v491_v29 = vld [vmem:[%s2628_s28 + $0x1ca8] sm:$0xff] }
  0x5f   : > { %484 = vst [vmem:[%s2636_s29 + $0x4c8] sm:$0xff] %v483_v25  ;;  %486 = vst [vmem:[%s2636_s29 + $0x4d0] sm:$0xff] %v485_v26  ;;  %v493_v30 = vld [vmem:[%s2628_s28 + $0x1cb0] sm:$0xff]  ;;  %v495_v31 = vld [vmem:[%s2628_s28 + $0x1cb8] sm:$0xff] }
  0x60   : > { %488 = vst [vmem:[%s2636_s29 + $0x4d8] sm:$0xff] %v487_v27  ;;  %490 = vst [vmem:[%s2636_s29 + $0x4e0] sm:$0xff] %v489_v28  ;;  %v497_v32 = vld [vmem:[%s2628_s28 + $0x1e00] sm:$0xff]  ;;  %v499_v33 = vld [vmem:[%s2628_s28 + $0x1e08] sm:$0xff] }
  0x61   : > { %492 = vst [vmem:[%s2636_s29 + $0x4e8] sm:$0xff] %v491_v29  ;;  %494 = vst [vmem:[%s2636_s29 + $0x4f0] sm:$0xff] %v493_v30  ;;  %v501_v34 = vld [vmem:[%s2628_s28 + $0x1e10] sm:$0xff]  ;;  %v503_v35 = vld [vmem:[%s2628_s28 + $0x1e18] sm:$0xff] }
  0x62   : > { %496 = vst [vmem:[%s2636_s29 + $0x4f8] sm:$0xff] %v495_v31  ;;  %498 = vst [vmem:[%s2636_s29 + $0x500] sm:$0xff] %v497_v32  ;;  %v505_v36 = vld [vmem:[%s2628_s28 + $0x1e20] sm:$0xff]  ;;  %v507_v37 = vld [vmem:[%s2628_s28 + $0x1e28] sm:$0xff] }
  0x63   : > { %500 = vst [vmem:[%s2636_s29 + $0x508] sm:$0xff] %v499_v33  ;;  %502 = vst [vmem:[%s2636_s29 + $0x510] sm:$0xff] %v501_v34  ;;  %v509_v38 = vld [vmem:[%s2628_s28 + $0x1e30] sm:$0xff]  ;;  %v511_v39 = vld [vmem:[%s2628_s28 + $0x1e38] sm:$0xff] }
  0x64   : > { %504 = vst [vmem:[%s2636_s29 + $0x518] sm:$0xff] %v503_v35  ;;  %506 = vst [vmem:[%s2636_s29 + $0x520] sm:$0xff] %v505_v36  ;;  %v513_v40 = vld [vmem:[%s2628_s28 + $0x1f80] sm:$0xff]  ;;  %v515_v41 = vld [vmem:[%s2628_s28 + $0x1f88] sm:$0xff] }
  0x65   : > { %508 = vst [vmem:[%s2636_s29 + $0x528] sm:$0xff] %v507_v37  ;;  %510 = vst [vmem:[%s2636_s29 + $0x530] sm:$0xff] %v509_v38  ;;  %v517_v42 = vld [vmem:[%s2628_s28 + $0x1f90] sm:$0xff]  ;;  %v519_v43 = vld [vmem:[%s2628_s28 + $0x1f98] sm:$0xff] }
  0x66   : > { %512 = vst [vmem:[%s2636_s29 + $0x538] sm:$0xff] %v511_v39  ;;  %514 = vst [vmem:[%s2636_s29 + $0x540] sm:$0xff] %v513_v40  ;;  %v521_v44 = vld [vmem:[%s2628_s28 + $0x1fa0] sm:$0xff]  ;;  %v523_v45 = vld [vmem:[%s2628_s28 + $0x1fa8] sm:$0xff] }
  0x67   : > { %516 = vst [vmem:[%s2636_s29 + $0x548] sm:$0xff] %v515_v41  ;;  %518 = vst [vmem:[%s2636_s29 + $0x550] sm:$0xff] %v517_v42  ;;  %v525_v46 = vld [vmem:[%s2628_s28 + $0x1fb0] sm:$0xff]  ;;  %v527_v47 = vld [vmem:[%s2628_s28 + $0x1fb8] sm:$0xff] }
  0x68   : > { %520 = vst [vmem:[%s2636_s29 + $0x558] sm:$0xff] %v519_v43  ;;  %522 = vst [vmem:[%s2636_s29 + $0x560] sm:$0xff] %v521_v44  ;;  %v529_v48 = vld [vmem:[%s2628_s28 + $0x2100] sm:$0xff]  ;;  %v531_v49 = vld [vmem:[%s2628_s28 + $0x2108] sm:$0xff] }
  0x69   : > { %524 = vst [vmem:[%s2636_s29 + $0x568] sm:$0xff] %v523_v45  ;;  %526 = vst [vmem:[%s2636_s29 + $0x570] sm:$0xff] %v525_v46  ;;  %v533_v50 = vld [vmem:[%s2628_s28 + $0x2110] sm:$0xff]  ;;  %v535_v51 = vld [vmem:[%s2628_s28 + $0x2118] sm:$0xff] }
  0x6a   : > { %528 = vst [vmem:[%s2636_s29 + $0x578] sm:$0xff] %v527_v47  ;;  %530 = vst [vmem:[%s2636_s29 + $0x580] sm:$0xff] %v529_v48  ;;  %v537_v52 = vld [vmem:[%s2628_s28 + $0x2120] sm:$0xff]  ;;  %v539_v53 = vld [vmem:[%s2628_s28 + $0x2128] sm:$0xff] }
  0x6b   : > { %532 = vst [vmem:[%s2636_s29 + $0x588] sm:$0xff] %v531_v49  ;;  %534 = vst [vmem:[%s2636_s29 + $0x590] sm:$0xff] %v533_v50  ;;  %v541_v54 = vld [vmem:[%s2628_s28 + $0x2130] sm:$0xff]  ;;  %v543_v55 = vld [vmem:[%s2628_s28 + $0x2138] sm:$0xff] }
  0x6c   : > { %536 = vst [vmem:[%s2636_s29 + $0x598] sm:$0xff] %v535_v51  ;;  %538 = vst [vmem:[%s2636_s29 + $0x5a0] sm:$0xff] %v537_v52  ;;  %v545_v56 = vld [vmem:[%s2628_s28 + $0x2280] sm:$0xff]  ;;  %v547_v57 = vld [vmem:[%s2628_s28 + $0x2288] sm:$0xff] }
  0x6d   : > { %540 = vst [vmem:[%s2636_s29 + $0x5a8] sm:$0xff] %v539_v53  ;;  %542 = vst [vmem:[%s2636_s29 + $0x5b0] sm:$0xff] %v541_v54  ;;  %v549_v58 = vld [vmem:[%s2628_s28 + $0x2290] sm:$0xff]  ;;  %v551_v59 = vld [vmem:[%s2628_s28 + $0x2298] sm:$0xff] }
  0x6e   : > { %544 = vst [vmem:[%s2636_s29 + $0x5b8] sm:$0xff] %v543_v55  ;;  %546 = vst [vmem:[%s2636_s29 + $0x5c0] sm:$0xff] %v545_v56  ;;  %v553_v60 = vld [vmem:[%s2628_s28 + $0x22a0] sm:$0xff]  ;;  %v555_v61 = vld [vmem:[%s2628_s28 + $0x22a8] sm:$0xff] }
  0x6f   : > { %548 = vst [vmem:[%s2636_s29 + $0x5c8] sm:$0xff] %v547_v57  ;;  %550 = vst [vmem:[%s2636_s29 + $0x5d0] sm:$0xff] %v549_v58  ;;  %v557_v62 = vld [vmem:[%s2628_s28 + $0x22b0] sm:$0xff]  ;;  %v559_v63 = vld [vmem:[%s2628_s28 + $0x22b8] sm:$0xff] }
  0x70   : > { %552 = vst [vmem:[%s2636_s29 + $0x5d8] sm:$0xff] %v551_v59  ;;  %554 = vst [vmem:[%s2636_s29 + $0x5e0] sm:$0xff] %v553_v60 }
  0x71   : > { %556 = vst [vmem:[%s2636_s29 + $0x5e8] sm:$0xff] %v555_v61  ;;  %558 = vst [vmem:[%s2636_s29 + $0x5f0] sm:$0xff] %v557_v62 }
  0x72   : > { %560 = vst [vmem:[%s2636_s29 + $0x5f8] sm:$0xff] %v559_v63 }
  0x73 PF: > { %p2302_p5 = scmp.ge.s32.totalorder %s2565_s17, 1  ;;  %p574_p6 = scmp.lt.s32.totalorder %s2565_s17, 7 }
  0x75   : > { %p575_p7 = pnand %p2302_p5, %p574_p6 }
  0x76   : > { %s581_s30 = sand.u32 (!%p575_p7), 1, %s2557_s15   ;;  %v3022_v0 = vld [vmem:[%s3367_s0] sm:$0xff] (!%p575_p7)  ;;  %vm1774_vm0 = vcmask (!%p575_p7), 498688   ;;  %v2567_v28 = vmov (!%p575_p7), 0   ;;  %vm1778_vm1 = vcmask (!%p575_p7), 1045504   ;;  %vm1779_vm2 = vcmask (!%p575_p7), 1046528  }
  0x77   : > { %578 = sbr.rel (%p575_p7) target bundleno = 539 (0x21b), region = 55  ;;  %v3026_v1 = vcombine.high (!%p575_p7), %v3022_v0, %v3022_v0  ;;  %2540 = vset.pattern.permute.xlu0 (!%p575_p7), %v2567_v28  ;;  %s2303_s11 = sshll.u32 (!%p575_p7), %s2296_s18, 4 }
  0x78   : > { %s2513_s7 = smul.u32 (!%p575_p7), 1536, %s581_s30  ;;  %p613_p8 = scmp.lt.s32.totalorder (!%p575_p7), %s2303_s11, 95 }
  0x79   : > { %2501 = vmatprep.mubr.msk.bf16.mxu0 (!%p575_p7), %vm1774_vm0, %v3026_v1  ;;  %2502 = vmatprep.mubr.msk.bf16.mxu1 (!%p575_p7), %vm1774_vm0, %v3026_v1 }
  0x7a   : > { %s3032_s8 = scalar_lea.vmem (!%p575_p7), [#allocation2], %s2513_s7 }
  0x7b   : > { %v626_v2 = vld [vmem:[%s3032_s8] sm:$0xff] (!%p575_p7)  ;;  %v627_v4 = vld [vmem:[%s3032_s8 + $0x8] sm:$0xff] (!%p575_p7) }
  0x7c   : > { %v634_v3 = vld [vmem:[%s3032_s8 + $0x40] sm:$0xff] (!%p575_p7)  ;;  %v635_v6 = vld [vmem:[%s3032_s8 + $0x48] sm:$0xff] (!%p575_p7) }
  0x7d   : > { %v2310_v5 = vcombine.high (!%p575_p7), %v626_v2, %v634_v3  ;;  %v2309_v7 = vcombine.low (!%p575_p7), %v626_v2, %v634_v3  ;;  %v642_v8 = vld [vmem:[%s3032_s8 + $0x80] sm:$0xff] (!%p575_p7)  ;;  %v2312_v10 = vcombine.high (!%p575_p7), %v627_v4, %v635_v6  ;;  %v2311_v11 = vcombine.low (!%p575_p7), %v627_v4, %v635_v6  ;;  %v643_v13 = vld [vmem:[%s3032_s8 + $0x88] sm:$0xff] (!%p575_p7) }
  0x7e   : > { %v650_v9 = vld [vmem:[%s3032_s8 + $0xc0] sm:$0xff]  ;;  %v651_v14 = vld [vmem:[%s3032_s8 + $0xc8] sm:$0xff]  ;;  %s3376_s11 = smov (!%p613_p8, %s2303_s11), 95 }
  0x7f   : > { %v2326_v12 = vcombine.high %v642_v8, %v650_v9  ;;  %v658_v15 = vld [vmem:[%s3032_s8 + $0x100] sm:$0xff]  ;;  %1830 = vmatprep.subr.bf16.mxu0 %v2310_v5  ;;  %v2328_v16 = vcombine.high %v643_v13, %v651_v14  ;;  %v659_v18 = vld [vmem:[%s3032_s8 + $0x108] sm:$0xff]  ;;  %1871 = vmatprep.subr.bf16.mxu1 %v2312_v10  ;;  %v2325_v20 = vcombine.low %v642_v8, %v650_v9  ;;  %s2304_s12 = sshll.u32 %s3376_s11, 3 }
  0x80   : > { %v666_v17 = vld [vmem:[%s3032_s8 + $0x140] sm:$0xff]  ;;  %v667_v19 = vld [vmem:[%s3032_s8 + $0x148] sm:$0xff]  ;;  %1831 = vmatpush1.bf16.msra.mxu0 %v2309_v7  ;;  %1872 = vmatpush1.bf16.msra.mxu1 %v2311_v11  ;;  %v2327_v21 = vcombine.low %v643_v13, %v651_v14  ;;  %s3300_s15 = scalar_lea.vmem %s3370_s3, %s2304_s12  ;;  %s3315_s20 = scalar_lea.vmem %s3371_s4, %s2304_s12 }
  0x81   : > { %1832 = vmatprep.subr.bf16.mxu0 %v2326_v12  ;;  %v2342_v22 = vcombine.high %v658_v15, %v666_v17  ;;  %1873 = vmatprep.subr.bf16.mxu1 %v2328_v16  ;;  %v2344_v23 = vcombine.high %v659_v18, %v667_v19  ;;  %v674_v24 = vld [vmem:[%s3032_s8 + $0x180] sm:$0xff]  ;;  %v675_v26 = vld [vmem:[%s3032_s8 + $0x188] sm:$0xff]  ;;  %v2341_v29 = vcombine.low %v658_v15, %v666_v17 }
  0x82   : > { %v682_v25 = vld [vmem:[%s3032_s8 + $0x1c0] sm:$0xff]  ;;  %v683_v27 = vld [vmem:[%s3032_s8 + $0x1c8] sm:$0xff]  ;;  %v2343_v30 = vcombine.low %v659_v18, %v667_v19 }
  0x83   : > { %v2358_v31 = vcombine.high %v674_v24, %v682_v25  ;;  %v2360_v32 = vcombine.high %v675_v26, %v683_v27  ;;  %v690_v33 = vld [vmem:[%s3032_s8 + $0x200] sm:$0xff]  ;;  %v691_v35 = vld [vmem:[%s3032_s8 + $0x208] sm:$0xff]  ;;  %v2357_v37 = vcombine.low %v674_v24, %v682_v25  ;;  %v2359_v38 = vcombine.low %v675_v26, %v683_v27 }
  0x84   : > { %1833 = vmatpush1.bf16.msra.mxu0 %v2325_v20  ;;  %1874 = vmatpush1.bf16.msra.mxu1 %v2327_v21  ;;  %v698_v34 = vld [vmem:[%s3032_s8 + $0x240] sm:$0xff]  ;;  %v699_v36 = vld [vmem:[%s3032_s8 + $0x248] sm:$0xff]  ;;  %v2568_v25 = vmov 65535  }
  0x85   : > { %1834 = vmatprep.subr.bf16.mxu0 %v2342_v22  ;;  %1875 = vmatprep.subr.bf16.mxu1 %v2344_v23  ;;  %v2374_v39 = vcombine.high %v690_v33, %v698_v34  ;;  %v2376_v40 = vcombine.high %v691_v35, %v699_v36  ;;  %v706_v41 = vld [vmem:[%s3032_s8 + $0x280] sm:$0xff]  ;;  %v707_v43 = vld [vmem:[%s3032_s8 + $0x288] sm:$0xff]  ;;  %v2373_v45 = vcombine.low %v690_v33, %v698_v34  ;;  %v1780_v26 = vsel %vm1778_vm1, 4294967295, %v2568_v25  ;;  %v692_v25 = vld [vmem:[%s3032_s8 + $0x210] sm:$0xff] }
  0x86   : > { %v714_v42 = vld [vmem:[%s3032_s8 + $0x2c0] sm:$0xff]  ;;  %v715_v44 = vld [vmem:[%s3032_s8 + $0x2c8] sm:$0xff]  ;;  %v2375_v46 = vcombine.low %v691_v35, %v699_v36  ;;  %v3082_v34 = vsel %vm1779_vm2, %v1780_v26, 0  ;;  %v700_v26 = vld [vmem:[%s3032_s8 + $0x250] sm:$0xff] }
  0x87   : > { %v2390_v47 = vcombine.high %v706_v41, %v714_v42  ;;  %v2392_v48 = vcombine.high %v707_v43, %v715_v44  ;;  %v722_v49 = vld [vmem:[%s3032_s8 + $0x300] sm:$0xff]  ;;  %v723_v51 = vld [vmem:[%s3032_s8 + $0x308] sm:$0xff]  ;;  %v2389_v53 = vcombine.low %v706_v41, %v714_v42  ;;  %v2391_v54 = vcombine.low %v707_v43, %v715_v44  ;;  %v628_v42 = vld [vmem:[%s3032_s8 + $0x10] sm:$0xff] }
  0x88   : > { %1835 = vmatpush1.bf16.msra.mxu0 %v2341_v29  ;;  %1876 = vmatpush1.bf16.msra.mxu1 %v2343_v30  ;;  %v730_v50 = vld [vmem:[%s3032_s8 + $0x340] sm:$0xff]  ;;  %v731_v52 = vld [vmem:[%s3032_s8 + $0x348] sm:$0xff]  ;;  %v636_v43 = vld [vmem:[%s3032_s8 + $0x50] sm:$0xff] }
  0x89   : > { %1836 = vmatprep.subr.bf16.mxu0 %v2358_v31  ;;  %1877 = vmatprep.subr.bf16.mxu1 %v2360_v32  ;;  %v2406_v55 = vcombine.high %v722_v49, %v730_v50  ;;  %v2408_v56 = vcombine.high %v723_v51, %v731_v52  ;;  %v738_v57 = vld [vmem:[%s3032_s8 + $0x380] sm:$0xff]  ;;  %v739_v59 = vld [vmem:[%s3032_s8 + $0x388] sm:$0xff]  ;;  %v2405_v61 = vcombine.low %v722_v49, %v730_v50  ;;  %v629_v44 = vld [vmem:[%s3032_s8 + $0x18] sm:$0xff] }
  0x8a   : > { %v746_v58 = vld [vmem:[%s3032_s8 + $0x3c0] sm:$0xff]  ;;  %v747_v60 = vld [vmem:[%s3032_s8 + $0x3c8] sm:$0xff]  ;;  %v2407_v62 = vcombine.low %v723_v51, %v731_v52  ;;  %v644_v49 = vld [vmem:[%s3032_s8 + $0x90] sm:$0xff] }
  0x8b   : > { %v2422_v63 = vcombine.high %v738_v57, %v746_v58  ;;  %v2424_v2 = vcombine.high %v739_v59, %v747_v60  ;;  %v754_v3 = vld [vmem:[%s3032_s8 + $0x400] sm:$0xff]  ;;  %v755_v5 = vld [vmem:[%s3032_s8 + $0x408] sm:$0xff]  ;;  %v2421_v7 = vcombine.low %v738_v57, %v746_v58  ;;  %v2423_v8 = vcombine.low %v739_v59, %v747_v60  ;;  %v652_v52 = vld [vmem:[%s3032_s8 + $0xd0] sm:$0xff] }
  0x8c   : > { %1837 = vmatpush1.bf16.msra.mxu0 %v2357_v37  ;;  %1878 = vmatpush1.bf16.msra.mxu1 %v2359_v38  ;;  %v762_v4 = vld [vmem:[%s3032_s8 + $0x440] sm:$0xff]  ;;  %v763_v6 = vld [vmem:[%s3032_s8 + $0x448] sm:$0xff]  ;;  %v2313_v59 = vcombine.low %v628_v42, %v636_v43 }
  0x8d   : > { %1838 = vmatprep.subr.bf16.mxu0 %v2374_v39  ;;  %1879 = vmatprep.subr.bf16.mxu1 %v2376_v40  ;;  %v2438_v9 = vcombine.high %v754_v3, %v762_v4  ;;  %v2440_v10 = vcombine.high %v755_v5, %v763_v6  ;;  %v770_v11 = vld [vmem:[%s3032_s8 + $0x480] sm:$0xff]  ;;  %v771_v13 = vld [vmem:[%s3032_s8 + $0x488] sm:$0xff]  ;;  %v2437_v15 = vcombine.low %v754_v3, %v762_v4 }
  0x8e   : > { %v778_v12 = vld [vmem:[%s3032_s8 + $0x4c0] sm:$0xff]  ;;  %v779_v14 = vld [vmem:[%s3032_s8 + $0x4c8] sm:$0xff]  ;;  %v2439_v16 = vcombine.low %v755_v5, %v763_v6  ;;  %v660_v5 = vld [vmem:[%s3032_s8 + $0x110] sm:$0xff] }
  0x8f   : > { %v2454_v17 = vcombine.high %v770_v11, %v778_v12  ;;  %v786_v18 = vld [vmem:[%s3032_s8 + $0x500] sm:$0xff]  ;;  %v2456_v20 = vcombine.high %v771_v13, %v779_v14  ;;  %v787_v21 = vld [vmem:[%s3032_s8 + $0x508] sm:$0xff]  ;;  %v2453_v29 = vcombine.low %v770_v11, %v778_v12  ;;  %v2455_v30 = vcombine.low %v771_v13, %v779_v14  ;;  %v668_v6 = vld [vmem:[%s3032_s8 + $0x150] sm:$0xff] }
  0x90   : > { %1839 = vmatpush1.bf16.msra.mxu0 %v2373_v45  ;;  %1880 = vmatpush1.bf16.msra.mxu1 %v2375_v46  ;;  %v794_v19 = vld [vmem:[%s3032_s8 + $0x540] sm:$0xff]  ;;  %v795_v24 = vld [vmem:[%s3032_s8 + $0x548] sm:$0xff]  ;;  %v637_v45 = vld [vmem:[%s3032_s8 + $0x58] sm:$0xff]  ;;  %v2329_v13 = vcombine.low %v644_v49, %v652_v52 }
  0x91   : > { %1840 = vmatprep.subr.bf16.mxu0 %v2390_v47  ;;  %1881 = vmatprep.subr.bf16.mxu1 %v2392_v48  ;;  %v802_v22 = vld [vmem:[%s3032_s8 + $0x580] sm:$0xff]  ;;  %v803_v27 = vld [vmem:[%s3032_s8 + $0x588] sm:$0xff]  ;;  %v2470_v31 = vcombine.high %v786_v18, %v794_v19  ;;  %v2472_v33 = vcombine.high %v787_v21, %v795_v24  ;;  %v2469_v36 = vcombine.low %v786_v18, %v794_v19  ;;  %v684_v18 = vld [vmem:[%s3032_s8 + $0x1d0] sm:$0xff] }
  0x92   : > { %v810_v23 = vld [vmem:[%s3032_s8 + $0x5c0] sm:$0x77]  ;;  %v811_v28 = vld [vmem:[%s3032_s8 + $0x5c8] sm:$0x77]  ;;  %v2471_v38 = vcombine.low %v787_v21, %v795_v24  ;;  %v2314_v48 = vcombine.high %v628_v42, %v636_v43  ;;  %v2316_v51 = vcombine.high %v629_v44, %v637_v45  ;;  %v2315_v60 = vcombine.low %v629_v44, %v637_v45  ;;  %v677_v19 = vld [vmem:[%s3032_s8 + $0x198] sm:$0xff] }
  0x93   : > { %v2486_v32 = vcombine.high %v802_v22, %v810_v23  ;;  %v2488_v35 = vcombine.high %v803_v27, %v811_v28  ;;  %v2485_v37 = vcombine.low %v802_v22, %v810_v23  ;;  %v2487_v40 = vcombine.low %v803_v27, %v811_v28  ;;  %v818_v50 = vld [vmem:[%s3369_s2] sm:$0xff]  ;;  %v807_v58 = vld [vmem:[%s3032_s8 + $0x5a8] sm:$0xff]  ;;  %v693_v27 = vld [vmem:[%s3032_s8 + $0x218] sm:$0xff] }
  0x94   : > { %1841 = vmatpush1.bf16.msra.mxu0 %v2389_v53  ;;  %1882 = vmatpush1.bf16.msra.mxu1 %v2391_v54  ;;  %v645_v53 = vld [vmem:[%s3032_s8 + $0x98] sm:$0xff]  ;;  %v814_v57 = vld [vmem:[%s3032_s8 + $0x5e0] sm:$0x77]  ;;  %v2345_v21 = vcombine.low %v660_v5, %v668_v6 }
  0x95   : > { %1842 = vmatprep.subr.bf16.mxu0 %v2406_v55  ;;  %1883 = vmatprep.subr.bf16.mxu1 %v2408_v56  ;;  %v1786_v39 = vand.u32 %v2486_v32, %v3082_v34  ;;  %v1792_v41 = vand.u32 %v2488_v35, %v3082_v34  ;;  %v1783_v46 = vand.u32 %v2485_v37, %v3082_v34  ;;  %v653_v54 = vld [vmem:[%s3032_s8 + $0xd8] sm:$0xff]  ;;  %v806_v56 = vld [vmem:[%s3032_s8 + $0x5a0] sm:$0xff]  ;;  %v708_v32 = vld [vmem:[%s3032_s8 + $0x290] sm:$0xff] }
  0x96   : > { %v1789_v47 = vand.u32 %v2487_v40, %v3082_v34  ;;  %821 = vperm.xlu0 %2540, %v818_v50   ;;  %v3101_v55 = vcombine.low %v3022_v0, %v3022_v0  ;;  %v2332_v0 = vcombine.high %v645_v53, %v653_v54  ;;  %v2331_v14 = vcombine.low %v645_v53, %v653_v54  ;;  %v701_v28 = vld [vmem:[%s3032_s8 + $0x258] sm:$0xff]  ;;  %v716_v35 = vld [vmem:[%s3032_s8 + $0x2d0] sm:$0xff] }
  0x97   : > { %v717_v37 = vld [vmem:[%s3032_s8 + $0x2d8] sm:$0xff]  ;;  %v2379_v42 = vcombine.low %v693_v27, %v701_v28  ;;  %v724_v50 = vld [vmem:[%s3032_s8 + $0x310] sm:$0xff] }
  0x98   : > { %1843 = vmatpush1.bf16.msra.mxu0 %v2405_v61  ;;  %1884 = vmatpush1.bf16.msra.mxu1 %v2407_v62  ;;  %v2493_v61 = vcombine.low %v806_v56, %v814_v57  ;;  %v2494_v62 = vcombine.high %v806_v56, %v814_v57  ;;  %v809_v40 = vld [vmem:[%s3032_s8 + $0x5b8] sm:$0xff] }
  0x99   : > { %1844 = vmatprep.subr.bf16.mxu0 %v2422_v63  ;;  %1885 = vmatprep.subr.bf16.mxu1 %v2424_v2  ;;  %v815_v63 = vld [vmem:[%s3032_s8 + $0x5e8] sm:$0x77]  ;;  %v2330_v2 = vcombine.high %v644_v49, %v652_v52  ;;  %v817_v45 = vld [vmem:[%s3032_s8 + $0x5f8] sm:$0x77] }
  0x9a   : > { %v2495_v3 = vcombine.low %v807_v58, %v815_v63  ;;  %v2496_v4 = vcombine.high %v807_v58, %v815_v63  ;;  %v725_v54 = vld [vmem:[%s3032_s8 + $0x318] sm:$0xff]  ;;  %v740_v63 = vld [vmem:[%s3032_s8 + $0x390] sm:$0xff] }
  0x9b   : > { %v733_v56 = vld [vmem:[%s3032_s8 + $0x358] sm:$0xff] }
  0x9c   : > { %1845 = vmatpush1.bf16.msra.mxu0 %v2421_v7  ;;  %1886 = vmatpush1.bf16.msra.mxu1 %v2423_v8  ;;  %v3110_v7 = vand.u32 %v2494_v62, %v3082_v34  ;;  %v3113_v8 = vand.u32 %v2493_v61, %v3082_v34  ;;  %v3119_v11 = vand.u32 %v2496_v4, %v3082_v34  ;;  %v749_v4 = vld [vmem:[%s3032_s8 + $0x3d8] sm:$0xff] }
  0x9d   : > { %1846 = vmatprep.subr.bf16.mxu0 %v2438_v9  ;;  %1887 = vmatprep.subr.bf16.mxu1 %v2440_v10  ;;  %v661_v9 = vld [vmem:[%s3032_s8 + $0x118] sm:$0xff]  ;;  %v3122_v12 = vand.u32 %v2495_v3, %v3082_v34  ;;  %v2412_v62 = vcombine.high %v725_v54, %v733_v56 }
  0x9e   : > { %v669_v10 = vld [vmem:[%s3032_s8 + $0x158] sm:$0xff] }
  0x9f   : > { %v2347_v22 = vcombine.low %v661_v9, %v669_v10  ;;  %v741_v3 = vld [vmem:[%s3032_s8 + $0x398] sm:$0xff] }
  0xa0   : > { %1847 = vmatpush1.bf16.msra.mxu0 %v2437_v15  ;;  %1888 = vmatpush1.bf16.msra.mxu1 %v2439_v16  ;;  %v2346_v15 = vcombine.high %v660_v5, %v668_v6  ;;  %v2348_v16 = vcombine.high %v661_v9, %v669_v10  ;;  %v2411_v5 = vcombine.low %v725_v54, %v733_v56  ;;  %v756_v10 = vld [vmem:[%s3032_s8 + $0x410] sm:$0xff]  ;;  %v639_v54 = vld [vmem:[%s3032_s8 + $0x68] sm:$0xff] }
  0xa1   : > { %1848 = vmatprep.subr.bf16.mxu0 %v2454_v17  ;;  %1889 = vmatprep.subr.bf16.mxu1 %v2456_v20  ;;  %v676_v17 = vld [vmem:[%s3032_s8 + $0x190] sm:$0xff]  ;;  %v685_v20 = vld [vmem:[%s3032_s8 + $0x1d8] sm:$0xff]  ;;  %v2428_v9 = vcombine.high %v741_v3, %v749_v4 }
  0xa2   : > { %v2362_v23 = vcombine.high %v676_v17, %v684_v18  ;;  %v2364_v24 = vcombine.high %v677_v19, %v685_v20 }
  0xa4   : > { %1849 = vmatpush1.bf16.msra.mxu0 %v2453_v29  ;;  %1890 = vmatpush1.bf16.msra.mxu1 %v2455_v30  ;;  %v2361_v29 = vcombine.low %v676_v17, %v684_v18  ;;  %v2363_v30 = vcombine.low %v677_v19, %v685_v20  ;;  %v2427_v17 = vcombine.low %v741_v3, %v749_v4  ;;  %v772_v20 = vld [vmem:[%s3032_s8 + $0x490] sm:$0xff]  ;;  %v655_v3 = vld [vmem:[%s3032_s8 + $0xe8] sm:$0xff] }
  0xa5   : > { %1850 = vmatprep.subr.bf16.mxu0 %v2470_v31  ;;  %1891 = vmatprep.subr.bf16.mxu1 %v2472_v33  ;;  %v2378_v31 = vcombine.high %v692_v25, %v700_v26  ;;  %v2380_v33 = vcombine.high %v693_v27, %v701_v28  ;;  %v788_v27 = vld [vmem:[%s3032_s8 + $0x510] sm:$0xff] }
  0xa6   : > { %v796_v28 = vld [vmem:[%s3032_s8 + $0x550] sm:$0xff] }
  0xa8   : > { %1851 = vmatpush1.bf16.msra.mxu0 %v2469_v36  ;;  %1892 = vmatpush1.bf16.msra.mxu1 %v2471_v38  ;;  %v709_v36 = vld [vmem:[%s3032_s8 + $0x298] sm:$0xff]  ;;  %v808_v38 = vld [vmem:[%s3032_s8 + $0x5b0] sm:$0xff] }
  0xa9   : > { %1852 = vmatprep.subr.bf16.mxu0 %v1786_v39  ;;  %1893 = vmatprep.subr.bf16.mxu1 %v1792_v41  ;;  %v816_v39 = vld [vmem:[%s3032_s8 + $0x5f0] sm:$0x77]  ;;  %v2377_v41 = vcombine.low %v692_v25, %v700_v26  ;;  %v2396_v49 = vcombine.high %v709_v36, %v717_v37 }
  0xaa   : > { %v2497_v43 = vcombine.low %v808_v38, %v816_v39  ;;  %v2498_v44 = vcombine.high %v808_v38, %v816_v39  ;;  %v2474_v39 = vcombine.high %v788_v27, %v796_v28 }
  0xac   : > { %1853 = vmatpush1.bf16.msra.mxu0 %v1783_v46  ;;  %1894 = vmatpush1.bf16.msra.mxu1 %v1789_v47  ;;  %v2394_v46 = vcombine.high %v708_v32, %v716_v35  ;;  %v2499_v47 = vcombine.low %v809_v40, %v817_v45  ;;  %v3148_v52 = vand.u32 %v2498_v44, %v3082_v34 }
  0xad   : > { %1912 = vmatprep.subr.bf16.mxu0 %v2314_v48  ;;  %1953 = vmatprep.subr.bf16.mxu1 %v2316_v51  ;;  %v2500_v48 = vcombine.high %v809_v40, %v817_v45  ;;  %v732_v51 = vld [vmem:[%s3032_s8 + $0x350] sm:$0xff]  ;;  %v3151_v53 = vand.u32 %v2497_v43, %v3082_v34  ;;  %v2473_v43 = vcombine.low %v788_v27, %v796_v28  ;;  %v702_v27 = vld [vmem:[%s3032_s8 + $0x260] sm:$0xff]  ;;  %v695_v28 = vld [vmem:[%s3032_s8 + $0x228] sm:$0xff] }
  0xae   : > { %v3159_v58 = vand.u32 %v2499_v47, %v3082_v34  ;;  %v2410_v61 = vcombine.high %v724_v50, %v732_v51 }
  0xaf   : > { %1863 = vmatmul.mubr.bf16.vlgmr.msra.gmra.mrb[0].mxu0 %v3101_v55  ;;  %1904 = vmatmul.mubr.bf16.vlgmr.msra.gmra.mrb[0].mxu1 %v3101_v55  ;;  %v3156_v57 = vand.u32 %v2500_v48, %v3082_v34 }
  0xb0   : > { %1913 = vmatpush1.bf16.msra.mxu0 %v2313_v59  ;;  %1954 = vmatpush1.bf16.msra.mxu1 %v2315_v60  ;;  %v2393_v59 = vcombine.low %v708_v32, %v716_v35  ;;  %v2395_v60 = vcombine.low %v709_v36, %v717_v37  ;;  %v812_v32 = vld [vmem:[%s3032_s8 + $0x5d0] sm:$0x77]  ;;  %v805_v35 = vld [vmem:[%s3032_s8 + $0x598] sm:$0xff] }
  0xb1   : > { %1914 = vmatprep.subr.bf16.mxu0 %v2330_v2  ;;  %1955 = vmatprep.subr.bf16.mxu1 %v2332_v0  ;;  %v748_v2 = vld [vmem:[%s3032_s8 + $0x3d0] sm:$0xff]  ;;  %v2409_v0 = vcombine.low %v724_v50, %v732_v51  ;;  %v813_v36 = vld [vmem:[%s3032_s8 + $0x5d8] sm:$0x77]  ;;  %v638_v50 = vld [vmem:[%s3032_s8 + $0x60] sm:$0xff] }
  0xb2   : > { %2503 = vmatprep.mubr.msk.bf16.mxu0 %vm1774_vm0, %v3026_v1  ;;  %2504 = vmatprep.mubr.msk.bf16.mxu1 %vm1774_vm0, %v3026_v1  ;;  %v2426_v6 = vcombine.high %v740_v63, %v748_v2  ;;  %v2491_v47 = vcombine.low %v805_v35, %v813_v36  ;;  %v631_v51 = vld [vmem:[%s3032_s8 + $0x28] sm:$0xff] }
  0xb4   : > { %1915 = vmatpush1.bf16.msra.mxu0 %v2329_v13  ;;  %1956 = vmatpush1.bf16.msra.mxu1 %v2331_v14  ;;  %v764_v13 = vld [vmem:[%s3032_s8 + $0x450] sm:$0xff]  ;;  %v757_v14 = vld [vmem:[%s3032_s8 + $0x418] sm:$0xff] }
  0xb5   : > { %1916 = vmatprep.subr.bf16.mxu0 %v2346_v15  ;;  %1957 = vmatprep.subr.bf16.mxu1 %v2348_v16  ;;  %v765_v15 = vld [vmem:[%s3032_s8 + $0x458] sm:$0xff]  ;;  %v2425_v16 = vcombine.low %v740_v63, %v748_v2  ;;  %v2442_v18 = vcombine.high %v756_v10, %v764_v13  ;;  %v654_v63 = vld [vmem:[%s3032_s8 + $0xe0] sm:$0xff]  ;;  %v647_v2 = vld [vmem:[%s3032_s8 + $0xa8] sm:$0xff] }
  0xb6   : > { %v2444_v19 = vcombine.high %v757_v14, %v765_v15  ;;  %v2443_v25 = vcombine.low %v757_v14, %v765_v15  ;;  %v2335_v15 = vcombine.low %v647_v2, %v655_v3 }
  0xb8   : > { %1917 = vmatpush1.bf16.msra.mxu0 %v2345_v21  ;;  %1958 = vmatpush1.bf16.msra.mxu1 %v2347_v22  ;;  %v780_v21 = vld [vmem:[%s3032_s8 + $0x4d0] sm:$0xff]  ;;  %v773_v22 = vld [vmem:[%s3032_s8 + $0x498] sm:$0xff] }
  0xb9   : > { %1918 = vmatprep.subr.bf16.mxu0 %v2362_v23  ;;  %1959 = vmatprep.subr.bf16.mxu1 %v2364_v24  ;;  %v781_v23 = vld [vmem:[%s3032_s8 + $0x4d8] sm:$0xff]  ;;  %v2441_v24 = vcombine.low %v756_v10, %v764_v13  ;;  %v2458_v26 = vcombine.high %v772_v20, %v780_v21  ;;  %v2457_v37 = vcombine.low %v772_v20, %v780_v21  ;;  %v663_v10 = vld [vmem:[%s3032_s8 + $0x128] sm:$0xff] }
  0xba   : > { %v2459_v38 = vcombine.low %v773_v22, %v781_v23  ;;  %v671_v13 = vld [vmem:[%s3032_s8 + $0x168] sm:$0xff] }
  0xbb   : > { %v679_v20 = vld [vmem:[%s3032_s8 + $0x1a8] sm:$0xff] }
  0xbc   : > { %1919 = vmatpush1.bf16.msra.mxu0 %v2361_v29  ;;  %1960 = vmatpush1.bf16.msra.mxu1 %v2363_v30  ;;  %v2460_v29 = vcombine.high %v773_v22, %v781_v23  ;;  %v789_v30 = vld [vmem:[%s3032_s8 + $0x518] sm:$0xff]  ;;  %v687_v21 = vld [vmem:[%s3032_s8 + $0x1e8] sm:$0xff]  ;;  %v2351_v23 = vcombine.low %v663_v10, %v671_v13 }
  0xbd   : > { %1920 = vmatprep.subr.bf16.mxu0 %v2378_v31  ;;  %1961 = vmatprep.subr.bf16.mxu1 %v2380_v33  ;;  %v804_v31 = vld [vmem:[%s3032_s8 + $0x590] sm:$0xff]  ;;  %v797_v33 = vld [vmem:[%s3032_s8 + $0x558] sm:$0xff] }
  0xbe   : > { %v2490_v40 = vcombine.high %v804_v31, %v812_v32  ;;  %v2489_v44 = vcombine.low %v804_v31, %v812_v32  ;;  %v2475_v45 = vcombine.low %v789_v30, %v797_v33  ;;  %v2367_v31 = vcombine.low %v679_v20, %v687_v21 }
  0xc0   : > { %1921 = vmatpush1.bf16.msra.mxu0 %v2377_v41  ;;  %1962 = vmatpush1.bf16.msra.mxu1 %v2379_v42  ;;  %v2476_v41 = vcombine.high %v789_v30, %v797_v33  ;;  %v2492_v42 = vcombine.high %v805_v35, %v813_v36  ;;  %v1795_v56 = vand.u32 %v2489_v44, %v3082_v34  ;;  %v710_v35 = vld [vmem:[%s3032_s8 + $0x2a0] sm:$0xff] }
  0xc1   : > { %1922 = vmatprep.subr.bf16.mxu0 %v2394_v46  ;;  %1963 = vmatprep.subr.bf16.mxu1 %v2396_v49  ;;  %v1798_v46 = vand.u32 %v2490_v40, %v3082_v34  ;;  %v630_v49 = vld [vmem:[%s3032_s8 + $0x20] sm:$0xff] }
  0xc2   : > { %v1804_v48 = vand.u32 %v2492_v42, %v3082_v34  ;;  %v2317_v4 = vcombine.low %v630_v49, %v638_v50  ;;  %v718_v36 = vld [vmem:[%s3032_s8 + $0x2e0] sm:$0xff] }
  0xc3   : > { %v734_v44 = vld [vmem:[%s3032_s8 + $0x360] sm:$0xff] }
  0xc4   : > { %1923 = vmatpush1.bf16.msra.mxu0 %v2393_v59  ;;  %1964 = vmatpush1.bf16.msra.mxu1 %v2395_v60  ;;  %v1801_v59 = vand.u32 %v2491_v47, %v3082_v34  ;;  %v2318_v60 = vcombine.high %v630_v49, %v638_v50  ;;  %v2336_v34 = vcombine.high %v647_v2, %v655_v3  ;;  %v758_v2 = vld [vmem:[%s3032_s8 + $0x420] sm:$0xff] }
  0xc5   : > { %1924 = vmatprep.subr.bf16.mxu0 %v2410_v61  ;;  %1965 = vmatprep.subr.bf16.mxu1 %v2412_v62  ;;  %v2320_v61 = vcombine.high %v631_v51, %v639_v54  ;;  %v646_v62 = vld [vmem:[%s3032_s8 + $0xa0] sm:$0xff]  ;;  %v2397_v47 = vcombine.low %v710_v35, %v718_v36 }
  0xc6   : > { %v2333_v14 = vcombine.low %v646_v62, %v654_v63  ;;  %v766_v3 = vld [vmem:[%s3032_s8 + $0x460] sm:$0xff] }
  0xc8   : > { %1925 = vmatpush1.bf16.msra.mxu0 %v2409_v0  ;;  %1966 = vmatpush1.bf16.msra.mxu1 %v2411_v5  ;;  %v2319_v0 = vcombine.low %v631_v51, %v639_v54  ;;  %v2334_v5 = vcombine.high %v646_v62, %v654_v63  ;;  %v742_v51 = vld [vmem:[%s3032_s8 + $0x3a0] sm:$0xff] }
  0xc9   : > { %1926 = vmatprep.subr.bf16.mxu0 %v2426_v6  ;;  %1967 = vmatprep.subr.bf16.mxu1 %v2428_v9  ;;  %v662_v6 = vld [vmem:[%s3032_s8 + $0x120] sm:$0xff] }
  0xca   : > { %v670_v9 = vld [vmem:[%s3032_s8 + $0x160] sm:$0xff] }
  0xcb   : > { %v2349_v22 = vcombine.low %v662_v6, %v670_v9  ;;  %v750_v54 = vld [vmem:[%s3032_s8 + $0x3e0] sm:$0xff] }
  0xcc   : > { %1927 = vmatpush1.bf16.msra.mxu0 %v2425_v16  ;;  %1968 = vmatpush1.bf16.msra.mxu1 %v2427_v17  ;;  %v2350_v16 = vcombine.high %v662_v6, %v670_v9  ;;  %v2352_v17 = vcombine.high %v663_v10, %v671_v13  ;;  %v2430_v62 = vcombine.high %v742_v51, %v750_v54  ;;  %v774_v10 = vld [vmem:[%s3032_s8 + $0x4a0] sm:$0xff] }
  0xcd   : > { %1928 = vmatprep.subr.bf16.mxu0 %v2442_v18  ;;  %1969 = vmatprep.subr.bf16.mxu1 %v2444_v19  ;;  %v678_v18 = vld [vmem:[%s3032_s8 + $0x1a0] sm:$0xff]  ;;  %v2446_v6 = vcombine.high %v758_v2, %v766_v3 }
  0xce   : > { %v686_v19 = vld [vmem:[%s3032_s8 + $0x1e0] sm:$0xff] }
  0xcf   : > { %v2365_v30 = vcombine.low %v678_v18, %v686_v19  ;;  %v782_v13 = vld [vmem:[%s3032_s8 + $0x4e0] sm:$0xff] }
  0xd0   : > { %1929 = vmatpush1.bf16.msra.mxu0 %v2441_v24  ;;  %1970 = vmatpush1.bf16.msra.mxu1 %v2443_v25  ;;  %v2366_v24 = vcombine.high %v678_v18, %v686_v19  ;;  %v2368_v25 = vcombine.high %v679_v20, %v687_v21  ;;  %v2462_v18 = vcombine.high %v774_v10, %v782_v13  ;;  %v790_v20 = vld [vmem:[%s3032_s8 + $0x520] sm:$0xff] }
  0xd1   : > { %1930 = vmatprep.subr.bf16.mxu0 %v2458_v26  ;;  %1971 = vmatprep.subr.bf16.mxu1 %v2460_v29  ;;  %v694_v26 = vld [vmem:[%s3032_s8 + $0x220] sm:$0xff]  ;;  %v703_v29 = vld [vmem:[%s3032_s8 + $0x268] sm:$0xff] }
  0xd2   : > { %v2382_v32 = vcombine.high %v694_v26, %v702_v27  ;;  %v2384_v33 = vcombine.high %v695_v28, %v703_v29  ;;  %v2383_v40 = vcombine.low %v695_v28, %v703_v29  ;;  %v798_v21 = vld [vmem:[%s3032_s8 + $0x560] sm:$0xff] }
  0xd3   : > { %v2477_v28 = vcombine.low %v790_v20, %v798_v21 }
  0xd4   : > { %1931 = vmatpush1.bf16.msra.mxu0 %v2457_v37  ;;  %1972 = vmatpush1.bf16.msra.mxu1 %v2459_v38  ;;  %v711_v37 = vld [vmem:[%s3032_s8 + $0x2a8] sm:$0xff] }
  0xd5   : > { %1932 = vmatprep.subr.bf16.mxu0 %v2474_v39  ;;  %1973 = vmatprep.subr.bf16.mxu1 %v2476_v41  ;;  %v719_v38 = vld [vmem:[%s3032_s8 + $0x2e8] sm:$0xff]  ;;  %v2381_v39 = vcombine.low %v694_v26, %v702_v27  ;;  %v2398_v41 = vcombine.high %v710_v35, %v718_v36  ;;  %v2478_v26 = vcombine.high %v790_v20, %v798_v21  ;;  %v737_v20 = vld [vmem:[%s3032_s8 + $0x378] sm:$0xff] }
  0xd6   : > { %v2400_v42 = vcombine.high %v711_v37, %v719_v38 }
  0xd8   : > { %1933 = vmatpush1.bf16.msra.mxu0 %v2473_v43  ;;  %1974 = vmatpush1.bf16.msra.mxu1 %v2475_v45  ;;  %v726_v43 = vld [vmem:[%s3032_s8 + $0x320] sm:$0xff]  ;;  %v727_v45 = vld [vmem:[%s3032_s8 + $0x328] sm:$0xff] }
  0xd9   : > { %1934 = vmatprep.subr.bf16.mxu0 %v1798_v46  ;;  %1975 = vmatprep.subr.bf16.mxu1 %v1804_v48  ;;  %v735_v46 = vld [vmem:[%s3032_s8 + $0x368] sm:$0xff]  ;;  %v2399_v48 = vcombine.low %v711_v37, %v719_v38  ;;  %v2414_v49 = vcombine.high %v726_v43, %v734_v44  ;;  %v648_v37 = vld [vmem:[%s3032_s8 + $0xb0] sm:$0xff] }
  0xda   : > { %v2416_v50 = vcombine.high %v727_v45, %v735_v46  ;;  %v656_v38 = vld [vmem:[%s3032_s8 + $0xf0] sm:$0xff] }
  0xdc   : > { %1935 = vmatpush1.bf16.msra.mxu0 %v1795_v56  ;;  %1976 = vmatpush1.bf16.msra.mxu1 %v1801_v59  ;;  %v743_v56 = vld [vmem:[%s3032_s8 + $0x3a8] sm:$0xff] }
  0xdd   : > { %1994 = vmatprep.subr.bf16.mxu0 %v2318_v60  ;;  %2035 = vmatprep.subr.bf16.mxu1 %v2320_v61  ;;  %v751_v59 = vld [vmem:[%s3032_s8 + $0x3e8] sm:$0xff]  ;;  %v2413_v60 = vcombine.low %v726_v43, %v734_v44  ;;  %v2415_v61 = vcombine.low %v727_v45, %v735_v46  ;;  %v672_v44 = vld [vmem:[%s3032_s8 + $0x170] sm:$0xff]  ;;  %v665_v45 = vld [vmem:[%s3032_s8 + $0x138] sm:$0xff] }
  0xde   : > { %v2432_v63 = vcombine.high %v743_v56, %v751_v59  ;;  %v673_v46 = vld [vmem:[%s3032_s8 + $0x178] sm:$0xff] }
  0xdf   : > { %1945 = vmatmul.mubr.bf16.vlgmr.msra.gmra.mrb[4].mxu0 %v3101_v55  ;;  %1986 = vmatmul.mubr.bf16.vlgmr.msra.gmra.mrb[4].mxu1 %v3101_v55 }
  0xe0   : > { %1995 = vmatpush1.bf16.msra.mxu0 %v2317_v4  ;;  %2036 = vmatpush1.bf16.msra.mxu1 %v2319_v0  ;;  %v759_v4 = vld [vmem:[%s3032_s8 + $0x428] sm:$0xff] }
  0xe1   : > { %1996 = vmatprep.subr.bf16.mxu0 %v2334_v5  ;;  %2037 = vmatprep.subr.bf16.mxu1 %v2336_v34  ;;  %v767_v0 = vld [vmem:[%s3032_s8 + $0x468] sm:$0xff]  ;;  %v2429_v5 = vcombine.low %v742_v51, %v750_v54  ;;  %v2431_v34 = vcombine.low %v743_v56, %v751_v59  ;;  %v681_v51 = vld [vmem:[%s3032_s8 + $0x1b8] sm:$0xff]  ;;  %v2355_v59 = vcombine.low %v665_v45, %v673_v46 }
  0xe2   : > { %2505 = vmatprep.mubr.msk.bf16.mxu0 %vm1774_vm0, %v3026_v1  ;;  %2506 = vmatprep.mubr.msk.bf16.mxu1 %vm1774_vm0, %v3026_v1  ;;  %v2448_v9 = vcombine.high %v759_v4, %v767_v0  ;;  %v689_v54 = vld [vmem:[%s3032_s8 + $0x1f8] sm:$0xff] }
  0xe4   : > { %1997 = vmatpush1.bf16.msra.mxu0 %v2333_v14  ;;  %2038 = vmatpush1.bf16.msra.mxu1 %v2335_v15  ;;  %v775_v14 = vld [vmem:[%s3032_s8 + $0x4a8] sm:$0xff] }
  0xe5   : > { %1998 = vmatprep.subr.bf16.mxu0 %v2350_v16  ;;  %2039 = vmatprep.subr.bf16.mxu1 %v2352_v17  ;;  %v783_v15 = vld [vmem:[%s3032_s8 + $0x4e8] sm:$0xff]  ;;  %v2445_v16 = vcombine.low %v758_v2, %v766_v3  ;;  %v2447_v17 = vcombine.low %v759_v4, %v767_v0  ;;  %v697_v2 = vld [vmem:[%s3032_s8 + $0x238] sm:$0xff] }
  0xe6   : > { %v2464_v19 = vcombine.high %v775_v14, %v783_v15  ;;  %v705_v3 = vld [vmem:[%s3032_s8 + $0x278] sm:$0xff] }
  0xe8   : > { %1999 = vmatpush1.bf16.msra.mxu0 %v2349_v22  ;;  %2040 = vmatpush1.bf16.msra.mxu1 %v2351_v23  ;;  %v791_v22 = vld [vmem:[%s3032_s8 + $0x528] sm:$0xff] }
  0xe9   : > { %2000 = vmatprep.subr.bf16.mxu0 %v2366_v24  ;;  %2041 = vmatprep.subr.bf16.mxu1 %v2368_v25  ;;  %v799_v23 = vld [vmem:[%s3032_s8 + $0x568] sm:$0xff]  ;;  %v2461_v24 = vcombine.low %v774_v10, %v782_v13  ;;  %v2463_v25 = vcombine.low %v775_v14, %v783_v15  ;;  %v721_v10 = vld [vmem:[%s3032_s8 + $0x2f8] sm:$0xff]  ;;  %v2387_v14 = vcombine.low %v697_v2, %v705_v3 }
  0xea   : > { %v2480_v27 = vcombine.high %v791_v22, %v799_v23  ;;  %v2479_v29 = vcombine.low %v791_v22, %v799_v23 }
  0xec   : > { %2001 = vmatpush1.bf16.msra.mxu0 %v2365_v30  ;;  %2042 = vmatpush1.bf16.msra.mxu1 %v2367_v31  ;;  %v632_v30 = vld [vmem:[%s3032_s8 + $0x30] sm:$0xff] }
  0xed   : > { %2002 = vmatprep.subr.bf16.mxu0 %v2382_v32  ;;  %2043 = vmatprep.subr.bf16.mxu1 %v2384_v33  ;;  %v640_v31 = vld [vmem:[%s3032_s8 + $0x70] sm:$0xff]  ;;  %v633_v32 = vld [vmem:[%s3032_s8 + $0x38] sm:$0xff] }
  0xee   : > { %v641_v33 = vld [vmem:[%s3032_s8 + $0x78] sm:$0xff]  ;;  %v2322_v35 = vcombine.high %v632_v30, %v640_v31 }
  0xef   : > { %v2324_v36 = vcombine.high %v633_v32, %v641_v33 }
  0xf0   : > { %2003 = vmatpush1.bf16.msra.mxu0 %v2381_v39  ;;  %2044 = vmatpush1.bf16.msra.mxu1 %v2383_v40  ;;  %v649_v39 = vld [vmem:[%s3032_s8 + $0xb8] sm:$0xff] }
  0xf1   : > { %2004 = vmatprep.subr.bf16.mxu0 %v2398_v41  ;;  %2045 = vmatprep.subr.bf16.mxu1 %v2400_v42  ;;  %v657_v40 = vld [vmem:[%s3032_s8 + $0xf8] sm:$0xff]  ;;  %v2321_v41 = vcombine.low %v632_v30, %v640_v31  ;;  %v2323_v42 = vcombine.low %v633_v32, %v641_v33  ;;  %v760_v33 = vld [vmem:[%s3032_s8 + $0x430] sm:$0xff] }
  0xf2   : > { %v2340_v43 = vcombine.high %v649_v39, %v657_v40 }
  0xf4   : > { %2005 = vmatpush1.bf16.msra.mxu0 %v2397_v47  ;;  %2046 = vmatpush1.bf16.msra.mxu1 %v2399_v48  ;;  %v2356_v48 = vcombine.high %v665_v45, %v673_v46 }
  0xf5   : > { %2006 = vmatprep.subr.bf16.mxu0 %v2414_v49  ;;  %2047 = vmatprep.subr.bf16.mxu1 %v2416_v50  ;;  %v680_v49 = vld [vmem:[%s3032_s8 + $0x1b0] sm:$0xff] }
  0xf6   : > { %v688_v50 = vld [vmem:[%s3032_s8 + $0x1f0] sm:$0xff] }
  0xf7   : > { %v2369_v4 = vcombine.low %v680_v49, %v688_v50 }
  0xf8   : > { %2007 = vmatpush1.bf16.msra.mxu0 %v2413_v60  ;;  %2048 = vmatpush1.bf16.msra.mxu1 %v2415_v61  ;;  %v2370_v60 = vcombine.high %v680_v49, %v688_v50  ;;  %v2372_v61 = vcombine.high %v681_v51, %v689_v54  ;;  %v801_v49 = vld [vmem:[%s3032_s8 + $0x578] sm:$0xff] }
  0xf9   : > { %2008 = vmatprep.subr.bf16.mxu0 %v2430_v62  ;;  %2049 = vmatprep.subr.bf16.mxu1 %v2432_v63  ;;  %v696_v62 = vld [vmem:[%s3032_s8 + $0x230] sm:$0xff] }
  0xfa   : > { %v704_v63 = vld [vmem:[%s3032_s8 + $0x270] sm:$0xff] }
  0xfb   : > { %v2386_v0 = vcombine.high %v696_v62, %v704_v63  ;;  %v2385_v13 = vcombine.low %v696_v62, %v704_v63  ;;  %v2159_v63 = vld [vmem:[%s3300_s15 + $0x8] sm:$0xff] }
  0xfc   : > { %2009 = vmatpush1.bf16.msra.mxu0 %v2429_v5  ;;  %2050 = vmatpush1.bf16.msra.mxu1 %v2431_v34  ;;  %v2388_v5 = vcombine.high %v697_v2, %v705_v3  ;;  %v712_v34 = vld [vmem:[%s3032_s8 + $0x2b0] sm:$0xff] }
  0xfd   : > { %2010 = vmatprep.subr.bf16.mxu0 %v2446_v6  ;;  %2051 = vmatprep.subr.bf16.mxu1 %v2448_v9  ;;  %v720_v6 = vld [vmem:[%s3032_s8 + $0x2f0] sm:$0xff]  ;;  %v713_v9 = vld [vmem:[%s3032_s8 + $0x2b8] sm:$0xff] }
  0xfe   : > { %v2402_v15 = vcombine.high %v712_v34, %v720_v6  ;;  %v2401_v21 = vcombine.low %v712_v34, %v720_v6  ;;  %v2403_v22 = vcombine.low %v713_v9, %v721_v10 }
 0x100   : > { %2011 = vmatpush1.bf16.msra.mxu0 %v2445_v16  ;;  %2052 = vmatpush1.bf16.msra.mxu1 %v2447_v17  ;;  %v2404_v16 = vcombine.high %v713_v9, %v721_v10  ;;  %v728_v17 = vld [vmem:[%s3032_s8 + $0x330] sm:$0xff] }
 0x101   : > { %2012 = vmatprep.subr.bf16.mxu0 %v2462_v18  ;;  %2053 = vmatprep.subr.bf16.mxu1 %v2464_v19  ;;  %v736_v18 = vld [vmem:[%s3032_s8 + $0x370] sm:$0xff]  ;;  %v729_v19 = vld [vmem:[%s3032_s8 + $0x338] sm:$0xff] }
 0x102   : > { %v2418_v23 = vcombine.high %v728_v17, %v736_v18  ;;  %v2419_v30 = vcombine.low %v729_v19, %v737_v20 }
 0x104   : > { %2013 = vmatpush1.bf16.msra.mxu0 %v2461_v24  ;;  %2054 = vmatpush1.bf16.msra.mxu1 %v2463_v25  ;;  %v2420_v24 = vcombine.high %v729_v19, %v737_v20  ;;  %v744_v25 = vld [vmem:[%s3032_s8 + $0x3b0] sm:$0xff] }
 0x105   : > { %2014 = vmatprep.subr.bf16.mxu0 %v2478_v26  ;;  %2055 = vmatprep.subr.bf16.mxu1 %v2480_v27  ;;  %v752_v26 = vld [vmem:[%s3032_s8 + $0x3f0] sm:$0xff]  ;;  %v745_v27 = vld [vmem:[%s3032_s8 + $0x3b8] sm:$0xff] }
 0x106   : > { %v2434_v31 = vcombine.high %v744_v25, %v752_v26 }
 0x108   : > { %2015 = vmatpush1.bf16.msra.mxu0 %v2477_v28  ;;  %2056 = vmatpush1.bf16.msra.mxu1 %v2479_v29  ;;  %v753_v28 = vld [vmem:[%s3032_s8 + $0x3f8] sm:$0xff]  ;;  %v2417_v29 = vcombine.low %v728_v17, %v736_v18 }
 0x109   : > { %2016 = vmatprep.subr.bf16.mxu0 %v3110_v7  ;;  %2057 = vmatprep.subr.bf16.mxu1 %v3119_v11  ;;  %v2338_v7 = vcombine.high %v648_v37, %v656_v38  ;;  %v664_v11 = vld [vmem:[%s3032_s8 + $0x130] sm:$0xff]  ;;  %v2436_v32 = vcombine.high %v745_v27, %v753_v28 }
 0x10a   : > { %v2354_v47 = vcombine.high %v664_v11, %v672_v44  ;;  %v2353_v56 = vcombine.low %v664_v11, %v672_v44  ;;  %v785_v11 = vld [vmem:[%s3032_s8 + $0x4f8] sm:$0xff] }
 0x10c   : > { %2017 = vmatpush1.bf16.msra.mxu0 %v3113_v8  ;;  %2058 = vmatpush1.bf16.msra.mxu1 %v3122_v12  ;;  %v2337_v8 = vcombine.low %v648_v37, %v656_v38  ;;  %v2339_v12 = vcombine.low %v649_v39, %v657_v40  ;;  %v769_v37 = vld [vmem:[%s3032_s8 + $0x478] sm:$0xff]  ;;  %v2433_v38 = vcombine.low %v744_v25, %v752_v26  ;;  %v2163_v26 = vld [vmem:[%s3300_s15 + $0x28] sm:$0xff] }
 0x10d   : > { %2076 = vmatprep.subr.bf16.mxu0 %v2322_v35  ;;  %2117 = vmatprep.subr.bf16.mxu1 %v2324_v36  ;;  %v768_v35 = vld [vmem:[%s3032_s8 + $0x470] sm:$0xff]  ;;  %v761_v36 = vld [vmem:[%s3032_s8 + $0x438] sm:$0xff]  ;;  %v2435_v39 = vcombine.low %v745_v27, %v753_v28 }
 0x10e   : > { %v2450_v40 = vcombine.high %v760_v33, %v768_v35  ;;  %v2449_v44 = vcombine.low %v760_v33, %v768_v35  ;;  %v2451_v45 = vcombine.low %v761_v36, %v769_v37 }
 0x10f   : > { %2027 = vmatmul.mubr.bf16.vlgmr.msra.gmra.mrb[8].mxu0 %v3101_v55  ;;  %2068 = vmatmul.mubr.bf16.vlgmr.msra.gmra.mrb[8].mxu1 %v3101_v55 }
 0x110   : > { %2077 = vmatpush1.bf16.msra.mxu0 %v2321_v41  ;;  %2118 = vmatpush1.bf16.msra.mxu1 %v2323_v42  ;;  %v2452_v41 = vcombine.high %v761_v36, %v769_v37  ;;  %v776_v42 = vld [vmem:[%s3032_s8 + $0x4b0] sm:$0xff] }
 0x111   : > { %2078 = vmatprep.subr.bf16.mxu0 %v2338_v7  ;;  %2119 = vmatprep.subr.bf16.mxu1 %v2340_v43  ;;  %v784_v7 = vld [vmem:[%s3032_s8 + $0x4f0] sm:$0xff]  ;;  %v777_v43 = vld [vmem:[%s3032_s8 + $0x4b8] sm:$0xff] }
 0x112   : > { %2507 = vmatprep.mubr.msk.bf16.mxu0 %vm1774_vm0, %v3026_v1  ;;  %2508 = vmatprep.mubr.msk.bf16.mxu1 %vm1774_vm0, %v3026_v1  ;;  %v2371_v1 = vcombine.low %v681_v51, %v689_v54  ;;  %v2466_v46 = vcombine.high %v776_v42, %v784_v7  ;;  %v2465_v50 = vcombine.low %v776_v42, %v784_v7 }
 0x113   : > { %v2467_v51 = vcombine.low %v777_v43, %v785_v11 }
 0x114   : > { %2079 = vmatpush1.bf16.msra.mxu0 %v2337_v8  ;;  %2120 = vmatpush1.bf16.msra.mxu1 %v2339_v12  ;;  %v2468_v8 = vcombine.high %v777_v43, %v785_v11  ;;  %v792_v12 = vld [vmem:[%s3032_s8 + $0x530] sm:$0xff] }
 0x115   : > { %2080 = vmatprep.subr.bf16.mxu0 %v2354_v47  ;;  %2121 = vmatprep.subr.bf16.mxu1 %v2356_v48  ;;  %v800_v47 = vld [vmem:[%s3032_s8 + $0x570] sm:$0xff]  ;;  %v793_v48 = vld [vmem:[%s3032_s8 + $0x538] sm:$0xff] }
 0x116   : > { %v2482_v54 = vcombine.high %v792_v12, %v800_v47 }
 0x118   : > { %2081 = vmatpush1.bf16.msra.mxu0 %v2353_v56  ;;  %2122 = vmatpush1.bf16.msra.mxu1 %v2355_v59  ;;  %v2484_v56 = vcombine.high %v793_v48, %v801_v49  ;;  %v2481_v59 = vcombine.low %v792_v12, %v800_v47  ;;  %v2167_v47 = vld [vmem:[%s3300_s15 + $0x48] sm:$0xff] }
 0x119   : > { %2082 = vmatprep.subr.bf16.mxu0 %v2370_v60  ;;  %2123 = vmatprep.subr.bf16.mxu1 %v2372_v61  ;;  %v2483_v60 = vcombine.low %v793_v48, %v801_v49  ;;  %v2160_v61 = vld [vmem:[%s3300_s15 + $0x10] sm:$0xff] }
 0x11c   : > { %2083 = vmatpush1.bf16.msra.mxu0 %v2369_v4  ;;  %2124 = vmatpush1.bf16.msra.mxu1 %v2371_v1  ;;  %v2161_v1 = vld [vmem:[%s3300_s15 + $0x18] sm:$0xff] }
 0x11d   : > { %2084 = vmatprep.subr.bf16.mxu0 %v2386_v0  ;;  %2125 = vmatprep.subr.bf16.mxu1 %v2388_v5 }
 0x120   : > { %2085 = vmatpush1.bf16.msra.mxu0 %v2385_v13  ;;  %2126 = vmatpush1.bf16.msra.mxu1 %v2387_v14 }
 0x121   : > { %2086 = vmatprep.subr.bf16.mxu0 %v2402_v15  ;;  %2127 = vmatprep.subr.bf16.mxu1 %v2404_v16 }
 0x124   : > { %2087 = vmatpush1.bf16.msra.mxu0 %v2401_v21  ;;  %2128 = vmatpush1.bf16.msra.mxu1 %v2403_v22  ;;  %v2162_v21 = vld [vmem:[%s3300_s15 + $0x20] sm:$0xff] }
 0x125   : > { %2088 = vmatprep.subr.bf16.mxu0 %v2418_v23  ;;  %2129 = vmatprep.subr.bf16.mxu1 %v2420_v24  ;;  %v2164_v24 = vld [vmem:[%s3300_s15 + $0x30] sm:$0xff] }
 0x128   : > { %2089 = vmatpush1.bf16.msra.mxu0 %v2417_v29  ;;  %2130 = vmatpush1.bf16.msra.mxu1 %v2419_v30  ;;  %v2165_v30 = vld [vmem:[%s3300_s15 + $0x38] sm:$0xff] }
 0x129   : > { %2090 = vmatprep.subr.bf16.mxu0 %v2434_v31  ;;  %2131 = vmatprep.subr.bf16.mxu1 %v2436_v32 }
 0x12c   : > { %2091 = vmatpush1.bf16.msra.mxu0 %v2433_v38  ;;  %2132 = vmatpush1.bf16.msra.mxu1 %v2435_v39 }
 0x12d   : > { %2092 = vmatprep.subr.bf16.mxu0 %v2450_v40  ;;  %2133 = vmatprep.subr.bf16.mxu1 %v2452_v41 }
 0x130   : > { %2093 = vmatpush1.bf16.msra.mxu0 %v2449_v44  ;;  %2134 = vmatpush1.bf16.msra.mxu1 %v2451_v45  ;;  %v2166_v44 = vld [vmem:[%s3300_s15 + $0x40] sm:$0xff] }
 0x131   : > { %2094 = vmatprep.subr.bf16.mxu0 %v2466_v46  ;;  %2135 = vmatprep.subr.bf16.mxu1 %v2468_v8  ;;  %v2168_v8 = vld [vmem:[%s3300_s15 + $0x50] sm:$0xff] }
 0x134   : > { %2095 = vmatpush1.bf16.msra.mxu0 %v2465_v50  ;;  %2136 = vmatpush1.bf16.msra.mxu1 %v2467_v51  ;;  %v2169_v51 = vld [vmem:[%s3300_s15 + $0x58] sm:$0xff] }
 0x135   : > { %2096 = vmatprep.subr.bf16.mxu0 %v2482_v54  ;;  %2137 = vmatprep.subr.bf16.mxu1 %v2484_v56 }
 0x138   : > { %2097 = vmatpush1.bf16.msra.mxu0 %v2481_v59  ;;  %2138 = vmatpush1.bf16.msra.mxu1 %v2483_v60 }
 0x139   : > { %2098 = vmatprep.subr.bf16.mxu0 %v3148_v52  ;;  %2139 = vmatprep.subr.bf16.mxu1 %v3156_v57  ;;  %v3302_v52 = vpop.permute.xlu0 %821  ;;  %v2158_v57 = vld [vmem:[%s3300_s15] sm:$0xff] }
 0x13c   : > { %2099 = vmatpush1.bf16.msra.mxu0 %v3151_v53  ;;  %2140 = vmatpush1.bf16.msra.mxu1 %v3159_v58 }
 0x13f   : > { %2109 = vmatmul.mubr.bf16.vlgmr.msra.gmra.mrb[12].mxu0 %v3101_v55  ;;  %2150 = vmatmul.mubr.bf16.vlgmr.msra.gmra.mrb[12].mxu1 %v3101_v55 }
 0x182   : > { %v1864_v53 = vpop.f32.mrb[0].mxu0  ;;  %v1905_v58 = vpop.f32.mrb[0].mxu1 }
 0x183   : > { %v1865_v55 = vadd.f32 %v1864_v53, %v3302_v52  ;;  %v1866_v62 = vpop.f32.mrb[1].mxu0  ;;  %v1906_v2 = vadd.f32 %v1905_v58, %v3302_v52  ;;  %v1907_v4 = vpop.f32.mrb[1].mxu1 }
 0x184   : > { %v1867_v3 = vadd.f32 %v1866_v62, %v3302_v52  ;;  %v1868_v0 = vpop.f32.mrb[2].mxu0  ;;  %v1908_v34 = vadd.f32 %v1907_v4, %v3302_v52  ;;  %v1909_v6 = vpop.f32.mrb[2].mxu1 }
 0x185   : > { %v2174_v5 = vadd.f32 %v2158_v57, %v1865_v55  ;;  %v1869_v9 = vpop.f32.mrb[3].mxu0  ;;  %v2176_v10 = vadd.f32 %v2160_v61, %v1906_v2  ;;  %v1910_v14 = vpop.f32.mrb[3].mxu1 }
 0x186   : > { %v2175_v13 = vadd.f32 %v2159_v63, %v1867_v3  ;;  %v2177_v16 = vadd.f32 %v2161_v1, %v1908_v34  ;;  %v2170_v1 = vld [vmem:[%s3300_s15 + $0x60] sm:$0xff]  ;;  %v2172_v34 = vld [vmem:[%s3300_s15 + $0x70] sm:$0xff]  ;;  %v2171_v9 = vld [vmem:[%s3300_s15 + $0x68] sm:$0xff] }
 0x187   : > { %v2190_v15 = vmax.f32 %v2174_v5, 0.0  ;;  %v2192_v17 = vmax.f32 %v2176_v10, 0.0 }
 0x188   : > { %v2191_v18 = vmax.f32 %v2175_v13, 0.0  ;;  %v2193_v19 = vmax.f32 %v2177_v16, 0.0 }
 0x189   : > { %2206 = vst [vmem:[%s3315_s20] sm:$0xff] %v2190_v15  ;;  %2208 = vst [vmem:[%s3315_s20 + $0x10] sm:$0xff] %v2192_v17  ;;  %v2173_v15 = vld [vmem:[%s3300_s15 + $0x78] sm:$0xff] }
 0x18a   : > { %2207 = vst [vmem:[%s3315_s20 + $0x8] sm:$0xff] %v2191_v18  ;;  %2209 = vst [vmem:[%s3315_s20 + $0x18] sm:$0xff] %v2193_v19 }
 0x1b2   : > { %v1946_v20 = vpop.f32.mrb[4].mxu0  ;;  %v1987_v23 = vpop.f32.mrb[4].mxu1 }
 0x1b3   : > { %v1947_v22 = vadd.f32 %v1946_v20, %v3302_v52  ;;  %v1948_v25 = vpop.f32.mrb[5].mxu0  ;;  %v1988_v27 = vadd.f32 %v1987_v23, %v3302_v52  ;;  %v1989_v29 = vpop.f32.mrb[5].mxu1 }
 0x1b4   : > { %v1949_v28 = vadd.f32 %v1948_v25, %v3302_v52  ;;  %v1950_v31 = vpop.f32.mrb[6].mxu0  ;;  %v1990_v33 = vadd.f32 %v1989_v29, %v3302_v52  ;;  %v1991_v35 = vpop.f32.mrb[6].mxu1 }
 0x1b5   : > { %v2178_v32 = vadd.f32 %v2162_v21, %v1947_v22  ;;  %v1951_v36 = vpop.f32.mrb[7].mxu0  ;;  %v2180_v37 = vadd.f32 %v2164_v24, %v1988_v27  ;;  %v1992_v39 = vpop.f32.mrb[7].mxu1 }
 0x1b6   : > { %v2179_v38 = vadd.f32 %v2163_v26, %v1949_v28  ;;  %v2181_v41 = vadd.f32 %v2165_v30, %v1990_v33 }
 0x1b7   : > { %v2194_v40 = vmax.f32 %v2178_v32, 0.0  ;;  %v2196_v42 = vmax.f32 %v2180_v37, 0.0 }
 0x1b8   : > { %v2195_v7 = vmax.f32 %v2179_v38, 0.0  ;;  %v2197_v43 = vmax.f32 %v2181_v41, 0.0 }
 0x1b9   : > { %2210 = vst [vmem:[%s3315_s20 + $0x20] sm:$0xff] %v2194_v40  ;;  %2212 = vst [vmem:[%s3315_s20 + $0x30] sm:$0xff] %v2196_v42 }
 0x1ba   : > { %2211 = vst [vmem:[%s3315_s20 + $0x28] sm:$0xff] %v2195_v7  ;;  %2213 = vst [vmem:[%s3315_s20 + $0x38] sm:$0xff] %v2197_v43 }
 0x1e2   : > { %v2028_v11 = vpop.f32.mrb[8].mxu0  ;;  %v2069_v46 = vpop.f32.mrb[8].mxu1 }
 0x1e3   : > { %v2029_v45 = vadd.f32 %v2028_v11, %v3302_v52  ;;  %v2030_v12 = vpop.f32.mrb[9].mxu0  ;;  %v2070_v48 = vadd.f32 %v2069_v46, %v3302_v52  ;;  %v2071_v50 = vpop.f32.mrb[9].mxu1 }
 0x1e4   : > { %v2031_v49 = vadd.f32 %v2030_v12, %v3302_v52  ;;  %v2032_v54 = vpop.f32.mrb[10].mxu0  ;;  %v2072_v59 = vadd.f32 %v2071_v50, %v3302_v52  ;;  %v2073_v60 = vpop.f32.mrb[10].mxu1 }
 0x1e5   : > { %v2182_v56 = vadd.f32 %v2166_v44, %v2029_v45  ;;  %v2033_v53 = vpop.f32.mrb[11].mxu0  ;;  %v2184_v57 = vadd.f32 %v2168_v8, %v2070_v48  ;;  %v2074_v55 = vpop.f32.mrb[11].mxu1 }
 0x1e6   : > { %v2183_v58 = vadd.f32 %v2167_v47, %v2031_v49  ;;  %v2185_v62 = vadd.f32 %v2169_v51, %v2072_v59 }
 0x1e7   : > { %v2198_v61 = vmax.f32 %v2182_v56, 0.0  ;;  %v2200_v63 = vmax.f32 %v2184_v57, 0.0 }
 0x1e8   : > { %v2199_v2 = vmax.f32 %v2183_v58, 0.0  ;;  %v2201_v3 = vmax.f32 %v2185_v62, 0.0 }
 0x1e9   : > { %2214 = vst [vmem:[%s3315_s20 + $0x40] sm:$0xff] %v2198_v61  ;;  %2216 = vst [vmem:[%s3315_s20 + $0x50] sm:$0xff] %v2200_v63 }
 0x1ea   : > { %2215 = vst [vmem:[%s3315_s20 + $0x48] sm:$0xff] %v2199_v2  ;;  %2217 = vst [vmem:[%s3315_s20 + $0x58] sm:$0xff] %v2201_v3 }
 0x212   : > { %v2110_v4 = vpop.f32.mrb[12].mxu0  ;;  %v2151_v5 = vpop.f32.mrb[12].mxu1 }
 0x213   : > { %v2111_v0 = vadd.f32 %v2110_v4, %v3302_v52  ;;  %v2112_v6 = vpop.f32.mrb[13].mxu0  ;;  %v2152_v10 = vadd.f32 %v2151_v5, %v3302_v52  ;;  %v2153_v14 = vpop.f32.mrb[13].mxu1 }
 0x214   : > { %v2113_v13 = vadd.f32 %v2112_v6, %v3302_v52  ;;  %v2114_v16 = vpop.f32.mrb[14].mxu0  ;;  %v2154_v18 = vadd.f32 %v2153_v14, %v3302_v52  ;;  %v2155_v19 = vpop.f32.mrb[14].mxu1 }
 0x215   : > { %v2186_v17 = vadd.f32 %v2170_v1, %v2111_v0  ;;  %v2115_v20 = vpop.f32.mrb[15].mxu0  ;;  %v2188_v21 = vadd.f32 %v2172_v34, %v2152_v10  ;;  %v2156_v23 = vpop.f32.mrb[15].mxu1 }
 0x216   : > { %v2187_v22 = vadd.f32 %v2171_v9, %v2113_v13  ;;  %v2189_v25 = vadd.f32 %v2173_v15, %v2154_v18 }
 0x217   : > { %v2202_v24 = vmax.f32 %v2186_v17, 0.0  ;;  %v2204_v26 = vmax.f32 %v2188_v21, 0.0 }
 0x218   : > { %v2203_v27 = vmax.f32 %v2187_v22, 0.0  ;;  %v2205_v28 = vmax.f32 %v2189_v25, 0.0 }
 0x219   : > { %2218 = vst [vmem:[%s3315_s20 + $0x60] sm:$0xff] %v2202_v24  ;;  %2220 = vst [vmem:[%s3315_s20 + $0x70] sm:$0xff] %v2204_v26 }
 0x21a   : > { %2219 = vst [vmem:[%s3315_s20 + $0x68] sm:$0xff] %v2203_v27  ;;  %2221 = vst [vmem:[%s3315_s20 + $0x78] sm:$0xff] %v2205_v28 }
 0x21b PF: > { %p11_p9 = scmp.ge.s32.totalorder %s2611_s19, 8   ;;  %s3372_s15 = smov %s2561_s16 }
 0x21c   : > { %s3373_s16 = smov %s2620_s22  ;;  %s3374_s17 = smov %s2611_s19 }
 0x21d   :  { %13 = sbr.rel (!%p11_p9) target bundleno = 2 (0x2), region = 97 }

// kernel: _ob_path_batched.17
= control target key start
LH: loop header
LB: loop body
LE: loop exit
PB: predicated region body
PF: predicated region fallthrough
CT: control target
= control target key end

     0   :  { %v3714_v1 = vmov 0   ;;  %vm2164_vm0 = vcmask 523264   ;;  %s4558_s1 = inlined_call_operand.vmem [shape: bf16[4032,128], index: 1, kind: input, shape index: {}]   ;;  %s4559_s0 = inlined_call_operand.vmem [shape: bf16[8,4032], index: 0, kind: input, shape index: {}]   ;;  %s4560_s2 = inlined_call_operand.vmem [shape: f32[8,1], index: 2, kind: input, shape index: {}]   ;;  %s4561_s3 = inlined_call_operand.vmem [shape: f32[8,128], index: 3, kind: output, shape index: {}]  }
   0x1   :  { %v3430_v0 = vld [vmem:[%s4558_s1 + $0x40] sm:$0xff]   ;;  %3429 = vset.pattern.permute.xlu0 %v3714_v1  ;;  %v3434_v5 = vld [vmem:[%s4558_s1 + $0x48] sm:$0xff]   ;;  %v3438_v9 = vld [vmem:[%s4558_s1 + $0x50] sm:$0xff]  }
   0x2   :  { %v3431_v2 = vld [vmem:[%s4558_s1 + $0xc0] sm:$0xff]   ;;  %3098 = vmatprep.subr.bf16.mxu0 %v3430_v0  ;;  %v3435_v6 = vld [vmem:[%s4558_s1 + $0xc8] sm:$0xff]   ;;  %v3439_v10 = vld [vmem:[%s4558_s1 + $0xd0] sm:$0xff]  }
   0x3   :  { %v3432_v3 = vld [vmem:[%s4558_s1] sm:$0xff]   ;;  %3120 = vmatprep.subr.bf16.mxu1 %v3431_v2  ;;  %v3436_v7 = vld [vmem:[%s4558_s1 + $0x8] sm:$0xff]   ;;  %v3440_v11 = vld [vmem:[%s4558_s1 + $0x10] sm:$0xff]  }
   0x4   :  { %v3433_v4 = vld [vmem:[%s4558_s1 + $0x80] sm:$0xff]   ;;  %3099 = vmatpush3.bf16.msra.mxu0 %v3432_v3  ;;  %v3437_v8 = vld [vmem:[%s4558_s1 + $0x88] sm:$0xff]   ;;  %v3441_v12 = vld [vmem:[%s4558_s1 + $0x90] sm:$0xff]  }
   0x5   :  { %3121 = vmatpush3.bf16.msra.mxu1 %v3433_v4  ;;  %3100 = vmatprep.subr.bf16.mxu0 %v3434_v5  ;;  %v3442_v13 = vld [vmem:[%s4558_s1 + $0x58] sm:$0xff]   ;;  %v3446_v17 = vld [vmem:[%s4558_s1 + $0x60] sm:$0xff]   ;;  %v3450_v21 = vld [vmem:[%s4558_s1 + $0x68] sm:$0xff]  }
   0x6   :  { %3122 = vmatprep.subr.bf16.mxu1 %v3435_v6  ;;  %v3443_v14 = vld [vmem:[%s4558_s1 + $0xd8] sm:$0xff]   ;;  %v3447_v18 = vld [vmem:[%s4558_s1 + $0xe0] sm:$0xff]   ;;  %v3451_v22 = vld [vmem:[%s4558_s1 + $0xe8] sm:$0xff]  }
   0x7   :  { %v3444_v15 = vld [vmem:[%s4558_s1 + $0x18] sm:$0xff]   ;;  %v3448_v19 = vld [vmem:[%s4558_s1 + $0x20] sm:$0xff]   ;;  %v3452_v23 = vld [vmem:[%s4558_s1 + $0x28] sm:$0xff]  }
   0x8   :  { %3101 = vmatpush3.bf16.msra.mxu0 %v3436_v7  ;;  %v3445_v16 = vld [vmem:[%s4558_s1 + $0x98] sm:$0xff]   ;;  %v3449_v20 = vld [vmem:[%s4558_s1 + $0xa0] sm:$0xff]   ;;  %v3453_v24 = vld [vmem:[%s4558_s1 + $0xa8] sm:$0xff]  }
   0x9   :  { %3123 = vmatpush3.bf16.msra.mxu1 %v3437_v8  ;;  %3102 = vmatprep.subr.bf16.mxu0 %v3438_v9  ;;  %v3454_v25 = vld [vmem:[%s4558_s1 + $0x70] sm:$0xff]   ;;  %v3458_v29 = vld [vmem:[%s4558_s1 + $0x78] sm:$0xff]   ;;  %v15_v33 = vld [vmem:[%s4559_s0] sm:$0xff] }
   0xa   :  { %3124 = vmatprep.subr.bf16.mxu1 %v3439_v10  ;;  %v3455_v26 = vld [vmem:[%s4558_s1 + $0xf0] sm:$0xff]   ;;  %v3459_v30 = vld [vmem:[%s4558_s1 + $0xf8] sm:$0xff]   ;;  %v16_v34 = vld [vmem:[%s4559_s0 + $0x8] sm:$0xff]  ;;  %v2813_v35 = vcombine.low %v15_v33, %v15_v33  ;;  %v2814_v36 = vcombine.high %v15_v33, %v15_v33 }
   0xb   :  { %v3456_v27 = vld [vmem:[%s4558_s1 + $0x30] sm:$0xff]   ;;  %v3460_v31 = vld [vmem:[%s4558_s1 + $0x38] sm:$0xff]   ;;  %v2815_v37 = vcombine.low %v16_v34, %v16_v34  ;;  %v2816_v38 = vcombine.high %v16_v34, %v16_v34  ;;  %v3466_v39 = vld [vmem:[%s4558_s1 + $0x140] sm:$0xff]  }
   0xc   :  { %3103 = vmatpush3.bf16.msra.mxu0 %v3440_v11  ;;  %v3457_v28 = vld [vmem:[%s4558_s1 + $0xb0] sm:$0xff]   ;;  %v3461_v32 = vld [vmem:[%s4558_s1 + $0xb8] sm:$0xff]   ;;  %v3467_v40 = vld [vmem:[%s4558_s1 + $0x1c0] sm:$0xff]   ;;  %2200 = vmatprep.mubr.bf16.mxu0 %v2814_v36 }
   0xd   :  { %3125 = vmatpush3.bf16.msra.mxu1 %v3441_v12  ;;  %3104 = vmatprep.subr.bf16.mxu0 %v3442_v13  ;;  %v3468_v41 = vld [vmem:[%s4558_s1 + $0x100] sm:$0xff]   ;;  %v3470_v43 = vld [vmem:[%s4558_s1 + $0x148] sm:$0xff]   ;;  %v3474_v47 = vld [vmem:[%s4558_s1 + $0x150] sm:$0xff]  }
   0xe   :  { %3126 = vmatprep.subr.bf16.mxu1 %v3443_v14  ;;  %2240 = vmatprep.mubr.bf16.mxu1 %v2816_v38  ;;  %v3469_v42 = vld [vmem:[%s4558_s1 + $0x180] sm:$0xff]   ;;  %v3471_v44 = vld [vmem:[%s4558_s1 + $0x1c8] sm:$0xff]   ;;  %v3475_v48 = vld [vmem:[%s4558_s1 + $0x1d0] sm:$0xff]  }
   0xf   :  { %v3472_v45 = vld [vmem:[%s4558_s1 + $0x108] sm:$0xff]   ;;  %v3476_v49 = vld [vmem:[%s4558_s1 + $0x110] sm:$0xff]   ;;  %v3478_v51 = vld [vmem:[%s4558_s1 + $0x158] sm:$0xff]  }
  0x10   :  { %3105 = vmatpush3.bf16.msra.mxu0 %v3444_v15  ;;  %v3473_v46 = vld [vmem:[%s4558_s1 + $0x188] sm:$0xff]   ;;  %v3477_v50 = vld [vmem:[%s4558_s1 + $0x190] sm:$0xff]   ;;  %v3479_v52 = vld [vmem:[%s4558_s1 + $0x1d8] sm:$0xff]  }
  0x11   :  { %3127 = vmatpush3.bf16.msra.mxu1 %v3445_v16  ;;  %3106 = vmatprep.subr.bf16.mxu0 %v3446_v17  ;;  %v3480_v53 = vld [vmem:[%s4558_s1 + $0x118] sm:$0xff]   ;;  %v3482_v55 = vld [vmem:[%s4558_s1 + $0x160] sm:$0xff]   ;;  %v3486_v59 = vld [vmem:[%s4558_s1 + $0x168] sm:$0xff]  }
  0x12   :  { %3128 = vmatprep.subr.bf16.mxu1 %v3447_v18  ;;  %v3481_v54 = vld [vmem:[%s4558_s1 + $0x198] sm:$0xff]   ;;  %v3483_v56 = vld [vmem:[%s4558_s1 + $0x1e0] sm:$0xff]   ;;  %v3487_v60 = vld [vmem:[%s4558_s1 + $0x1e8] sm:$0xff]  }
  0x13   :  { %v3484_v57 = vld [vmem:[%s4558_s1 + $0x120] sm:$0xff]   ;;  %v3488_v61 = vld [vmem:[%s4558_s1 + $0x128] sm:$0xff]   ;;  %v3490_v63 = vld [vmem:[%s4558_s1 + $0x170] sm:$0xff]  }
  0x14   :  { %3107 = vmatpush3.bf16.msra.mxu0 %v3448_v19  ;;  %v3485_v58 = vld [vmem:[%s4558_s1 + $0x1a0] sm:$0xff]   ;;  %v3489_v62 = vld [vmem:[%s4558_s1 + $0x1a8] sm:$0xff]   ;;  %v3491_v0 = vld [vmem:[%s4558_s1 + $0x1f0] sm:$0xff]  }
  0x15   :  { %3129 = vmatpush3.bf16.msra.mxu1 %v3449_v20  ;;  %3108 = vmatprep.subr.bf16.mxu0 %v3450_v21  ;;  %v3492_v2 = vld [vmem:[%s4558_s1 + $0x130] sm:$0xff]   ;;  %v3494_v4 = vld [vmem:[%s4558_s1 + $0x178] sm:$0xff]   ;;  %v3502_v14 = vld [vmem:[%s4558_s1 + $0x240] sm:$0xff]  }
  0x16   :  { %3130 = vmatprep.subr.bf16.mxu1 %v3451_v22  ;;  %v3493_v3 = vld [vmem:[%s4558_s1 + $0x1b0] sm:$0xff]   ;;  %v3495_v5 = vld [vmem:[%s4558_s1 + $0x1f8] sm:$0xff]   ;;  %v3503_v15 = vld [vmem:[%s4558_s1 + $0x2c0] sm:$0xff]  }
  0x17   :  { %v3496_v6 = vld [vmem:[%s4558_s1 + $0x138] sm:$0xff]   ;;  %v17_v8 = vld [vmem:[%s4559_s0 + $0x10] sm:$0xff]  ;;  %v3504_v16 = vld [vmem:[%s4558_s1 + $0x200] sm:$0xff]  }
  0x18   :  { %3109 = vmatpush3.bf16.msra.mxu0 %v3452_v23  ;;  %v3497_v7 = vld [vmem:[%s4558_s1 + $0x1b8] sm:$0xff]   ;;  %v2817_v9 = vcombine.low %v17_v8, %v17_v8  ;;  %v2818_v10 = vcombine.high %v17_v8, %v17_v8  ;;  %v3505_v17 = vld [vmem:[%s4558_s1 + $0x280] sm:$0xff]   ;;  %v3506_v18 = vld [vmem:[%s4558_s1 + $0x248] sm:$0xff]  }
  0x19   :  { %3131 = vmatpush3.bf16.msra.mxu1 %v3453_v24  ;;  %3110 = vmatprep.subr.bf16.mxu0 %v3454_v25  ;;  %v18_v11 = vld [vmem:[%s4559_s0 + $0x18] sm:$0xff]  ;;  %v3507_v19 = vld [vmem:[%s4558_s1 + $0x2c8] sm:$0xff]   ;;  %v3510_v22 = vld [vmem:[%s4558_s1 + $0x250] sm:$0xff]  }
  0x1a   :  { %3132 = vmatprep.subr.bf16.mxu1 %v3455_v26  ;;  %v2819_v12 = vcombine.low %v18_v11, %v18_v11  ;;  %v2820_v13 = vcombine.high %v18_v11, %v18_v11  ;;  %v3508_v20 = vld [vmem:[%s4558_s1 + $0x208] sm:$0xff]   ;;  %v3511_v23 = vld [vmem:[%s4558_s1 + $0x2d0] sm:$0xff]   ;;  %v3514_v26 = vld [vmem:[%s4558_s1 + $0x258] sm:$0xff]  }
  0x1b   :  { %v3509_v21 = vld [vmem:[%s4558_s1 + $0x288] sm:$0xff]   ;;  %v3512_v24 = vld [vmem:[%s4558_s1 + $0x210] sm:$0xff]   ;;  %v3521_v33 = vld [vmem:[%s4558_s1 + $0x2a0] sm:$0xff]  }
  0x1c   :  { %3111 = vmatpush3.bf16.msra.mxu0 %v3456_v27  ;;  %v3513_v25 = vld [vmem:[%s4558_s1 + $0x290] sm:$0xff]   ;;  %v3515_v27 = vld [vmem:[%s4558_s1 + $0x2d8] sm:$0xff]   ;;  %v3522_v34 = vld [vmem:[%s4558_s1 + $0x268] sm:$0xff]  }
  0x1d   :  { %3133 = vmatpush3.bf16.msra.mxu1 %v3457_v28  ;;  %3112 = vmatprep.subr.bf16.mxu0 %v3458_v29  ;;  %v3516_v28 = vld [vmem:[%s4558_s1 + $0x218] sm:$0xff]   ;;  %v3524_v36 = vld [vmem:[%s4558_s1 + $0x228] sm:$0xff]   ;;  %v3526_v38 = vld [vmem:[%s4558_s1 + $0x270] sm:$0xff]  }
  0x1e   :  { %3134 = vmatprep.subr.bf16.mxu1 %v3459_v30  ;;  %v3517_v29 = vld [vmem:[%s4558_s1 + $0x298] sm:$0xff]   ;;  %v3518_v30 = vld [vmem:[%s4558_s1 + $0x260] sm:$0xff]   ;;  %v3560_v11 = vld [vmem:[%s4558_s1 + $0x328] sm:$0xff]  }
  0x1f   :  { %v3557_v8 = vld [vmem:[%s4558_s1 + $0x3a0] sm:$0xff]  }
  0x20   :  { %3113 = vmatpush3.bf16.msra.mxu0 %v3460_v31  ;;  %v3519_v31 = vld [vmem:[%s4558_s1 + $0x2e0] sm:$0xff]  }
  0x21   :  { %3135 = vmatpush3.bf16.msra.mxu1 %v3461_v32  ;;  %3142 = vmatprep.subr.bf16.mxu0 %v3466_v39  ;;  %v3520_v32 = vld [vmem:[%s4558_s1 + $0x220] sm:$0xff]   ;;  %v3527_v39 = vld [vmem:[%s4558_s1 + $0x2f0] sm:$0xff]  }
  0x22   :  { %3164 = vmatprep.subr.bf16.mxu1 %v3467_v40  ;;  %v3528_v40 = vld [vmem:[%s4558_s1 + $0x230] sm:$0xff]  }
  0x23   :  { %2201 = vmatmul.mubr.bf16.vlgmr.msra.gmra.mrb[0].mxu0 %v2813_v35  ;;  %v3523_v35 = vld [vmem:[%s4558_s1 + $0x2e8] sm:$0xff]  }
  0x24   :  { %2241 = vmatmul.mubr.bf16.vlgmr.msra.gmra.mrb[0].mxu1 %v2815_v37  ;;  %3143 = vmatpush3.bf16.msra.mxu0 %v3468_v41  ;;  %v3525_v37 = vld [vmem:[%s4558_s1 + $0x2a8] sm:$0xff]   ;;  %v3529_v41 = vld [vmem:[%s4558_s1 + $0x2b0] sm:$0xff]  }
  0x25   :  { %3165 = vmatpush3.bf16.msra.mxu1 %v3469_v42  ;;  %3144 = vmatprep.subr.bf16.mxu0 %v3470_v43  ;;  %v3530_v42 = vld [vmem:[%s4558_s1 + $0x278] sm:$0xff]  }
  0x26   :  { %3166 = vmatprep.subr.bf16.mxu1 %v3471_v44  ;;  %2280 = vmatprep.mubr.bf16.mxu0 %v2818_v10  ;;  %v3531_v43 = vld [vmem:[%s4558_s1 + $0x2f8] sm:$0xff]   ;;  %v3559_v10 = vld [vmem:[%s4558_s1 + $0x3e8] sm:$0xff]  }
  0x27   :  { %2320 = vmatprep.mubr.bf16.mxu1 %v2820_v13  ;;  %v3532_v44 = vld [vmem:[%s4558_s1 + $0x238] sm:$0xff]   ;;  %v535_v13 = vld [vmem:[%s4560_s2] sm:$0xff] }
  0x28   :  { %3145 = vmatpush3.bf16.msra.mxu0 %v3472_v45  ;;  %v3533_v45 = vld [vmem:[%s4558_s1 + $0x2b8] sm:$0xff]   ;;  %538 = vperm.xlu0 %3429, %v535_v13   ;;  %v3620_v13 = vld [vmem:[%s4558_s1 + $0x510] sm:$0xff]  }
  0x29   :  { %3167 = vmatpush3.bf16.msra.mxu1 %v3473_v46  ;;  %3146 = vmatprep.subr.bf16.mxu0 %v3474_v47  ;;  %v19_v46 = vld [vmem:[%s4559_s0 + $0x20] sm:$0xff]  ;;  %v20_v47 = vld [vmem:[%s4559_s0 + $0x28] sm:$0xff] }
  0x2a   :  { %3168 = vmatprep.subr.bf16.mxu1 %v3475_v48  ;;  %v2821_v48 = vcombine.low %v19_v46, %v19_v46 }
  0x2c   :  { %3147 = vmatpush3.bf16.msra.mxu0 %v3476_v49  ;;  %v2822_v49 = vcombine.high %v19_v46, %v19_v46  ;;  %v3592_v46 = vld [vmem:[%s4558_s1 + $0x420] sm:$0xff]  }
  0x2d   :  { %3169 = vmatpush3.bf16.msra.mxu1 %v3477_v50  ;;  %3148 = vmatprep.subr.bf16.mxu0 %v3478_v51  ;;  %v2823_v50 = vcombine.low %v20_v47, %v20_v47  ;;  %v2824_v51 = vcombine.high %v20_v47, %v20_v47  ;;  %v3593_v47 = vld [vmem:[%s4558_s1 + $0x4a0] sm:$0xff]  }
  0x2e   :  { %3170 = vmatprep.subr.bf16.mxu1 %v3479_v52  ;;  %v3538_v52 = vld [vmem:[%s4558_s1 + $0x340] sm:$0xff]  }
  0x30   :  { %3149 = vmatpush3.bf16.msra.mxu0 %v3480_v53  ;;  %v3539_v53 = vld [vmem:[%s4558_s1 + $0x3c0] sm:$0xff]  }
  0x31   :  { %3171 = vmatpush3.bf16.msra.mxu1 %v3481_v54  ;;  %3150 = vmatprep.subr.bf16.mxu0 %v3482_v55  ;;  %v3540_v54 = vld [vmem:[%s4558_s1 + $0x300] sm:$0xff]  }
  0x32   :  { %3172 = vmatprep.subr.bf16.mxu1 %v3483_v56  ;;  %v3541_v55 = vld [vmem:[%s4558_s1 + $0x380] sm:$0xff]   ;;  %v3542_v56 = vld [vmem:[%s4558_s1 + $0x348] sm:$0xff]  }
  0x34   :  { %3151 = vmatpush3.bf16.msra.mxu0 %v3484_v57  ;;  %v3543_v57 = vld [vmem:[%s4558_s1 + $0x3c8] sm:$0xff]  }
  0x35   :  { %3173 = vmatpush3.bf16.msra.mxu1 %v3485_v58  ;;  %3152 = vmatprep.subr.bf16.mxu0 %v3486_v59  ;;  %v3544_v58 = vld [vmem:[%s4558_s1 + $0x308] sm:$0xff]  }
  0x36   :  { %3174 = vmatprep.subr.bf16.mxu1 %v3487_v60  ;;  %v3545_v59 = vld [vmem:[%s4558_s1 + $0x388] sm:$0xff]   ;;  %v3546_v60 = vld [vmem:[%s4558_s1 + $0x350] sm:$0xff]  }
  0x38   :  { %3153 = vmatpush3.bf16.msra.mxu0 %v3488_v61  ;;  %v3547_v61 = vld [vmem:[%s4558_s1 + $0x3d0] sm:$0xff]  }
  0x39   :  { %3175 = vmatpush3.bf16.msra.mxu1 %v3489_v62  ;;  %3154 = vmatprep.subr.bf16.mxu0 %v3490_v63  ;;  %v3548_v62 = vld [vmem:[%s4558_s1 + $0x310] sm:$0xff]  }
  0x3a   :  { %3176 = vmatprep.subr.bf16.mxu1 %v3491_v0  ;;  %v3549_v63 = vld [vmem:[%s4558_s1 + $0x390] sm:$0xff]   ;;  %v3550_v0 = vld [vmem:[%s4558_s1 + $0x358] sm:$0xff]  }
  0x3c   :  { %3155 = vmatpush3.bf16.msra.mxu0 %v3492_v2  ;;  %v3551_v2 = vld [vmem:[%s4558_s1 + $0x3d8] sm:$0xff]  }
  0x3d   :  { %3177 = vmatpush3.bf16.msra.mxu1 %v3493_v3  ;;  %3156 = vmatprep.subr.bf16.mxu0 %v3494_v4  ;;  %v3552_v3 = vld [vmem:[%s4558_s1 + $0x318] sm:$0xff]  }
  0x3e   :  { %3178 = vmatprep.subr.bf16.mxu1 %v3495_v5  ;;  %v3553_v4 = vld [vmem:[%s4558_s1 + $0x398] sm:$0xff]   ;;  %v3554_v5 = vld [vmem:[%s4558_s1 + $0x360] sm:$0xff]  }
  0x40   :  { %3157 = vmatpush3.bf16.msra.mxu0 %v3496_v6  ;;  %v3555_v6 = vld [vmem:[%s4558_s1 + $0x3e0] sm:$0xff]  }
  0x41   :  { %3179 = vmatpush3.bf16.msra.mxu1 %v3497_v7  ;;  %3186 = vmatprep.subr.bf16.mxu0 %v3502_v14  ;;  %v3556_v7 = vld [vmem:[%s4558_s1 + $0x320] sm:$0xff]   ;;  %v3562_v14 = vld [vmem:[%s4558_s1 + $0x370] sm:$0xff]  }
  0x42   :  { %3208 = vmatprep.subr.bf16.mxu1 %v3503_v15  ;;  %v3563_v15 = vld [vmem:[%s4558_s1 + $0x3f0] sm:$0xff]  }
  0x43   :  { %2281 = vmatmul.mubr.bf16.vlgmr.msra.gmra.mrb[4].mxu0 %v2817_v9  ;;  %v3558_v9 = vld [vmem:[%s4558_s1 + $0x368] sm:$0xff]  }
  0x44   :  { %2321 = vmatmul.mubr.bf16.vlgmr.msra.gmra.mrb[4].mxu1 %v2819_v12  ;;  %3187 = vmatpush3.bf16.msra.mxu0 %v3504_v16  ;;  %v3561_v12 = vld [vmem:[%s4558_s1 + $0x3a8] sm:$0xff]   ;;  %v3564_v16 = vld [vmem:[%s4558_s1 + $0x330] sm:$0xff]  }
  0x45   :  { %3209 = vmatpush3.bf16.msra.mxu1 %v3505_v17  ;;  %3188 = vmatprep.subr.bf16.mxu0 %v3506_v18  ;;  %v3565_v17 = vld [vmem:[%s4558_s1 + $0x3b0] sm:$0xff]   ;;  %v3566_v18 = vld [vmem:[%s4558_s1 + $0x378] sm:$0xff]  }
  0x46   :  { %3210 = vmatprep.subr.bf16.mxu1 %v3507_v19  ;;  %2360 = vmatprep.mubr.bf16.mxu0 %v2822_v49  ;;  %v3567_v19 = vld [vmem:[%s4558_s1 + $0x3f8] sm:$0xff]   ;;  %v3595_v49 = vld [vmem:[%s4558_s1 + $0x4e8] sm:$0xff]  }
  0x47   :  { %2400 = vmatprep.mubr.bf16.mxu1 %v2824_v51  ;;  %v3597_v51 = vld [vmem:[%s4558_s1 + $0x4a8] sm:$0xff]  }
  0x48   :  { %3189 = vmatpush3.bf16.msra.mxu0 %v3508_v20  ;;  %v3568_v20 = vld [vmem:[%s4558_s1 + $0x338] sm:$0xff]  }
  0x49   :  { %3211 = vmatpush3.bf16.msra.mxu1 %v3509_v21  ;;  %3190 = vmatprep.subr.bf16.mxu0 %v3510_v22  ;;  %v3569_v21 = vld [vmem:[%s4558_s1 + $0x3b8] sm:$0xff]   ;;  %v21_v22 = vld [vmem:[%s4559_s0 + $0x30] sm:$0xff] }
  0x4a   :  { %3212 = vmatprep.subr.bf16.mxu1 %v3511_v23  ;;  %v22_v23 = vld [vmem:[%s4559_s0 + $0x38] sm:$0xff] }
  0x4c   :  { %3191 = vmatpush3.bf16.msra.mxu0 %v3512_v24  ;;  %v2825_v24 = vcombine.low %v21_v22, %v21_v22 }
  0x4d   :  { %3213 = vmatpush3.bf16.msra.mxu1 %v3513_v25  ;;  %3192 = vmatprep.subr.bf16.mxu0 %v3514_v26  ;;  %v2826_v25 = vcombine.high %v21_v22, %v21_v22  ;;  %v2827_v26 = vcombine.low %v22_v23, %v22_v23  ;;  %v3629_v22 = vld [vmem:[%s4558_s1 + $0x5a0] sm:$0xff]  }
  0x4e   :  { %3214 = vmatprep.subr.bf16.mxu1 %v3515_v27  ;;  %v2828_v27 = vcombine.high %v22_v23, %v22_v23  ;;  %v3630_v23 = vld [vmem:[%s4558_s1 + $0x568] sm:$0xff]  }
  0x50   :  { %3193 = vmatpush3.bf16.msra.mxu0 %v3516_v28  ;;  %v3574_v28 = vld [vmem:[%s4558_s1 + $0x440] sm:$0xff]  }
  0x51   :  { %3215 = vmatpush3.bf16.msra.mxu1 %v3517_v29  ;;  %3194 = vmatprep.subr.bf16.mxu0 %v3518_v30  ;;  %v3575_v29 = vld [vmem:[%s4558_s1 + $0x4c0] sm:$0xff]  }
  0x52   :  { %3216 = vmatprep.subr.bf16.mxu1 %v3519_v31  ;;  %v3576_v30 = vld [vmem:[%s4558_s1 + $0x400] sm:$0xff]  }
  0x53   :  { %v3577_v31 = vld [vmem:[%s4558_s1 + $0x480] sm:$0xff]  }
  0x54   :  { %3195 = vmatpush3.bf16.msra.mxu0 %v3520_v32  ;;  %v3578_v32 = vld [vmem:[%s4558_s1 + $0x448] sm:$0xff]  }
  0x55   :  { %3217 = vmatpush3.bf16.msra.mxu1 %v3521_v33  ;;  %3196 = vmatprep.subr.bf16.mxu0 %v3522_v34  ;;  %v3579_v33 = vld [vmem:[%s4558_s1 + $0x4c8] sm:$0xff]  }
  0x56   :  { %3218 = vmatprep.subr.bf16.mxu1 %v3523_v35  ;;  %v3580_v34 = vld [vmem:[%s4558_s1 + $0x408] sm:$0xff]  }
  0x57   :  { %v3581_v35 = vld [vmem:[%s4558_s1 + $0x488] sm:$0xff]  }
  0x58   :  { %3197 = vmatpush3.bf16.msra.mxu0 %v3524_v36  ;;  %v3582_v36 = vld [vmem:[%s4558_s1 + $0x450] sm:$0xff]  }
  0x59   :  { %3219 = vmatpush3.bf16.msra.mxu1 %v3525_v37  ;;  %3198 = vmatprep.subr.bf16.mxu0 %v3526_v38  ;;  %v3583_v37 = vld [vmem:[%s4558_s1 + $0x4d0] sm:$0xff]  }
  0x5a   :  { %3220 = vmatprep.subr.bf16.mxu1 %v3527_v39  ;;  %v3584_v38 = vld [vmem:[%s4558_s1 + $0x410] sm:$0xff]  }
  0x5b   :  { %v3585_v39 = vld [vmem:[%s4558_s1 + $0x490] sm:$0xff]  }
  0x5c   :  { %3199 = vmatpush3.bf16.msra.mxu0 %v3528_v40  ;;  %v3586_v40 = vld [vmem:[%s4558_s1 + $0x458] sm:$0xff]  }
  0x5d   :  { %3221 = vmatpush3.bf16.msra.mxu1 %v3529_v41  ;;  %3200 = vmatprep.subr.bf16.mxu0 %v3530_v42  ;;  %v3587_v41 = vld [vmem:[%s4558_s1 + $0x4d8] sm:$0xff]  }
  0x5e   :  { %3222 = vmatprep.subr.bf16.mxu1 %v3531_v43  ;;  %v3588_v42 = vld [vmem:[%s4558_s1 + $0x418] sm:$0xff]  }
  0x5f   :  { %v3589_v43 = vld [vmem:[%s4558_s1 + $0x498] sm:$0xff]  }
  0x60   :  { %3201 = vmatpush3.bf16.msra.mxu0 %v3532_v44  ;;  %v3590_v44 = vld [vmem:[%s4558_s1 + $0x460] sm:$0xff]  }
  0x61   :  { %3223 = vmatpush3.bf16.msra.mxu1 %v3533_v45  ;;  %3230 = vmatprep.subr.bf16.mxu0 %v3538_v52  ;;  %v3591_v45 = vld [vmem:[%s4558_s1 + $0x4e0] sm:$0xff]   ;;  %v3598_v52 = vld [vmem:[%s4558_s1 + $0x470] sm:$0xff]  }
  0x62   :  { %3252 = vmatprep.subr.bf16.mxu1 %v3539_v53  ;;  %v3599_v53 = vld [vmem:[%s4558_s1 + $0x4f0] sm:$0xff]  }
  0x63   :  { %2361 = vmatmul.mubr.bf16.vlgmr.msra.gmra.mrb[8].mxu0 %v2821_v48  ;;  %v3594_v48 = vld [vmem:[%s4558_s1 + $0x468] sm:$0xff]  }
  0x64   :  { %2401 = vmatmul.mubr.bf16.vlgmr.msra.gmra.mrb[8].mxu1 %v2823_v50  ;;  %3231 = vmatpush3.bf16.msra.mxu0 %v3540_v54  ;;  %v3596_v50 = vld [vmem:[%s4558_s1 + $0x428] sm:$0xff]   ;;  %v3600_v54 = vld [vmem:[%s4558_s1 + $0x430] sm:$0xff]  }
  0x65   :  { %3253 = vmatpush3.bf16.msra.mxu1 %v3541_v55  ;;  %3232 = vmatprep.subr.bf16.mxu0 %v3542_v56  ;;  %v3601_v55 = vld [vmem:[%s4558_s1 + $0x4b0] sm:$0xff]   ;;  %v3602_v56 = vld [vmem:[%s4558_s1 + $0x478] sm:$0xff]  }
  0x66   :  { %3254 = vmatprep.subr.bf16.mxu1 %v3543_v57  ;;  %2440 = vmatprep.mubr.bf16.mxu0 %v2826_v25  ;;  %v3603_v57 = vld [vmem:[%s4558_s1 + $0x4f8] sm:$0xff]   ;;  %v3632_v25 = vld [vmem:[%s4558_s1 + $0x528] sm:$0xff]  }
  0x67   :  { %2480 = vmatprep.mubr.bf16.mxu1 %v2828_v27  ;;  %v3634_v27 = vld [vmem:[%s4558_s1 + $0x570] sm:$0xff]  }
  0x68   :  { %3233 = vmatpush3.bf16.msra.mxu0 %v3544_v58  ;;  %v3604_v58 = vld [vmem:[%s4558_s1 + $0x438] sm:$0xff]  }
  0x69   :  { %3255 = vmatpush3.bf16.msra.mxu1 %v3545_v59  ;;  %3234 = vmatprep.subr.bf16.mxu0 %v3546_v60  ;;  %v3605_v59 = vld [vmem:[%s4558_s1 + $0x4b8] sm:$0xff]   ;;  %v23_v60 = vld [vmem:[%s4559_s0 + $0x40] sm:$0xff] }
  0x6a   :  { %3256 = vmatprep.subr.bf16.mxu1 %v3547_v61  ;;  %v24_v61 = vld [vmem:[%s4559_s0 + $0x48] sm:$0xff] }
  0x6c   :  { %3235 = vmatpush3.bf16.msra.mxu0 %v3548_v62  ;;  %v2829_v62 = vcombine.low %v23_v60, %v23_v60 }
  0x6d   :  { %3257 = vmatpush3.bf16.msra.mxu1 %v3549_v63  ;;  %3236 = vmatprep.subr.bf16.mxu0 %v3550_v0  ;;  %v2830_v63 = vcombine.high %v23_v60, %v23_v60  ;;  %v2831_v0 = vcombine.low %v24_v61, %v24_v61  ;;  %v3665_v60 = vld [vmem:[%s4558_s1 + $0x6a0] sm:$0xff]  }
  0x6e   :  { %3258 = vmatprep.subr.bf16.mxu1 %v3551_v2  ;;  %v3610_v2 = vld [vmem:[%s4558_s1 + $0x540] sm:$0xff]  }
  0x70   :  { %3237 = vmatpush3.bf16.msra.mxu0 %v3552_v3  ;;  %v2832_v3 = vcombine.high %v24_v61, %v24_v61  ;;  %v3666_v61 = vld [vmem:[%s4558_s1 + $0x668] sm:$0xff]  }
  0x71   :  { %3259 = vmatpush3.bf16.msra.mxu1 %v3553_v4  ;;  %3238 = vmatprep.subr.bf16.mxu0 %v3554_v5  ;;  %v3611_v4 = vld [vmem:[%s4558_s1 + $0x5c0] sm:$0xff]  }
  0x72   :  { %3260 = vmatprep.subr.bf16.mxu1 %v3555_v6  ;;  %v3612_v5 = vld [vmem:[%s4558_s1 + $0x500] sm:$0xff]  }
  0x73   :  { %v3613_v6 = vld [vmem:[%s4558_s1 + $0x580] sm:$0xff]  }
  0x74   :  { %3239 = vmatpush3.bf16.msra.mxu0 %v3556_v7  ;;  %v3614_v7 = vld [vmem:[%s4558_s1 + $0x548] sm:$0xff]  }
  0x75   :  { %3261 = vmatpush3.bf16.msra.mxu1 %v3557_v8  ;;  %3240 = vmatprep.subr.bf16.mxu0 %v3558_v9  ;;  %v3615_v8 = vld [vmem:[%s4558_s1 + $0x5c8] sm:$0xff]  }
  0x76   :  { %3262 = vmatprep.subr.bf16.mxu1 %v3559_v10  ;;  %v3616_v9 = vld [vmem:[%s4558_s1 + $0x508] sm:$0xff]  }
  0x77   :  { %v3617_v10 = vld [vmem:[%s4558_s1 + $0x588] sm:$0xff]  }
  0x78   :  { %3241 = vmatpush3.bf16.msra.mxu0 %v3560_v11  ;;  %v3618_v11 = vld [vmem:[%s4558_s1 + $0x550] sm:$0xff]  }
  0x79   :  { %3263 = vmatpush3.bf16.msra.mxu1 %v3561_v12  ;;  %3242 = vmatprep.subr.bf16.mxu0 %v3562_v14  ;;  %v3619_v12 = vld [vmem:[%s4558_s1 + $0x5d0] sm:$0xff]  }
  0x7a   :  { %3264 = vmatprep.subr.bf16.mxu1 %v3563_v15  ;;  %v3621_v14 = vld [vmem:[%s4558_s1 + $0x590] sm:$0xff]   ;;  %v3622_v15 = vld [vmem:[%s4558_s1 + $0x558] sm:$0xff]  }
  0x7c   :  { %3243 = vmatpush3.bf16.msra.mxu0 %v3564_v16  ;;  %v3623_v16 = vld [vmem:[%s4558_s1 + $0x5d8] sm:$0xff]  }
  0x7d   :  { %3265 = vmatpush3.bf16.msra.mxu1 %v3565_v17  ;;  %3244 = vmatprep.subr.bf16.mxu0 %v3566_v18  ;;  %v3624_v17 = vld [vmem:[%s4558_s1 + $0x518] sm:$0xff]  }
  0x7e   :  { %3266 = vmatprep.subr.bf16.mxu1 %v3567_v19  ;;  %v3625_v18 = vld [vmem:[%s4558_s1 + $0x598] sm:$0xff]   ;;  %v3626_v19 = vld [vmem:[%s4558_s1 + $0x560] sm:$0xff]  }
  0x80   :  { %3245 = vmatpush3.bf16.msra.mxu0 %v3568_v20  ;;  %v3627_v20 = vld [vmem:[%s4558_s1 + $0x5e0] sm:$0xff]  }
  0x81   :  { %3267 = vmatpush3.bf16.msra.mxu1 %v3569_v21  ;;  %3274 = vmatprep.subr.bf16.mxu0 %v3574_v28  ;;  %v3628_v21 = vld [vmem:[%s4558_s1 + $0x520] sm:$0xff]   ;;  %v3635_v28 = vld [vmem:[%s4558_s1 + $0x5f0] sm:$0xff]  }
  0x82   :  { %3296 = vmatprep.subr.bf16.mxu1 %v3575_v29  ;;  %v3636_v29 = vld [vmem:[%s4558_s1 + $0x530] sm:$0xff]  }
  0x83   :  { %2441 = vmatmul.mubr.bf16.vlgmr.msra.gmra.mrb[12].mxu0 %v2825_v24  ;;  %v3631_v24 = vld [vmem:[%s4558_s1 + $0x5e8] sm:$0xff]  }
  0x84   :  { %2481 = vmatmul.mubr.bf16.vlgmr.msra.gmra.mrb[12].mxu1 %v2827_v26  ;;  %3275 = vmatpush3.bf16.msra.mxu0 %v3576_v30  ;;  %v3633_v26 = vld [vmem:[%s4558_s1 + $0x5a8] sm:$0xff]   ;;  %v3637_v30 = vld [vmem:[%s4558_s1 + $0x5b0] sm:$0xff]  }
  0x85   :  { %3297 = vmatpush3.bf16.msra.mxu1 %v3577_v31  ;;  %3276 = vmatprep.subr.bf16.mxu0 %v3578_v32  ;;  %v3638_v31 = vld [vmem:[%s4558_s1 + $0x578] sm:$0xff]  }
  0x86   :  { %3298 = vmatprep.subr.bf16.mxu1 %v3579_v33  ;;  %2520 = vmatprep.mubr.bf16.mxu0 %v2830_v63  ;;  %v3639_v32 = vld [vmem:[%s4558_s1 + $0x5f8] sm:$0xff]   ;;  %v3668_v63 = vld [vmem:[%s4558_s1 + $0x628] sm:$0xff]  }
  0x87   :  { %2560 = vmatprep.mubr.bf16.mxu1 %v2832_v3  ;;  %v3640_v33 = vld [vmem:[%s4558_s1 + $0x538] sm:$0xff]   ;;  %v3671_v3 = vld [vmem:[%s4558_s1 + $0x6f0] sm:$0xff]  }
  0x88   :  { %3277 = vmatpush3.bf16.msra.mxu0 %v3580_v34  ;;  %v3641_v34 = vld [vmem:[%s4558_s1 + $0x5b8] sm:$0xff]  }
  0x89   :  { %3299 = vmatpush3.bf16.msra.mxu1 %v3581_v35  ;;  %3278 = vmatprep.subr.bf16.mxu0 %v3582_v36  ;;  %v25_v35 = vld [vmem:[%s4559_s0 + $0x50] sm:$0xff] }
  0x8a   :  { %3300 = vmatprep.subr.bf16.mxu1 %v3583_v37  ;;  %v2833_v36 = vcombine.low %v25_v35, %v25_v35  ;;  %v2834_v37 = vcombine.high %v25_v35, %v25_v35 }
  0x8c   :  { %3279 = vmatpush3.bf16.msra.mxu0 %v3584_v38  ;;  %v26_v38 = vld [vmem:[%s4559_s0 + $0x58] sm:$0xff] }
  0x8d   :  { %3301 = vmatpush3.bf16.msra.mxu1 %v3585_v39  ;;  %3280 = vmatprep.subr.bf16.mxu0 %v3586_v40  ;;  %v2835_v39 = vcombine.low %v26_v38, %v26_v38  ;;  %v2836_v40 = vcombine.high %v26_v38, %v26_v38 }
  0x8e   :  { %3302 = vmatprep.subr.bf16.mxu1 %v3587_v41  ;;  %v3646_v41 = vld [vmem:[%s4558_s1 + $0x640] sm:$0xff]  }
  0x90   :  { %3281 = vmatpush3.bf16.msra.mxu0 %v3588_v42  ;;  %v3647_v42 = vld [vmem:[%s4558_s1 + $0x6c0] sm:$0xff]  }
  0x91   :  { %3303 = vmatpush3.bf16.msra.mxu1 %v3589_v43  ;;  %3282 = vmatprep.subr.bf16.mxu0 %v3590_v44  ;;  %v3648_v43 = vld [vmem:[%s4558_s1 + $0x600] sm:$0xff]  }
  0x92   :  { %3304 = vmatprep.subr.bf16.mxu1 %v3591_v45  ;;  %v3649_v44 = vld [vmem:[%s4558_s1 + $0x680] sm:$0xff]   ;;  %v3650_v45 = vld [vmem:[%s4558_s1 + $0x648] sm:$0xff]  }
  0x94   :  { %3283 = vmatpush3.bf16.msra.mxu0 %v3592_v46  ;;  %v3651_v46 = vld [vmem:[%s4558_s1 + $0x6c8] sm:$0xff]  }
  0x95   :  { %3305 = vmatpush3.bf16.msra.mxu1 %v3593_v47  ;;  %3284 = vmatprep.subr.bf16.mxu0 %v3594_v48  ;;  %v3652_v47 = vld [vmem:[%s4558_s1 + $0x608] sm:$0xff]  }
  0x96   :  { %3306 = vmatprep.subr.bf16.mxu1 %v3595_v49  ;;  %v3653_v48 = vld [vmem:[%s4558_s1 + $0x688] sm:$0xff]   ;;  %v3654_v49 = vld [vmem:[%s4558_s1 + $0x650] sm:$0xff]  }
  0x98   :  { %3285 = vmatpush3.bf16.msra.mxu0 %v3596_v50  ;;  %v3655_v50 = vld [vmem:[%s4558_s1 + $0x6d0] sm:$0xff]  }
  0x99   :  { %3307 = vmatpush3.bf16.msra.mxu1 %v3597_v51  ;;  %3286 = vmatprep.subr.bf16.mxu0 %v3598_v52  ;;  %v3656_v51 = vld [vmem:[%s4558_s1 + $0x610] sm:$0xff]  }
  0x9a   :  { %3308 = vmatprep.subr.bf16.mxu1 %v3599_v53  ;;  %v3657_v52 = vld [vmem:[%s4558_s1 + $0x690] sm:$0xff]   ;;  %v3658_v53 = vld [vmem:[%s4558_s1 + $0x658] sm:$0xff]  }
  0x9c   :  { %3287 = vmatpush3.bf16.msra.mxu0 %v3600_v54  ;;  %v3659_v54 = vld [vmem:[%s4558_s1 + $0x6d8] sm:$0xff]  }
  0x9d   :  { %3309 = vmatpush3.bf16.msra.mxu1 %v3601_v55  ;;  %3288 = vmatprep.subr.bf16.mxu0 %v3602_v56  ;;  %v3660_v55 = vld [vmem:[%s4558_s1 + $0x618] sm:$0xff]  }
  0x9e   :  { %3310 = vmatprep.subr.bf16.mxu1 %v3603_v57  ;;  %v3661_v56 = vld [vmem:[%s4558_s1 + $0x698] sm:$0xff]   ;;  %v3662_v57 = vld [vmem:[%s4558_s1 + $0x660] sm:$0xff]  }
  0xa0   :  { %3289 = vmatpush3.bf16.msra.mxu0 %v3604_v58  ;;  %v3663_v58 = vld [vmem:[%s4558_s1 + $0x6e0] sm:$0xff]  }
  0xa1   :  { %3311 = vmatpush3.bf16.msra.mxu1 %v3605_v59  ;;  %3318 = vmatprep.subr.bf16.mxu0 %v3610_v2  ;;  %v3664_v59 = vld [vmem:[%s4558_s1 + $0x620] sm:$0xff]   ;;  %v3670_v2 = vld [vmem:[%s4558_s1 + $0x670] sm:$0xff]  }
  0xa2   :  { %3340 = vmatprep.subr.bf16.mxu1 %v3611_v4  ;;  %v3672_v4 = vld [vmem:[%s4558_s1 + $0x630] sm:$0xff]  }
  0xa3   :  { %2521 = vmatmul.mubr.bf16.vlgmr.msra.gmra.mrb[16].mxu0 %v2829_v62  ;;  %v3667_v62 = vld [vmem:[%s4558_s1 + $0x6e8] sm:$0xff]  }
  0xa4   :  { %2561 = vmatmul.mubr.bf16.vlgmr.msra.gmra.mrb[16].mxu1 %v2831_v0  ;;  %3319 = vmatpush3.bf16.msra.mxu0 %v3612_v5  ;;  %v3669_v0 = vld [vmem:[%s4558_s1 + $0x6a8] sm:$0xff]   ;;  %v3673_v5 = vld [vmem:[%s4558_s1 + $0x6b0] sm:$0xff]  }
  0xa5   :  { %3341 = vmatpush3.bf16.msra.mxu1 %v3613_v6  ;;  %3320 = vmatprep.subr.bf16.mxu0 %v3614_v7  ;;  %v3674_v6 = vld [vmem:[%s4558_s1 + $0x678] sm:$0xff]  }
  0xa6   :  { %3342 = vmatprep.subr.bf16.mxu1 %v3615_v8  ;;  %2600 = vmatprep.mubr.bf16.mxu0 %v2834_v37  ;;  %v3675_v7 = vld [vmem:[%s4558_s1 + $0x6f8] sm:$0xff]  }
  0xa7   :  { %2640 = vmatprep.mubr.bf16.mxu1 %v2836_v40  ;;  %v3676_v8 = vld [vmem:[%s4558_s1 + $0x638] sm:$0xff]   ;;  %v3699_v40 = vld [vmem:[%s4558_s1 + $0x7a8] sm:$0xff]  }
  0xa8   :  { %3321 = vmatpush3.bf16.msra.mxu0 %v3616_v9  ;;  %v3677_v9 = vld [vmem:[%s4558_s1 + $0x6b8] sm:$0xff]  }
  0xa9   :  { %3343 = vmatpush3.bf16.msra.mxu1 %v3617_v10  ;;  %3322 = vmatprep.subr.bf16.mxu0 %v3618_v11  ;;  %v27_v10 = vld [vmem:[%s4559_s0 + $0x60] sm:$0xff]  ;;  %v28_v11 = vld [vmem:[%s4559_s0 + $0x68] sm:$0xff] }
  0xaa   :  { %3344 = vmatprep.subr.bf16.mxu1 %v3619_v12  ;;  %v2837_v12 = vcombine.low %v27_v10, %v27_v10 }
  0xac   :  { %3323 = vmatpush3.bf16.msra.mxu0 %v3620_v13  ;;  %v2838_v13 = vcombine.high %v27_v10, %v27_v10 }
  0xad   :  { %3345 = vmatpush3.bf16.msra.mxu1 %v3621_v14  ;;  %3324 = vmatprep.subr.bf16.mxu0 %v3622_v15  ;;  %v2839_v14 = vcombine.low %v28_v11, %v28_v11  ;;  %v2840_v15 = vcombine.high %v28_v11, %v28_v11 }
  0xae   :  { %3346 = vmatprep.subr.bf16.mxu1 %v3623_v16  ;;  %v3682_v16 = vld [vmem:[%s4558_s1 + $0x740] sm:$0xff]  }
  0xb0   :  { %3325 = vmatpush3.bf16.msra.mxu0 %v3624_v17  ;;  %v3683_v17 = vld [vmem:[%s4558_s1 + $0x700] sm:$0xff]  }
  0xb1   :  { %3347 = vmatpush3.bf16.msra.mxu1 %v3625_v18  ;;  %3326 = vmatprep.subr.bf16.mxu0 %v3626_v19  ;;  %v3684_v18 = vld [vmem:[%s4558_s1 + $0x780] sm:$0xff]   ;;  %v3685_v19 = vld [vmem:[%s4558_s1 + $0x748] sm:$0xff]  }
  0xb2   :  { %3348 = vmatprep.subr.bf16.mxu1 %v3627_v20  ;;  %v3686_v20 = vld [vmem:[%s4558_s1 + $0x708] sm:$0xff]  }
  0xb4   :  { %3327 = vmatpush3.bf16.msra.mxu0 %v3628_v21  ;;  %v3687_v21 = vld [vmem:[%s4558_s1 + $0x788] sm:$0xff]  }
  0xb5   :  { %3349 = vmatpush3.bf16.msra.mxu1 %v3629_v22  ;;  %3328 = vmatprep.subr.bf16.mxu0 %v3630_v23  ;;  %v3688_v22 = vld [vmem:[%s4558_s1 + $0x750] sm:$0xff]  }
  0xb6   :  { %3350 = vmatprep.subr.bf16.mxu1 %v3631_v24  ;;  %v3689_v23 = vld [vmem:[%s4558_s1 + $0x710] sm:$0xff]  }
  0xb7   :  { %v3690_v24 = vld [vmem:[%s4558_s1 + $0x790] sm:$0xff]  }
  0xb8   :  { %3329 = vmatpush3.bf16.msra.mxu0 %v3632_v25  ;;  %v3691_v25 = vld [vmem:[%s4558_s1 + $0x758] sm:$0xff]  }
  0xb9   :  { %3351 = vmatpush3.bf16.msra.mxu1 %v3633_v26  ;;  %3330 = vmatprep.subr.bf16.mxu0 %v3634_v27  ;;  %v3692_v26 = vld [vmem:[%s4558_s1 + $0x718] sm:$0xff]  }
  0xba   :  { %3352 = vmatprep.subr.bf16.mxu1 %v3635_v28  ;;  %v3693_v27 = vld [vmem:[%s4558_s1 + $0x798] sm:$0xff]   ;;  %v3694_v28 = vld [vmem:[%s4558_s1 + $0x760] sm:$0xff]  }
  0xbc   :  { %3331 = vmatpush3.bf16.msra.mxu0 %v3636_v29  ;;  %v3695_v29 = vld [vmem:[%s4558_s1 + $0x720] sm:$0xff]  }
  0xbd   :  { %3353 = vmatpush3.bf16.msra.mxu1 %v3637_v30  ;;  %3332 = vmatprep.subr.bf16.mxu0 %v3638_v31  ;;  %v3696_v30 = vld [vmem:[%s4558_s1 + $0x7a0] sm:$0xff]   ;;  %v3697_v31 = vld [vmem:[%s4558_s1 + $0x768] sm:$0xff]  }
  0xbe   :  { %3354 = vmatprep.subr.bf16.mxu1 %v3639_v32 }
  0xc0   :  { %3333 = vmatpush3.bf16.msra.mxu0 %v3640_v33 }
  0xc1   :  { %3355 = vmatpush3.bf16.msra.mxu1 %v3641_v34  ;;  %3362 = vmatprep.subr.bf16.mxu0 %v3646_v41 }
  0xc2   :  { %3384 = vmatprep.subr.bf16.mxu1 %v3647_v42  ;;  %v3700_v42 = vld [vmem:[%s4558_s1 + $0x770] sm:$0xff]  }
  0xc3   :  { %2601 = vmatmul.mubr.bf16.vlgmr.msra.gmra.mrb[20].mxu0 %v2833_v36  ;;  %v3698_v36 = vld [vmem:[%s4558_s1 + $0x728] sm:$0xff]  }
  0xc4   :  { %2641 = vmatmul.mubr.bf16.vlgmr.msra.gmra.mrb[20].mxu1 %v2835_v39  ;;  %3363 = vmatpush3.bf16.msra.mxu0 %v3648_v43  ;;  %v539_v43 = vpop.permute.xlu0 %538 }
  0xc5   :  { %3385 = vmatpush3.bf16.msra.mxu1 %v3649_v44  ;;  %3364 = vmatprep.subr.bf16.mxu0 %v3650_v45 }
  0xc6   :  { %3386 = vmatprep.subr.bf16.mxu1 %v3651_v46  ;;  %2680 = vmatprep.mubr.bf16.mxu0 %v2838_v13  ;;  %v3701_v46 = vld [vmem:[%s4558_s1 + $0x730] sm:$0xff]  }
  0xc7   :  { %2720 = vmatprep.mubr.bf16.mxu1 %v2840_v15 }
  0xc8   :  { %3365 = vmatpush3.bf16.msra.mxu0 %v3652_v47 }
  0xc9   :  { %3387 = vmatpush3.bf16.msra.mxu1 %v3653_v48  ;;  %3366 = vmatprep.subr.bf16.mxu0 %v3654_v49  ;;  %v29_v48 = vld [vmem:[%s4559_s0 + $0x70] sm:$0xff] }
  0xca   :  { %3388 = vmatprep.subr.bf16.mxu1 %v3655_v50  ;;  %v3702_v50 = vld [vmem:[%s4558_s1 + $0x7b0] sm:$0xff]  }
  0xcc   :  { %3367 = vmatpush3.bf16.msra.mxu0 %v3656_v51  ;;  %v2842_v51 = vcombine.high %v29_v48, %v29_v48 }
  0xcd   :  { %3389 = vmatpush3.bf16.msra.mxu1 %v3657_v52  ;;  %3368 = vmatprep.subr.bf16.mxu0 %v3658_v53  ;;  %v3703_v52 = vld [vmem:[%s4558_s1 + $0x778] sm:$0xff]  }
  0xce   :  { %3390 = vmatprep.subr.bf16.mxu1 %v3659_v54  ;;  %v30_v53 = vld [vmem:[%s4559_s0 + $0x78] sm:$0xff] }
  0xcf   :  { %v3704_v54 = vld [vmem:[%s4558_s1 + $0x738] sm:$0xff]  }
  0xd0   :  { %3369 = vmatpush3.bf16.msra.mxu0 %v3660_v55  ;;  %v3705_v55 = vld [vmem:[%s4558_s1 + $0x7b8] sm:$0xff]  }
  0xd1   :  { %3391 = vmatpush3.bf16.msra.mxu1 %v3661_v56  ;;  %3370 = vmatprep.subr.bf16.mxu0 %v3662_v57  ;;  %v2844_v56 = vcombine.high %v30_v53, %v30_v53  ;;  %v2841_v57 = vcombine.low %v29_v48, %v29_v48 }
  0xd2   :  { %3392 = vmatprep.subr.bf16.mxu1 %v3663_v58  ;;  %v3708_v58 = vld [vmem:[%s4558_s1 + $0x7c0] sm:$0xff]  }
  0xd4   :  { %3371 = vmatpush3.bf16.msra.mxu0 %v3664_v59  ;;  %v3709_v59 = vld [vmem:[%s4558_s1 + $0x7c8] sm:$0xff]  }
  0xd5   :  { %3393 = vmatpush3.bf16.msra.mxu1 %v3665_v60  ;;  %3372 = vmatprep.subr.bf16.mxu0 %v3666_v61  ;;  %v3710_v60 = vld [vmem:[%s4558_s1 + $0x7d0] sm:$0xff]   ;;  %v3711_v61 = vld [vmem:[%s4558_s1 + $0x7d8] sm:$0xff]  }
  0xd6   :  { %3394 = vmatprep.subr.bf16.mxu1 %v3667_v62  ;;  %v2843_v62 = vcombine.low %v30_v53, %v30_v53 }
  0xd8   :  { %3373 = vmatpush3.bf16.msra.mxu0 %v3668_v63 }
  0xd9   :  { %3395 = vmatpush3.bf16.msra.mxu1 %v3669_v0  ;;  %3374 = vmatprep.subr.bf16.mxu0 %v3670_v2 }
  0xda   :  { %3396 = vmatprep.subr.bf16.mxu1 %v3671_v3 }
  0xdc   :  { %3375 = vmatpush3.bf16.msra.mxu0 %v3672_v4 }
  0xdd   :  { %3397 = vmatpush3.bf16.msra.mxu1 %v3673_v5  ;;  %3376 = vmatprep.subr.bf16.mxu0 %v3674_v6 }
  0xde   :  { %3398 = vmatprep.subr.bf16.mxu1 %v3675_v7 }
  0xe0   :  { %3377 = vmatpush3.bf16.msra.mxu0 %v3676_v8 }
  0xe1   :  { %3399 = vmatpush3.bf16.msra.mxu1 %v3677_v9  ;;  %3406 = vmatprep.subr.bf16.mxu0 %v3682_v16 }
  0xe2   :  { %2768 = vmatprep.subr.bf16.mxu1 %v3714_v1 }
  0xe3   :  { %2681 = vmatmul.mubr.bf16.vlgmr.msra.gmra.mrb[24].mxu0 %v2837_v12 }
  0xe4   :  { %2721 = vmatmul.mubr.bf16.vlgmr.msra.gmra.mrb[24].mxu1 %v2839_v14  ;;  %3407 = vmatpush3.bf16.msra.mxu0 %v3683_v17 }
  0xe5   :  { %2769 = vmatpush1.bf16.msra.mxu1 %v3684_v18  ;;  %3408 = vmatprep.subr.bf16.mxu0 %v3685_v19 }
  0xe6   :  { %2770 = vmatprep.subr.bf16.mxu1 %v3714_v1  ;;  %2760 = vmatprep.mubr.bf16.mxu0 %v2842_v51 }
  0xe7   :  { %3097 = vmatprep.mubr.msk.bf16.mxu1 %vm2164_vm0, %v2844_v56 }
  0xe8   :  { %3409 = vmatpush3.bf16.msra.mxu0 %v3686_v20 }
  0xe9   :  { %2771 = vmatpush1.bf16.msra.mxu1 %v3687_v21  ;;  %3410 = vmatprep.subr.bf16.mxu0 %v3688_v22 }
  0xea   :  { %2772 = vmatprep.subr.bf16.mxu1 %v3714_v1 }
  0xec   :  { %3411 = vmatpush3.bf16.msra.mxu0 %v3689_v23 }
  0xed   :  { %2773 = vmatpush1.bf16.msra.mxu1 %v3690_v24  ;;  %3412 = vmatprep.subr.bf16.mxu0 %v3691_v25 }
  0xee   :  { %2774 = vmatprep.subr.bf16.mxu1 %v3714_v1 }
  0xf0   :  { %3413 = vmatpush3.bf16.msra.mxu0 %v3692_v26 }
  0xf1   :  { %2775 = vmatpush1.bf16.msra.mxu1 %v3693_v27  ;;  %3414 = vmatprep.subr.bf16.mxu0 %v3694_v28 }
  0xf2   :  { %2776 = vmatprep.subr.bf16.mxu1 %v3714_v1 }
  0xf4   :  { %3415 = vmatpush3.bf16.msra.mxu0 %v3695_v29 }
  0xf5   :  { %2777 = vmatpush1.bf16.msra.mxu1 %v3696_v30  ;;  %3416 = vmatprep.subr.bf16.mxu0 %v3697_v31 }
  0xf6   :  { %v3114_v32 = vpop.f32.mrb[0].mxu0  ;;  %2778 = vmatprep.subr.bf16.mxu1 %v3714_v1 }
  0xf7   :  { %v3136_v33 = vpop.f32.mrb[0].mxu1  ;;  %v3115_v34 = vpop.f32.mrb[1].mxu0 }
  0xf8   :  { %v3137_v35 = vpop.f32.mrb[1].mxu1  ;;  %v3116_v37 = vadd.f32 %v3115_v34, %v3114_v32  ;;  %v3117_v45 = vpop.f32.mrb[2].mxu0  ;;  %3417 = vmatpush3.bf16.msra.mxu0 %v3698_v36 }
  0xf9   :  { %v3138_v38 = vadd.f32 %v3137_v35, %v3136_v33  ;;  %v3139_v39 = vpop.f32.mrb[2].mxu1  ;;  %v3118_v47 = vpop.f32.mrb[3].mxu0  ;;  %2779 = vmatpush1.bf16.msra.mxu1 %v3699_v40  ;;  %3418 = vmatprep.subr.bf16.mxu0 %v3700_v42 }
  0xfa   :  { %v3140_v41 = vpop.f32.mrb[3].mxu1  ;;  %v2203_v44 = vadd.f32 %v3116_v37, %v539_v43  ;;  %2780 = vmatprep.subr.bf16.mxu1 %v3714_v1 }
  0xfc   :  { %v2243_v49 = vadd.f32 %v3138_v38, %v2203_v44  ;;  %3419 = vmatpush3.bf16.msra.mxu0 %v3701_v46 }
  0xfd   :  { %2781 = vmatpush1.bf16.msra.mxu1 %v3702_v50  ;;  %3420 = vmatprep.subr.bf16.mxu0 %v3703_v52 }
  0xfe   :  { %2782 = vmatprep.subr.bf16.mxu1 %v3714_v1 }
 0x100   :  { %3421 = vmatpush3.bf16.msra.mxu0 %v3704_v54 }
 0x101   :  { %2783 = vmatpush1.bf16.msra.mxu1 %v3705_v55 }
 0x102   :  { %2784 = vmatprep.subr.bf16.mxu1 %v3714_v1 }
 0x103   :  { %2761 = vmatmul.mubr.bf16.vlgmr.msra.gmra.mrb[28].mxu0 %v2841_v57 }
 0x105   :  { %2785 = vmatpush1.bf16.msra.mxu1 %v3708_v58 }
 0x106   :  { %2786 = vmatprep.subr.bf16.mxu1 %v3714_v1 }
 0x109   :  { %2787 = vmatpush1.bf16.msra.mxu1 %v3709_v59 }
 0x10a   :  { %2788 = vmatprep.subr.bf16.mxu1 %v3714_v1 }
 0x10d   :  { %2789 = vmatpush1.bf16.msra.mxu1 %v3710_v60 }
 0x10e   :  { %2790 = vmatprep.subr.bf16.mxu1 %v3714_v1 }
 0x111   :  { %2791 = vmatpush1.bf16.msra.mxu1 %v3711_v61 }
 0x114   :  { %2801 = vmatmul.mubr.bf16.vlgmr.msra.gmra.mrb[28].mxu1 %v2843_v62 }
 0x116   :  { %v3158_v63 = vpop.f32.mrb[4].mxu0 }
 0x117   :  { %v3180_v0 = vpop.f32.mrb[4].mxu1  ;;  %v3159_v2 = vpop.f32.mrb[5].mxu0 }
 0x118   :  { %v3181_v3 = vpop.f32.mrb[5].mxu1  ;;  %v3160_v4 = vadd.f32 %v3159_v2, %v3158_v63  ;;  %v3161_v7 = vpop.f32.mrb[6].mxu0 }
 0x119   :  { %v3182_v5 = vadd.f32 %v3181_v3, %v3180_v0  ;;  %v3183_v6 = vpop.f32.mrb[6].mxu1  ;;  %v3162_v9 = vpop.f32.mrb[7].mxu0 }
 0x11a   :  { %v3184_v8 = vpop.f32.mrb[7].mxu1  ;;  %v2283_v10 = vadd.f32 %v3160_v4, %v2243_v49 }
 0x11c   :  { %v2323_v11 = vadd.f32 %v3182_v5, %v2283_v10 }
 0x136   :  { %v3202_v12 = vpop.f32.mrb[8].mxu0 }
 0x137   :  { %v3224_v13 = vpop.f32.mrb[8].mxu1  ;;  %v3203_v14 = vpop.f32.mrb[9].mxu0 }
 0x138   :  { %v3204_v15 = vadd.f32 %v3203_v14, %v3202_v12  ;;  %v3225_v1 = vpop.f32.mrb[9].mxu1  ;;  %v3205_v16 = vpop.f32.mrb[10].mxu0 }
 0x139   :  { %v3226_v17 = vadd.f32 %v3225_v1, %v3224_v13  ;;  %v3227_v18 = vpop.f32.mrb[10].mxu1  ;;  %v3206_v19 = vpop.f32.mrb[11].mxu0 }
 0x13a   :  { %v2363_v20 = vadd.f32 %v3204_v15, %v2323_v11  ;;  %v3228_v21 = vpop.f32.mrb[11].mxu1 }
 0x13c   :  { %v2403_v22 = vadd.f32 %v3226_v17, %v2363_v20 }
 0x156   :  { %v3246_v23 = vpop.f32.mrb[12].mxu0 }
 0x157   :  { %v3268_v24 = vpop.f32.mrb[12].mxu1  ;;  %v3247_v25 = vpop.f32.mrb[13].mxu0 }
 0x158   :  { %v3248_v26 = vadd.f32 %v3247_v25, %v3246_v23  ;;  %v3269_v27 = vpop.f32.mrb[13].mxu1  ;;  %v3249_v28 = vpop.f32.mrb[14].mxu0 }
 0x159   :  { %v3270_v29 = vadd.f32 %v3269_v27, %v3268_v24  ;;  %v3271_v30 = vpop.f32.mrb[14].mxu1  ;;  %v3250_v31 = vpop.f32.mrb[15].mxu0 }
 0x15a   :  { %v2443_v32 = vadd.f32 %v3248_v26, %v2403_v22  ;;  %v3272_v33 = vpop.f32.mrb[15].mxu1 }
 0x15c   :  { %v2483_v34 = vadd.f32 %v3270_v29, %v2443_v32 }
 0x176   :  { %v3290_v35 = vpop.f32.mrb[16].mxu0 }
 0x177   :  { %v3312_v36 = vpop.f32.mrb[16].mxu1  ;;  %v3291_v37 = vpop.f32.mrb[17].mxu0 }
 0x178   :  { %v3292_v38 = vadd.f32 %v3291_v37, %v3290_v35  ;;  %v3313_v39 = vpop.f32.mrb[17].mxu1  ;;  %v3293_v40 = vpop.f32.mrb[18].mxu0 }
 0x179   :  { %v3314_v41 = vadd.f32 %v3313_v39, %v3312_v36  ;;  %v3315_v42 = vpop.f32.mrb[18].mxu1  ;;  %v3294_v43 = vpop.f32.mrb[19].mxu0 }
 0x17a   :  { %v2523_v44 = vadd.f32 %v3292_v38, %v2483_v34  ;;  %v3316_v45 = vpop.f32.mrb[19].mxu1 }
 0x17c   :  { %v2563_v46 = vadd.f32 %v3314_v41, %v2523_v44 }
 0x196   :  { %v3334_v47 = vpop.f32.mrb[20].mxu0 }
 0x197   :  { %v3356_v48 = vpop.f32.mrb[20].mxu1  ;;  %v3335_v49 = vpop.f32.mrb[21].mxu0 }
 0x198   :  { %v3357_v50 = vpop.f32.mrb[21].mxu1  ;;  %v3336_v51 = vadd.f32 %v3335_v49, %v3334_v47  ;;  %v3337_v54 = vpop.f32.mrb[22].mxu0 }
 0x199   :  { %v3358_v52 = vadd.f32 %v3357_v50, %v3356_v48  ;;  %v3359_v53 = vpop.f32.mrb[22].mxu1  ;;  %v3338_v56 = vpop.f32.mrb[23].mxu0 }
 0x19a   :  { %v3360_v55 = vpop.f32.mrb[23].mxu1  ;;  %v2603_v57 = vadd.f32 %v3336_v51, %v2563_v46 }
 0x19c   :  { %v2643_v58 = vadd.f32 %v3358_v52, %v2603_v57 }
 0x1b6   :  { %v3378_v59 = vpop.f32.mrb[24].mxu0 }
 0x1b7   :  { %v3400_v60 = vpop.f32.mrb[24].mxu1  ;;  %v3379_v61 = vpop.f32.mrb[25].mxu0 }
 0x1b8   :  { %v3380_v62 = vadd.f32 %v3379_v61, %v3378_v59  ;;  %v3401_v63 = vpop.f32.mrb[25].mxu1  ;;  %v3381_v0 = vpop.f32.mrb[26].mxu0 }
 0x1b9   :  { %v3402_v2 = vadd.f32 %v3401_v63, %v3400_v60  ;;  %v3403_v3 = vpop.f32.mrb[26].mxu1  ;;  %v3382_v4 = vpop.f32.mrb[27].mxu0 }
 0x1ba   :  { %v2683_v5 = vadd.f32 %v3380_v62, %v2643_v58  ;;  %v3404_v6 = vpop.f32.mrb[27].mxu1 }
 0x1bc   :  { %v2723_v7 = vadd.f32 %v3402_v2, %v2683_v5 }
 0x1d6   :  { %v3422_v8 = vpop.f32.mrb[28].mxu0 }
 0x1d7   :  { %v3423_v9 = vpop.f32.mrb[29].mxu0 }
 0x1d8   :  { %v3424_v10 = vadd.f32 %v3423_v9, %v3422_v8  ;;  %v3425_v11 = vpop.f32.mrb[30].mxu0 }
 0x1d9   :  { %v3426_v12 = vpop.f32.mrb[31].mxu0 }
 0x1da   :  { %v2763_v13 = vadd.f32 %v3424_v10, %v2723_v7 }
 0x1e7   :  { %v2802_v14 = vpop.f32.mrb[28].mxu1 }
 0x1e8   :  { %v2803_v15 = vadd.f32 %v2802_v14, %v2763_v13  ;;  %v2804_v1 = vpop.f32.mrb[29].mxu1 }
 0x1e9   :  { %v2805_v16 = vpop.f32.mrb[30].mxu1 }
 0x1ea   :  { %2808 = vst [vmem:[%s4561_s3] sm:$0xff] %v2803_v15  ;;  %v2806_v17 = vpop.f32.mrb[31].mxu1 }

</bundles_post_ra>
